<compile_context>
chip_gen: v6e
topology: v6e:2x2x1
jax: 0.10.0
libtpu: 0.0.40
codegen_flags: <defaults>
</compile_context>

<pallas_src>
import jax
import jax.numpy as jnp
from jax import lax
from jax.experimental import pallas as pl
from jax.experimental.pallas import tpu as pltpu

EPS = 1e-5                  # PyTorch InstanceNorm2d default
MXU_DTYPE = jnp.bfloat16    # MXU-native operand dtype; set to jnp.float32 for
                            # bit-tighter agreement with the f32 reference.


def _make_kernel(C, H, W, Hp, Wpad, RPG):
    HWpad = H * Wpad
    CHUNK = RPG * W
    inv_hw = 1.0 / float(H * W)

    def put_row(pbuf, y, irow):
        # irow: (C, W) source row in MXU_DTYPE (for padded row y).
        # band0[x] = padded[y, x]   = [reflect(col 1), cols 0..W-2]
        # band1[x] = padded[y, x+1] = cols 0..W-1  (the row itself)
        # band2[x] = padded[y, x+2] = [cols 1..W-1, reflect(col W-2)]
        # Only columns [0, W) of each band are ever read by valid outputs.
        b0 = jnp.concatenate([irow[:, 1:2], irow[:, : W - 1]], axis=1)
        b2 = jnp.concatenate([irow[:, 1:], irow[:, W - 2 : W - 1]], axis=1)
        pbuf[:, pl.ds(y * Wpad, W)] = jnp.concatenate([b0, irow, b2], axis=0)

    def conv_in(pbuf, w_ref, mask):
        # 3x3 conv with dx folded into the contraction: 3 deep bf16 MXU
        # matmuls on lane-aligned dy windows, f32 accumulation.
        acc = jnp.dot(w_ref[0], pbuf[:, pl.ds(0 * Wpad, HWpad)],
                      preferred_element_type=jnp.float32)
        acc = acc + jnp.dot(w_ref[1], pbuf[:, pl.ds(1 * Wpad, HWpad)],
                            preferred_element_type=jnp.float32)
        acc = acc + jnp.dot(w_ref[2], pbuf[:, pl.ds(2 * Wpad, HWpad)],
                            preferred_element_type=jnp.float32)
        # InstanceNorm2d (affine=False): stats over the H*W valid columns only
        # (jnp.where keeps uninitialized-margin garbage out of the sums).
        masked = jnp.where(mask, acc, 0.0)
        mean = jnp.sum(masked, axis=1, keepdims=True) * inv_hw
        d = acc - mean
        dm = jnp.where(mask, d, 0.0)
        var = jnp.sum(dm * dm, axis=1, keepdims=True) * inv_hw
        return d * lax.rsqrt(var + EPS)       # (C, H*Wpad) f32; margins unused

    def kernel(x_ref, w1_ref, w2_ref, mask_ref, out_ref, pbuf):
        mask = mask_ref[...] != 0.0           # (1, H*Wpad) valid-column mask

        # ---- build dx-stacked, reflect-padded bands for conv1 from x ----
        if RPG > 1:
            for g in range(H // RPG):         # 128-lane-aligned wide x loads
                xc = x_ref[:, pl.ds(g * CHUNK, CHUNK)].astype(MXU_DTYPE)
                for j in range(RPG):
                    put_row(pbuf, g * RPG + j + 1, xc[:, j * W : (j + 1) * W])
        else:
            for r in range(H):
                put_row(pbuf, r + 1,
                        x_ref[:, pl.ds(r * W, W)].astype(MXU_DTYPE))
        # Reflect rows: padded row 0 <- input row 1, padded row Hp-1 <- row H-2.
        put_row(pbuf, 0, x_ref[:, pl.ds(W, W)].astype(MXU_DTYPE))
        put_row(pbuf, Hp - 1, x_ref[:, pl.ds((H - 2) * W, W)].astype(MXU_DTYPE))

        # ConvBlock 1: conv -> InstanceNorm -> ReLU.
        y1 = jnp.maximum(conv_in(pbuf, w1_ref, mask), 0.0).astype(MXU_DTYPE)

        # ---- rebuild bands for conv2 from y1 (never leaves VMEM) ----
        for r in range(H):
            put_row(pbuf, r + 1, y1[:, r * Wpad : r * Wpad + W])
        put_row(pbuf, 0, y1[:, Wpad : Wpad + W])
        put_row(pbuf, Hp - 1, y1[:, (H - 2) * Wpad : (H - 2) * Wpad + W])

        # ConvBlock 2: conv -> InstanceNorm (no activation).
        y2 = conv_in(pbuf, w2_ref, mask)

        # ---- residual add; packed 128-lane-aligned output stores ----
        if RPG > 1:
            for g in range(H // RPG):
                rows = [y2[:, (g * RPG + j) * Wpad : (g * RPG + j) * Wpad + W]
                        for j in range(RPG)]
                blk = jnp.concatenate(rows, axis=1)              # (C, CHUNK)
                xin = x_ref[:, pl.ds(g * CHUNK, CHUNK)].astype(jnp.float32)
                out_ref[:, pl.ds(g * CHUNK, CHUNK)] = (
                    xin + blk).astype(out_ref.dtype)
        else:
            for r in range(H):
                xin = x_ref[:, pl.ds(r * W, W)].astype(jnp.float32)
                out_ref[:, pl.ds(r * W, W)] = (
                    xin + y2[:, r * Wpad : r * Wpad + W]).astype(out_ref.dtype)

    return kernel


def residual_block(x, w1, b1, w2, b2):
    """x: (N, C, H, W). Weights: (C, C, 3, 3). Biases: (C,) (accepted but unused:
    a per-channel constant bias is cancelled exactly by the affine=False
    InstanceNorm that follows each conv)."""
    del b1, b2
    N, C, H, W = x.shape
    Hp, Wp = H + 2, W + 2
    Wpad = ((Wp + 127) // 128) * 128          # 128-lane-aligned row slab
    HW = H * W
    HWpad = H * Wpad
    # Rows packed per aligned 128-lane store/load (falls back to 1 otherwise).
    RPG = 128 // W if (W <= 128 and 128 % W == 0 and H % (128 // W) == 0) else 1

    # Weight layout: wmat[dy, co, dx*C + ci] = w[co, ci, dy, dx]  -> (3, C, 3C).
    def prep_w(w):
        return jnp.transpose(w, (2, 0, 3, 1)).reshape(3, C, 3 * C).astype(MXU_DTYPE)

    x_flat = x.reshape(N, C, HW)
    w1m, w2m = prep_w(w1), prep_w(w2)
    col_valid = (jnp.arange(Wpad, dtype=jnp.int32) < W).astype(jnp.float32)
    mask = jnp.tile(col_valid, (H,)).reshape(1, HWpad)

    kernel = _make_kernel(C, H, W, Hp, Wpad, RPG)

    # VMEM budget: band scratch + double-buffered I/O + weights + temporaries.
    # TODO(synk): at very large C/H on v7x (64 MiB VMEM) channel tiling would
    # be needed; constant-index weight specs could also use pl.Buffered(1).
    itemsize = jnp.dtype(x.dtype).itemsize
    need = (3 * C * Hp * Wpad * 2                 # bf16 band scratch
            + 2 * 2 * C * HW * itemsize           # x/out blocks, double buffered
            + 2 * 2 * 3 * C * 3 * C * 2           # weights, double buffered
            + 3 * C * HWpad * 4                   # acc / y1 / y2 temporaries
            + (4 << 20))                          # headroom
    vmem_limit = int(min(max(need, 32 << 20), 64 << 20))

    out_flat = pl.pallas_call(
        kernel,
        out_shape=jax.ShapeDtypeStruct((N, C, HW), x.dtype),
        grid=(N,),
        in_specs=[
            pl.BlockSpec((None, C, HW), lambda n: (n, 0, 0)),
            pl.BlockSpec((3, C, 3 * C), lambda n: (0, 0, 0)),
            pl.BlockSpec((3, C, 3 * C), lambda n: (0, 0, 0)),
            pl.BlockSpec((1, HWpad), lambda n: (0, 0)),
        ],
        out_specs=pl.BlockSpec((None, C, HW), lambda n: (n, 0, 0)),
        scratch_shapes=[pltpu.VMEM((3 * C, Hp * Wpad), MXU_DTYPE)],
        compiler_params=pltpu.CompilerParams(
            dimension_semantics=("parallel",),
            vmem_limit_bytes=vmem_limit),
    )(x_flat, w1m, w2m, mask)
    return out_flat.reshape(N, C, H, W)


def _reflect_pad(x):
    return jnp.pad(x, ((0, 0), (0, 0), (1, 1), (1, 1)), mode="reflect")


def residual_block_ref(x, w1, b1, w2, b2):
    """Pure-JAX f32 reference reproducing the PyTorch forward semantics."""
    def convblock(inp, w, b, act):
        xp = _reflect_pad(inp)
        y = lax.conv_general_dilated(
            xp, w, window_strides=(1, 1), padding="VALID",
            dimension_numbers=("NCHW", "OIHW", "NCHW"))
        y = y + b[None, :, None, None]
        mean = y.mean(axis=(2, 3), keepdims=True)
        var = ((y - mean) ** 2).mean(axis=(2, 3), keepdims=True)
        y = (y - mean) / jnp.sqrt(var + EPS)
        return jnp.maximum(y, 0.0) if act else y

    y = convblock(x, w1, b1, act=True)
    y = convblock(y, w2, b2, act=False)
    return x + y


if __name__ == "__main__":
    N, C, H, W = 2, 4, 16, 16

    key = jax.random.PRNGKey(0)
    kx, kw1, kb1, kw2, kb2 = jax.random.split(key, 5)

    x = jax.random.normal(kx, (N, C, H, W), dtype=jnp.float32)
    # Deterministic synthetic parameters (Conv2d default has bias=True).
    fan_in = C * 3 * 3
    bound = 1.0 / (fan_in ** 0.5)
    w1 = jax.random.uniform(kw1, (C, C, 3, 3), jnp.float32, -bound, bound)
    b1 = jax.random.uniform(kb1, (C,), jnp.float32, -bound, bound)
    w2 = jax.random.uniform(kw2, (C, C, 3, 3), jnp.float32, -bound, bound)
    b2 = jax.random.uniform(kb2, (C,), jnp.float32, -bound, bound)

    out = jax.jit(residual_block)(x, w1, b1, w2, b2)
    out = jax.block_until_ready(out)

    ref = residual_block_ref(x, w1, b1, w2, b2)
    assert out.shape == (N, C, H, W)
    # Tolerance accounts for bf16 MXU operands (f32 accumulation / f32
    # InstanceNorm stats) vs the pure-f32 XLA reference; the two cascaded
    # instance-normalized convs amplify the ~2^-9 bf16 rounding to O(1e-2).
    assert jnp.allclose(out, ref, atol=4e-2, rtol=2e-2), (
        float(jnp.max(jnp.abs(out - ref))))

    print("KERNEL_OK")
</pallas_src>

<mosaic_0001>
module attributes {stable_mosaic.version = 11 : i64} {
  func.func @kernel(%arg0: i32, %arg1: memref<1x4x256xf32, #tpu.memory_space<vmem>>, %arg2: memref<3x4x12xbf16, #tpu.memory_space<vmem>>, %arg3: memref<3x4x12xbf16, #tpu.memory_space<vmem>>, %arg4: memref<1x2048xf32, #tpu.memory_space<vmem>>, %arg5: memref<1x4x256xf32, #tpu.memory_space<vmem>>, %arg6: memref<12x2304xbf16, #tpu.memory_space<vmem>>) attributes {dimension_semantics = [#tpu.dimension_semantics<parallel>], iteration_bounds = array<i64: 2>, scalar_prefetch = 0 : i64, scratch_operands = 1 : i64, tpu.core_type = #tpu.core_type<tc>, window_params = [{transform_indices = @transform_0, window_bounds = array<i64: 1, 4, 256>}, {pipeline_mode = #tpu.pipeline_mode<synchronous>, transform_indices = @transform_1, window_bounds = array<i64: 3, 4, 12>}, {pipeline_mode = #tpu.pipeline_mode<synchronous>, transform_indices = @transform_2, window_bounds = array<i64: 3, 4, 12>}, {pipeline_mode = #tpu.pipeline_mode<synchronous>, transform_indices = @transform_3, window_bounds = array<i64: 1, 2048>}, {transform_indices = @transform_4, window_bounds = array<i64: 1, 4, 256>}]} {
    %c0 = arith.constant 0 : index
    %c0_0 = arith.constant 0 : index
    %0 = vector.load %arg4[%c0, %c0_0] : memref<1x2048xf32, #tpu.memory_space<vmem>>, vector<1x2048xf32>
    %cst = arith.constant 0.000000e+00 : f32
    %1 = vector.broadcast %cst : f32 to vector<1x2048xf32>
    %2 = arith.cmpf one, %0, %1 : vector<1x2048xf32>
    %c0_1 = arith.constant 0 : index
    %c0_2 = arith.constant 0 : index
    %c0_3 = arith.constant 0 : index
    %3 = vector.load %arg1[%c0_1, %c0_2, %c0_3] : memref<1x4x256xf32, #tpu.memory_space<vmem>>, vector<1x4x128xf32>
    %4 = vector.shape_cast %3 : vector<1x4x128xf32> to vector<4x128xf32>
    %5 = arith.truncf %4 : vector<4x128xf32> to vector<4x128xbf16>
    %6 = vector.extract_strided_slice %5 {offsets = [0, 0], sizes = [4, 16], strides = [1, 1]} : vector<4x128xbf16> to vector<4x16xbf16>
    %7 = vector.extract_strided_slice %6 {offsets = [0, 1], sizes = [4, 1], strides = [1, 1]} : vector<4x16xbf16> to vector<4x1xbf16>
    %8 = vector.extract_strided_slice %6 {offsets = [0, 0], sizes = [4, 15], strides = [1, 1]} : vector<4x16xbf16> to vector<4x15xbf16>
    %9 = tpu.concatenate %7, %8 in 1 : vector<4x1xbf16>, vector<4x15xbf16> -> vector<4x16xbf16>
    %10 = vector.extract_strided_slice %6 {offsets = [0, 1], sizes = [4, 15], strides = [1, 1]} : vector<4x16xbf16> to vector<4x15xbf16>
    %11 = vector.extract_strided_slice %6 {offsets = [0, 14], sizes = [4, 1], strides = [1, 1]} : vector<4x16xbf16> to vector<4x1xbf16>
    %12 = tpu.concatenate %10, %11 in 1 : vector<4x15xbf16>, vector<4x1xbf16> -> vector<4x16xbf16>
    %13 = tpu.concatenate %9, %6, %12 in 0 : vector<4x16xbf16>, vector<4x16xbf16>, vector<4x16xbf16> -> vector<12x16xbf16>
    %c0_4 = arith.constant 0 : index
    %c128 = arith.constant 128 : index
    %14 = vector.load %arg6[%c0_4, %c128] : memref<12x2304xbf16, #tpu.memory_space<vmem>>, vector<12x16xbf16>
    tpu.vector_store %arg6[%c0_4, %c128], %13 {strides = array<i32>} : memref<12x2304xbf16, #tpu.memory_space<vmem>>, vector<12x16xbf16>,
    %15 = vector.extract_strided_slice %5 {offsets = [0, 16], sizes = [4, 16], strides = [1, 1]} : vector<4x128xbf16> to vector<4x16xbf16>
    %16 = vector.extract_strided_slice %15 {offsets = [0, 1], sizes = [4, 1], strides = [1, 1]} : vector<4x16xbf16> to vector<4x1xbf16>
    %17 = vector.extract_strided_slice %15 {offsets = [0, 0], sizes = [4, 15], strides = [1, 1]} : vector<4x16xbf16> to vector<4x15xbf16>
    %18 = tpu.concatenate %16, %17 in 1 : vector<4x1xbf16>, vector<4x15xbf16> -> vector<4x16xbf16>
    %19 = vector.extract_strided_slice %15 {offsets = [0, 1], sizes = [4, 15], strides = [1, 1]} : vector<4x16xbf16> to vector<4x15xbf16>
    %20 = vector.extract_strided_slice %15 {offsets = [0, 14], sizes = [4, 1], strides = [1, 1]} : vector<4x16xbf16> to vector<4x1xbf16>
    %21 = tpu.concatenate %19, %20 in 1 : vector<4x15xbf16>, vector<4x1xbf16> -> vector<4x16xbf16>
    %22 = tpu.concatenate %18, %15, %21 in 0 : vector<4x16xbf16>, vector<4x16xbf16>, vector<4x16xbf16> -> vector<12x16xbf16>
    %c0_5 = arith.constant 0 : index
    %c256 = arith.constant 256 : index
    %23 = vector.load %arg6[%c0_5, %c256] : memref<12x2304xbf16, #tpu.memory_space<vmem>>, vector<12x16xbf16>
    tpu.vector_store %arg6[%c0_5, %c256], %22 {strides = array<i32>} : memref<12x2304xbf16, #tpu.memory_space<vmem>>, vector<12x16xbf16>,
    %24 = vector.extract_strided_slice %5 {offsets = [0, 32], sizes = [4, 16], strides = [1, 1]} : vector<4x128xbf16> to vector<4x16xbf16>
    %25 = vector.extract_strided_slice %24 {offsets = [0, 1], sizes = [4, 1], strides = [1, 1]} : vector<4x16xbf16> to vector<4x1xbf16>
    %26 = vector.extract_strided_slice %24 {offsets = [0, 0], sizes = [4, 15], strides = [1, 1]} : vector<4x16xbf16> to vector<4x15xbf16>
    %27 = tpu.concatenate %25, %26 in 1 : vector<4x1xbf16>, vector<4x15xbf16> -> vector<4x16xbf16>
    %28 = vector.extract_strided_slice %24 {offsets = [0, 1], sizes = [4, 15], strides = [1, 1]} : vector<4x16xbf16> to vector<4x15xbf16>
    %29 = vector.extract_strided_slice %24 {offsets = [0, 14], sizes = [4, 1], strides = [1, 1]} : vector<4x16xbf16> to vector<4x1xbf16>
    %30 = tpu.concatenate %28, %29 in 1 : vector<4x15xbf16>, vector<4x1xbf16> -> vector<4x16xbf16>
    %31 = tpu.concatenate %27, %24, %30 in 0 : vector<4x16xbf16>, vector<4x16xbf16>, vector<4x16xbf16> -> vector<12x16xbf16>
    %c0_6 = arith.constant 0 : index
    %c384 = arith.constant 384 : index
    %32 = vector.load %arg6[%c0_6, %c384] : memref<12x2304xbf16, #tpu.memory_space<vmem>>, vector<12x16xbf16>
    tpu.vector_store %arg6[%c0_6, %c384], %31 {strides = array<i32>} : memref<12x2304xbf16, #tpu.memory_space<vmem>>, vector<12x16xbf16>,
    %33 = vector.extract_strided_slice %5 {offsets = [0, 48], sizes = [4, 16], strides = [1, 1]} : vector<4x128xbf16> to vector<4x16xbf16>
    %34 = vector.extract_strided_slice %33 {offsets = [0, 1], sizes = [4, 1], strides = [1, 1]} : vector<4x16xbf16> to vector<4x1xbf16>
    %35 = vector.extract_strided_slice %33 {offsets = [0, 0], sizes = [4, 15], strides = [1, 1]} : vector<4x16xbf16> to vector<4x15xbf16>
    %36 = tpu.concatenate %34, %35 in 1 : vector<4x1xbf16>, vector<4x15xbf16> -> vector<4x16xbf16>
    %37 = vector.extract_strided_slice %33 {offsets = [0, 1], sizes = [4, 15], strides = [1, 1]} : vector<4x16xbf16> to vector<4x15xbf16>
    %38 = vector.extract_strided_slice %33 {offsets = [0, 14], sizes = [4, 1], strides = [1, 1]} : vector<4x16xbf16> to vector<4x1xbf16>
    %39 = tpu.concatenate %37, %38 in 1 : vector<4x15xbf16>, vector<4x1xbf16> -> vector<4x16xbf16>
    %40 = tpu.concatenate %36, %33, %39 in 0 : vector<4x16xbf16>, vector<4x16xbf16>, vector<4x16xbf16> -> vector<12x16xbf16>
    %c0_7 = arith.constant 0 : index
    %c512 = arith.constant 512 : index
    %41 = vector.load %arg6[%c0_7, %c512] : memref<12x2304xbf16, #tpu.memory_space<vmem>>, vector<12x16xbf16>
    tpu.vector_store %arg6[%c0_7, %c512], %40 {strides = array<i32>} : memref<12x2304xbf16, #tpu.memory_space<vmem>>, vector<12x16xbf16>,
    %42 = vector.extract_strided_slice %5 {offsets = [0, 64], sizes = [4, 16], strides = [1, 1]} : vector<4x128xbf16> to vector<4x16xbf16>
    %43 = vector.extract_strided_slice %42 {offsets = [0, 1], sizes = [4, 1], strides = [1, 1]} : vector<4x16xbf16> to vector<4x1xbf16>
    %44 = vector.extract_strided_slice %42 {offsets = [0, 0], sizes = [4, 15], strides = [1, 1]} : vector<4x16xbf16> to vector<4x15xbf16>
    %45 = tpu.concatenate %43, %44 in 1 : vector<4x1xbf16>, vector<4x15xbf16> -> vector<4x16xbf16>
    %46 = vector.extract_strided_slice %42 {offsets = [0, 1], sizes = [4, 15], strides = [1, 1]} : vector<4x16xbf16> to vector<4x15xbf16>
    %47 = vector.extract_strided_slice %42 {offsets = [0, 14], sizes = [4, 1], strides = [1, 1]} : vector<4x16xbf16> to vector<4x1xbf16>
    %48 = tpu.concatenate %46, %47 in 1 : vector<4x15xbf16>, vector<4x1xbf16> -> vector<4x16xbf16>
    %49 = tpu.concatenate %45, %42, %48 in 0 : vector<4x16xbf16>, vector<4x16xbf16>, vector<4x16xbf16> -> vector<12x16xbf16>
    %c0_8 = arith.constant 0 : index
    %c640 = arith.constant 640 : index
    %50 = vector.load %arg6[%c0_8, %c640] : memref<12x2304xbf16, #tpu.memory_space<vmem>>, vector<12x16xbf16>
    tpu.vector_store %arg6[%c0_8, %c640], %49 {strides = array<i32>} : memref<12x2304xbf16, #tpu.memory_space<vmem>>, vector<12x16xbf16>,
    %51 = vector.extract_strided_slice %5 {offsets = [0, 80], sizes = [4, 16], strides = [1, 1]} : vector<4x128xbf16> to vector<4x16xbf16>
    %52 = vector.extract_strided_slice %51 {offsets = [0, 1], sizes = [4, 1], strides = [1, 1]} : vector<4x16xbf16> to vector<4x1xbf16>
    %53 = vector.extract_strided_slice %51 {offsets = [0, 0], sizes = [4, 15], strides = [1, 1]} : vector<4x16xbf16> to vector<4x15xbf16>
    %54 = tpu.concatenate %52, %53 in 1 : vector<4x1xbf16>, vector<4x15xbf16> -> vector<4x16xbf16>
    %55 = vector.extract_strided_slice %51 {offsets = [0, 1], sizes = [4, 15], strides = [1, 1]} : vector<4x16xbf16> to vector<4x15xbf16>
    %56 = vector.extract_strided_slice %51 {offsets = [0, 14], sizes = [4, 1], strides = [1, 1]} : vector<4x16xbf16> to vector<4x1xbf16>
    %57 = tpu.concatenate %55, %56 in 1 : vector<4x15xbf16>, vector<4x1xbf16> -> vector<4x16xbf16>
    %58 = tpu.concatenate %54, %51, %57 in 0 : vector<4x16xbf16>, vector<4x16xbf16>, vector<4x16xbf16> -> vector<12x16xbf16>
    %c0_9 = arith.constant 0 : index
    %c768 = arith.constant 768 : index
    %59 = vector.load %arg6[%c0_9, %c768] : memref<12x2304xbf16, #tpu.memory_space<vmem>>, vector<12x16xbf16>
    tpu.vector_store %arg6[%c0_9, %c768], %58 {strides = array<i32>} : memref<12x2304xbf16, #tpu.memory_space<vmem>>, vector<12x16xbf16>,
    %60 = vector.extract_strided_slice %5 {offsets = [0, 96], sizes = [4, 16], strides = [1, 1]} : vector<4x128xbf16> to vector<4x16xbf16>
    %61 = vector.extract_strided_slice %60 {offsets = [0, 1], sizes = [4, 1], strides = [1, 1]} : vector<4x16xbf16> to vector<4x1xbf16>
    %62 = vector.extract_strided_slice %60 {offsets = [0, 0], sizes = [4, 15], strides = [1, 1]} : vector<4x16xbf16> to vector<4x15xbf16>
    %63 = tpu.concatenate %61, %62 in 1 : vector<4x1xbf16>, vector<4x15xbf16> -> vector<4x16xbf16>
    %64 = vector.extract_strided_slice %60 {offsets = [0, 1], sizes = [4, 15], strides = [1, 1]} : vector<4x16xbf16> to vector<4x15xbf16>
    %65 = vector.extract_strided_slice %60 {offsets = [0, 14], sizes = [4, 1], strides = [1, 1]} : vector<4x16xbf16> to vector<4x1xbf16>
    %66 = tpu.concatenate %64, %65 in 1 : vector<4x15xbf16>, vector<4x1xbf16> -> vector<4x16xbf16>
    %67 = tpu.concatenate %63, %60, %66 in 0 : vector<4x16xbf16>, vector<4x16xbf16>, vector<4x16xbf16> -> vector<12x16xbf16>
    %c0_10 = arith.constant 0 : index
    %c896 = arith.constant 896 : index
    %68 = vector.load %arg6[%c0_10, %c896] : memref<12x2304xbf16, #tpu.memory_space<vmem>>, vector<12x16xbf16>
    tpu.vector_store %arg6[%c0_10, %c896], %67 {strides = array<i32>} : memref<12x2304xbf16, #tpu.memory_space<vmem>>, vector<12x16xbf16>,
    %69 = vector.extract_strided_slice %5 {offsets = [0, 112], sizes = [4, 16], strides = [1, 1]} : vector<4x128xbf16> to vector<4x16xbf16>
    %70 = vector.extract_strided_slice %69 {offsets = [0, 1], sizes = [4, 1], strides = [1, 1]} : vector<4x16xbf16> to vector<4x1xbf16>
    %71 = vector.extract_strided_slice %69 {offsets = [0, 0], sizes = [4, 15], strides = [1, 1]} : vector<4x16xbf16> to vector<4x15xbf16>
    %72 = tpu.concatenate %70, %71 in 1 : vector<4x1xbf16>, vector<4x15xbf16> -> vector<4x16xbf16>
    %73 = vector.extract_strided_slice %69 {offsets = [0, 1], sizes = [4, 15], strides = [1, 1]} : vector<4x16xbf16> to vector<4x15xbf16>
    %74 = vector.extract_strided_slice %69 {offsets = [0, 14], sizes = [4, 1], strides = [1, 1]} : vector<4x16xbf16> to vector<4x1xbf16>
    %75 = tpu.concatenate %73, %74 in 1 : vector<4x15xbf16>, vector<4x1xbf16> -> vector<4x16xbf16>
    %76 = tpu.concatenate %72, %69, %75 in 0 : vector<4x16xbf16>, vector<4x16xbf16>, vector<4x16xbf16> -> vector<12x16xbf16>
    %c0_11 = arith.constant 0 : index
    %c1024 = arith.constant 1024 : index
    %77 = vector.load %arg6[%c0_11, %c1024] : memref<12x2304xbf16, #tpu.memory_space<vmem>>, vector<12x16xbf16>
    tpu.vector_store %arg6[%c0_11, %c1024], %76 {strides = array<i32>} : memref<12x2304xbf16, #tpu.memory_space<vmem>>, vector<12x16xbf16>,
    %c0_12 = arith.constant 0 : index
    %c0_13 = arith.constant 0 : index
    %c128_14 = arith.constant 128 : index
    %78 = vector.load %arg1[%c0_12, %c0_13, %c128_14] : memref<1x4x256xf32, #tpu.memory_space<vmem>>, vector<1x4x128xf32>
    %79 = vector.shape_cast %78 : vector<1x4x128xf32> to vector<4x128xf32>
    %80 = arith.truncf %79 : vector<4x128xf32> to vector<4x128xbf16>
    %81 = vector.extract_strided_slice %80 {offsets = [0, 0], sizes = [4, 16], strides = [1, 1]} : vector<4x128xbf16> to vector<4x16xbf16>
    %82 = vector.extract_strided_slice %81 {offsets = [0, 1], sizes = [4, 1], strides = [1, 1]} : vector<4x16xbf16> to vector<4x1xbf16>
    %83 = vector.extract_strided_slice %81 {offsets = [0, 0], sizes = [4, 15], strides = [1, 1]} : vector<4x16xbf16> to vector<4x15xbf16>
    %84 = tpu.concatenate %82, %83 in 1 : vector<4x1xbf16>, vector<4x15xbf16> -> vector<4x16xbf16>
    %85 = vector.extract_strided_slice %81 {offsets = [0, 1], sizes = [4, 15], strides = [1, 1]} : vector<4x16xbf16> to vector<4x15xbf16>
    %86 = vector.extract_strided_slice %81 {offsets = [0, 14], sizes = [4, 1], strides = [1, 1]} : vector<4x16xbf16> to vector<4x1xbf16>
    %87 = tpu.concatenate %85, %86 in 1 : vector<4x15xbf16>, vector<4x1xbf16> -> vector<4x16xbf16>
    %88 = tpu.concatenate %84, %81, %87 in 0 : vector<4x16xbf16>, vector<4x16xbf16>, vector<4x16xbf16> -> vector<12x16xbf16>
    %c0_15 = arith.constant 0 : index
    %c1152 = arith.constant 1152 : index
    %89 = vector.load %arg6[%c0_15, %c1152] : memref<12x2304xbf16, #tpu.memory_space<vmem>>, vector<12x16xbf16>
    tpu.vector_store %arg6[%c0_15, %c1152], %88 {strides = array<i32>} : memref<12x2304xbf16, #tpu.memory_space<vmem>>, vector<12x16xbf16>,
    %90 = vector.extract_strided_slice %80 {offsets = [0, 16], sizes = [4, 16], strides = [1, 1]} : vector<4x128xbf16> to vector<4x16xbf16>
    %91 = vector.extract_strided_slice %90 {offsets = [0, 1], sizes = [4, 1], strides = [1, 1]} : vector<4x16xbf16> to vector<4x1xbf16>
    %92 = vector.extract_strided_slice %90 {offsets = [0, 0], sizes = [4, 15], strides = [1, 1]} : vector<4x16xbf16> to vector<4x15xbf16>
    %93 = tpu.concatenate %91, %92 in 1 : vector<4x1xbf16>, vector<4x15xbf16> -> vector<4x16xbf16>
    %94 = vector.extract_strided_slice %90 {offsets = [0, 1], sizes = [4, 15], strides = [1, 1]} : vector<4x16xbf16> to vector<4x15xbf16>
    %95 = vector.extract_strided_slice %90 {offsets = [0, 14], sizes = [4, 1], strides = [1, 1]} : vector<4x16xbf16> to vector<4x1xbf16>
    %96 = tpu.concatenate %94, %95 in 1 : vector<4x15xbf16>, vector<4x1xbf16> -> vector<4x16xbf16>
    %97 = tpu.concatenate %93, %90, %96 in 0 : vector<4x16xbf16>, vector<4x16xbf16>, vector<4x16xbf16> -> vector<12x16xbf16>
    %c0_16 = arith.constant 0 : index
    %c1280 = arith.constant 1280 : index
    %98 = vector.load %arg6[%c0_16, %c1280] : memref<12x2304xbf16, #tpu.memory_space<vmem>>, vector<12x16xbf16>
    tpu.vector_store %arg6[%c0_16, %c1280], %97 {strides = array<i32>} : memref<12x2304xbf16, #tpu.memory_space<vmem>>, vector<12x16xbf16>,
    %99 = vector.extract_strided_slice %80 {offsets = [0, 32], sizes = [4, 16], strides = [1, 1]} : vector<4x128xbf16> to vector<4x16xbf16>
    %100 = vector.extract_strided_slice %99 {offsets = [0, 1], sizes = [4, 1], strides = [1, 1]} : vector<4x16xbf16> to vector<4x1xbf16>
    %101 = vector.extract_strided_slice %99 {offsets = [0, 0], sizes = [4, 15], strides = [1, 1]} : vector<4x16xbf16> to vector<4x15xbf16>
    %102 = tpu.concatenate %100, %101 in 1 : vector<4x1xbf16>, vector<4x15xbf16> -> vector<4x16xbf16>
    %103 = vector.extract_strided_slice %99 {offsets = [0, 1], sizes = [4, 15], strides = [1, 1]} : vector<4x16xbf16> to vector<4x15xbf16>
    %104 = vector.extract_strided_slice %99 {offsets = [0, 14], sizes = [4, 1], strides = [1, 1]} : vector<4x16xbf16> to vector<4x1xbf16>
    %105 = tpu.concatenate %103, %104 in 1 : vector<4x15xbf16>, vector<4x1xbf16> -> vector<4x16xbf16>
    %106 = tpu.concatenate %102, %99, %105 in 0 : vector<4x16xbf16>, vector<4x16xbf16>, vector<4x16xbf16> -> vector<12x16xbf16>
    %c0_17 = arith.constant 0 : index
    %c1408 = arith.constant 1408 : index
    %107 = vector.load %arg6[%c0_17, %c1408] : memref<12x2304xbf16, #tpu.memory_space<vmem>>, vector<12x16xbf16>
    tpu.vector_store %arg6[%c0_17, %c1408], %106 {strides = array<i32>} : memref<12x2304xbf16, #tpu.memory_space<vmem>>, vector<12x16xbf16>,
    %108 = vector.extract_strided_slice %80 {offsets = [0, 48], sizes = [4, 16], strides = [1, 1]} : vector<4x128xbf16> to vector<4x16xbf16>
    %109 = vector.extract_strided_slice %108 {offsets = [0, 1], sizes = [4, 1], strides = [1, 1]} : vector<4x16xbf16> to vector<4x1xbf16>
    %110 = vector.extract_strided_slice %108 {offsets = [0, 0], sizes = [4, 15], strides = [1, 1]} : vector<4x16xbf16> to vector<4x15xbf16>
    %111 = tpu.concatenate %109, %110 in 1 : vector<4x1xbf16>, vector<4x15xbf16> -> vector<4x16xbf16>
    %112 = vector.extract_strided_slice %108 {offsets = [0, 1], sizes = [4, 15], strides = [1, 1]} : vector<4x16xbf16> to vector<4x15xbf16>
    %113 = vector.extract_strided_slice %108 {offsets = [0, 14], sizes = [4, 1], strides = [1, 1]} : vector<4x16xbf16> to vector<4x1xbf16>
    %114 = tpu.concatenate %112, %113 in 1 : vector<4x15xbf16>, vector<4x1xbf16> -> vector<4x16xbf16>
    %115 = tpu.concatenate %111, %108, %114 in 0 : vector<4x16xbf16>, vector<4x16xbf16>, vector<4x16xbf16> -> vector<12x16xbf16>
    %c0_18 = arith.constant 0 : index
    %c1536 = arith.constant 1536 : index
    %116 = vector.load %arg6[%c0_18, %c1536] : memref<12x2304xbf16, #tpu.memory_space<vmem>>, vector<12x16xbf16>
    tpu.vector_store %arg6[%c0_18, %c1536], %115 {strides = array<i32>} : memref<12x2304xbf16, #tpu.memory_space<vmem>>, vector<12x16xbf16>,
    %117 = vector.extract_strided_slice %80 {offsets = [0, 64], sizes = [4, 16], strides = [1, 1]} : vector<4x128xbf16> to vector<4x16xbf16>
    %118 = vector.extract_strided_slice %117 {offsets = [0, 1], sizes = [4, 1], strides = [1, 1]} : vector<4x16xbf16> to vector<4x1xbf16>
    %119 = vector.extract_strided_slice %117 {offsets = [0, 0], sizes = [4, 15], strides = [1, 1]} : vector<4x16xbf16> to vector<4x15xbf16>
    %120 = tpu.concatenate %118, %119 in 1 : vector<4x1xbf16>, vector<4x15xbf16> -> vector<4x16xbf16>
    %121 = vector.extract_strided_slice %117 {offsets = [0, 1], sizes = [4, 15], strides = [1, 1]} : vector<4x16xbf16> to vector<4x15xbf16>
    %122 = vector.extract_strided_slice %117 {offsets = [0, 14], sizes = [4, 1], strides = [1, 1]} : vector<4x16xbf16> to vector<4x1xbf16>
    %123 = tpu.concatenate %121, %122 in 1 : vector<4x15xbf16>, vector<4x1xbf16> -> vector<4x16xbf16>
    %124 = tpu.concatenate %120, %117, %123 in 0 : vector<4x16xbf16>, vector<4x16xbf16>, vector<4x16xbf16> -> vector<12x16xbf16>
    %c0_19 = arith.constant 0 : index
    %c1664 = arith.constant 1664 : index
    %125 = vector.load %arg6[%c0_19, %c1664] : memref<12x2304xbf16, #tpu.memory_space<vmem>>, vector<12x16xbf16>
    tpu.vector_store %arg6[%c0_19, %c1664], %124 {strides = array<i32>} : memref<12x2304xbf16, #tpu.memory_space<vmem>>, vector<12x16xbf16>,
    %126 = vector.extract_strided_slice %80 {offsets = [0, 80], sizes = [4, 16], strides = [1, 1]} : vector<4x128xbf16> to vector<4x16xbf16>
    %127 = vector.extract_strided_slice %126 {offsets = [0, 1], sizes = [4, 1], strides = [1, 1]} : vector<4x16xbf16> to vector<4x1xbf16>
    %128 = vector.extract_strided_slice %126 {offsets = [0, 0], sizes = [4, 15], strides = [1, 1]} : vector<4x16xbf16> to vector<4x15xbf16>
    %129 = tpu.concatenate %127, %128 in 1 : vector<4x1xbf16>, vector<4x15xbf16> -> vector<4x16xbf16>
    %130 = vector.extract_strided_slice %126 {offsets = [0, 1], sizes = [4, 15], strides = [1, 1]} : vector<4x16xbf16> to vector<4x15xbf16>
    %131 = vector.extract_strided_slice %126 {offsets = [0, 14], sizes = [4, 1], strides = [1, 1]} : vector<4x16xbf16> to vector<4x1xbf16>
    %132 = tpu.concatenate %130, %131 in 1 : vector<4x15xbf16>, vector<4x1xbf16> -> vector<4x16xbf16>
    %133 = tpu.concatenate %129, %126, %132 in 0 : vector<4x16xbf16>, vector<4x16xbf16>, vector<4x16xbf16> -> vector<12x16xbf16>
    %c0_20 = arith.constant 0 : index
    %c1792 = arith.constant 1792 : index
    %134 = vector.load %arg6[%c0_20, %c1792] : memref<12x2304xbf16, #tpu.memory_space<vmem>>, vector<12x16xbf16>
    tpu.vector_store %arg6[%c0_20, %c1792], %133 {strides = array<i32>} : memref<12x2304xbf16, #tpu.memory_space<vmem>>, vector<12x16xbf16>,
    %135 = vector.extract_strided_slice %80 {offsets = [0, 96], sizes = [4, 16], strides = [1, 1]} : vector<4x128xbf16> to vector<4x16xbf16>
    %136 = vector.extract_strided_slice %135 {offsets = [0, 1], sizes = [4, 1], strides = [1, 1]} : vector<4x16xbf16> to vector<4x1xbf16>
    %137 = vector.extract_strided_slice %135 {offsets = [0, 0], sizes = [4, 15], strides = [1, 1]} : vector<4x16xbf16> to vector<4x15xbf16>
    %138 = tpu.concatenate %136, %137 in 1 : vector<4x1xbf16>, vector<4x15xbf16> -> vector<4x16xbf16>
    %139 = vector.extract_strided_slice %135 {offsets = [0, 1], sizes = [4, 15], strides = [1, 1]} : vector<4x16xbf16> to vector<4x15xbf16>
    %140 = vector.extract_strided_slice %135 {offsets = [0, 14], sizes = [4, 1], strides = [1, 1]} : vector<4x16xbf16> to vector<4x1xbf16>
    %141 = tpu.concatenate %139, %140 in 1 : vector<4x15xbf16>, vector<4x1xbf16> -> vector<4x16xbf16>
    %142 = tpu.concatenate %138, %135, %141 in 0 : vector<4x16xbf16>, vector<4x16xbf16>, vector<4x16xbf16> -> vector<12x16xbf16>
    %c0_21 = arith.constant 0 : index
    %c1920 = arith.constant 1920 : index
    %143 = vector.load %arg6[%c0_21, %c1920] : memref<12x2304xbf16, #tpu.memory_space<vmem>>, vector<12x16xbf16>
    tpu.vector_store %arg6[%c0_21, %c1920], %142 {strides = array<i32>} : memref<12x2304xbf16, #tpu.memory_space<vmem>>, vector<12x16xbf16>,
    %144 = vector.extract_strided_slice %80 {offsets = [0, 112], sizes = [4, 16], strides = [1, 1]} : vector<4x128xbf16> to vector<4x16xbf16>
    %145 = vector.extract_strided_slice %144 {offsets = [0, 1], sizes = [4, 1], strides = [1, 1]} : vector<4x16xbf16> to vector<4x1xbf16>
    %146 = vector.extract_strided_slice %144 {offsets = [0, 0], sizes = [4, 15], strides = [1, 1]} : vector<4x16xbf16> to vector<4x15xbf16>
    %147 = tpu.concatenate %145, %146 in 1 : vector<4x1xbf16>, vector<4x15xbf16> -> vector<4x16xbf16>
    %148 = vector.extract_strided_slice %144 {offsets = [0, 1], sizes = [4, 15], strides = [1, 1]} : vector<4x16xbf16> to vector<4x15xbf16>
    %149 = vector.extract_strided_slice %144 {offsets = [0, 14], sizes = [4, 1], strides = [1, 1]} : vector<4x16xbf16> to vector<4x1xbf16>
    %150 = tpu.concatenate %148, %149 in 1 : vector<4x15xbf16>, vector<4x1xbf16> -> vector<4x16xbf16>
    %151 = tpu.concatenate %147, %144, %150 in 0 : vector<4x16xbf16>, vector<4x16xbf16>, vector<4x16xbf16> -> vector<12x16xbf16>
    %c0_22 = arith.constant 0 : index
    %c2048 = arith.constant 2048 : index
    %152 = vector.load %arg6[%c0_22, %c2048] : memref<12x2304xbf16, #tpu.memory_space<vmem>>, vector<12x16xbf16>
    tpu.vector_store %arg6[%c0_22, %c2048], %151 {strides = array<i32>} : memref<12x2304xbf16, #tpu.memory_space<vmem>>, vector<12x16xbf16>,
    %c0_23 = arith.constant 0 : index
    %c0_24 = arith.constant 0 : index
    %c16 = arith.constant 16 : index
    %153 = vector.load %arg1[%c0_23, %c0_24, %c16] : memref<1x4x256xf32, #tpu.memory_space<vmem>>, vector<1x4x16xf32>
    %154 = vector.shape_cast %153 : vector<1x4x16xf32> to vector<4x16xf32>
    %155 = arith.truncf %154 : vector<4x16xf32> to vector<4x16xbf16>
    %156 = vector.extract_strided_slice %155 {offsets = [0, 1], sizes = [4, 1], strides = [1, 1]} : vector<4x16xbf16> to vector<4x1xbf16>
    %157 = vector.extract_strided_slice %155 {offsets = [0, 0], sizes = [4, 15], strides = [1, 1]} : vector<4x16xbf16> to vector<4x15xbf16>
    %158 = tpu.concatenate %156, %157 in 1 : vector<4x1xbf16>, vector<4x15xbf16> -> vector<4x16xbf16>
    %159 = vector.extract_strided_slice %155 {offsets = [0, 1], sizes = [4, 15], strides = [1, 1]} : vector<4x16xbf16> to vector<4x15xbf16>
    %160 = vector.extract_strided_slice %155 {offsets = [0, 14], sizes = [4, 1], strides = [1, 1]} : vector<4x16xbf16> to vector<4x1xbf16>
    %161 = tpu.concatenate %159, %160 in 1 : vector<4x15xbf16>, vector<4x1xbf16> -> vector<4x16xbf16>
    %162 = tpu.concatenate %158, %155, %161 in 0 : vector<4x16xbf16>, vector<4x16xbf16>, vector<4x16xbf16> -> vector<12x16xbf16>
    %c0_25 = arith.constant 0 : index
    %c0_26 = arith.constant 0 : index
    %163 = vector.load %arg6[%c0_25, %c0_26] : memref<12x2304xbf16, #tpu.memory_space<vmem>>, vector<12x16xbf16>
    tpu.vector_store %arg6[%c0_25, %c0_26], %162 {strides = array<i32>} : memref<12x2304xbf16, #tpu.memory_space<vmem>>, vector<12x16xbf16>,
    %c0_27 = arith.constant 0 : index
    %c0_28 = arith.constant 0 : index
    %c224 = arith.constant 224 : index
    %164 = vector.load %arg1[%c0_27, %c0_28, %c224] : memref<1x4x256xf32, #tpu.memory_space<vmem>>, vector<1x4x16xf32>
    %165 = vector.shape_cast %164 : vector<1x4x16xf32> to vector<4x16xf32>
    %166 = arith.truncf %165 : vector<4x16xf32> to vector<4x16xbf16>
    %167 = vector.extract_strided_slice %166 {offsets = [0, 1], sizes = [4, 1], strides = [1, 1]} : vector<4x16xbf16> to vector<4x1xbf16>
    %168 = vector.extract_strided_slice %166 {offsets = [0, 0], sizes = [4, 15], strides = [1, 1]} : vector<4x16xbf16> to vector<4x15xbf16>
    %169 = tpu.concatenate %167, %168 in 1 : vector<4x1xbf16>, vector<4x15xbf16> -> vector<4x16xbf16>
    %170 = vector.extract_strided_slice %166 {offsets = [0, 1], sizes = [4, 15], strides = [1, 1]} : vector<4x16xbf16> to vector<4x15xbf16>
    %171 = vector.extract_strided_slice %166 {offsets = [0, 14], sizes = [4, 1], strides = [1, 1]} : vector<4x16xbf16> to vector<4x1xbf16>
    %172 = tpu.concatenate %170, %171 in 1 : vector<4x15xbf16>, vector<4x1xbf16> -> vector<4x16xbf16>
    %173 = tpu.concatenate %169, %166, %172 in 0 : vector<4x16xbf16>, vector<4x16xbf16>, vector<4x16xbf16> -> vector<12x16xbf16>
    %c0_29 = arith.constant 0 : index
    %c2176 = arith.constant 2176 : index
    %174 = vector.load %arg6[%c0_29, %c2176] : memref<12x2304xbf16, #tpu.memory_space<vmem>>, vector<12x16xbf16>
    tpu.vector_store %arg6[%c0_29, %c2176], %173 {strides = array<i32>} : memref<12x2304xbf16, #tpu.memory_space<vmem>>, vector<12x16xbf16>,
    %c0_30 = arith.constant 0 : index
    %c0_31 = arith.constant 0 : index
    %c0_32 = arith.constant 0 : index
    %175 = vector.load %arg2[%c0_30, %c0_31, %c0_32] : memref<3x4x12xbf16, #tpu.memory_space<vmem>>, vector<1x4x12xbf16>
    %176 = vector.shape_cast %175 : vector<1x4x12xbf16> to vector<4x12xbf16>
    %c0_33 = arith.constant 0 : index
    %c0_34 = arith.constant 0 : index
    %177 = vector.load %arg6[%c0_33, %c0_34] : memref<12x2304xbf16, #tpu.memory_space<vmem>>, vector<12x2048xbf16>
    %cst_35 = arith.constant dense<0.000000e+00> : vector<4x2048xf32>
    %178 = tpu.matmul %176, %177, %cst_35 {dimension_numbers = #tpu.dot_dimension_numbers<[1], [0], [0], [1], [0, 0, 1, 1], [], []>} : vector<4x12xbf16>, vector<12x2048xbf16>, vector<4x2048xf32> -> vector<4x2048xf32>
    %c1 = arith.constant 1 : index
    %c0_36 = arith.constant 0 : index
    %c0_37 = arith.constant 0 : index
    %179 = vector.load %arg2[%c1, %c0_36, %c0_37] : memref<3x4x12xbf16, #tpu.memory_space<vmem>>, vector<1x4x12xbf16>
    %180 = vector.shape_cast %179 : vector<1x4x12xbf16> to vector<4x12xbf16>
    %c0_38 = arith.constant 0 : index
    %c128_39 = arith.constant 128 : index
    %181 = vector.load %arg6[%c0_38, %c128_39] : memref<12x2304xbf16, #tpu.memory_space<vmem>>, vector<12x2048xbf16>
    %cst_40 = arith.constant dense<0.000000e+00> : vector<4x2048xf32>
    %182 = tpu.matmul %180, %181, %cst_40 {dimension_numbers = #tpu.dot_dimension_numbers<[1], [0], [0], [1], [0, 0, 1, 1], [], []>} : vector<4x12xbf16>, vector<12x2048xbf16>, vector<4x2048xf32> -> vector<4x2048xf32>
    %183 = arith.addf %178, %182 : vector<4x2048xf32>
    %c2 = arith.constant 2 : index
    %c0_41 = arith.constant 0 : index
    %c0_42 = arith.constant 0 : index
    %184 = vector.load %arg2[%c2, %c0_41, %c0_42] : memref<3x4x12xbf16, #tpu.memory_space<vmem>>, vector<1x4x12xbf16>
    %185 = vector.shape_cast %184 : vector<1x4x12xbf16> to vector<4x12xbf16>
    %c0_43 = arith.constant 0 : index
    %c256_44 = arith.constant 256 : index
    %186 = vector.load %arg6[%c0_43, %c256_44] : memref<12x2304xbf16, #tpu.memory_space<vmem>>, vector<12x2048xbf16>
    %cst_45 = arith.constant dense<0.000000e+00> : vector<4x2048xf32>
    %187 = tpu.matmul %185, %186, %cst_45 {dimension_numbers = #tpu.dot_dimension_numbers<[1], [0], [0], [1], [0, 0, 1, 1], [], []>} : vector<4x12xbf16>, vector<12x2048xbf16>, vector<4x2048xf32> -> vector<4x2048xf32>
    %188 = arith.addf %183, %187 : vector<4x2048xf32>
    %cst_46 = arith.constant 0.000000e+00 : f32
    %189 = vector.shape_cast %2 : vector<1x2048xi1> to vector<1x2048xi1>
    %190 = vector.broadcast %189 : vector<1x2048xi1> to vector<4x2048xi1>
    %191 = vector.broadcast %cst_46 : f32 to vector<4x2048xf32>
    %192 = arith.select %190, %188, %191 : vector<4x2048xi1>, vector<4x2048xf32>
    %cst_47 = arith.constant dense<0.000000e+00> : vector<4xf32>
    %193 = vector.multi_reduction <add>, %192, %cst_47 [1] : vector<4x2048xf32> to vector<4xf32>
    %194 = vector.shape_cast %193 : vector<4xf32> to vector<4x1xf32>
    %cst_48 = arith.constant 3.906250e-03 : f32
    %195 = vector.broadcast %cst_48 : f32 to vector<4x1xf32>
    %196 = arith.mulf %194, %195 : vector<4x1xf32>
    %197 = vector.broadcast %196 : vector<4x1xf32> to vector<4x2048xf32>
    %198 = arith.subf %188, %197 : vector<4x2048xf32>
    %cst_49 = arith.constant 0.000000e+00 : f32
    %199 = vector.shape_cast %2 : vector<1x2048xi1> to vector<1x2048xi1>
    %200 = vector.broadcast %199 : vector<1x2048xi1> to vector<4x2048xi1>
    %201 = vector.broadcast %cst_49 : f32 to vector<4x2048xf32>
    %202 = arith.select %200, %198, %201 : vector<4x2048xi1>, vector<4x2048xf32>
    %203 = arith.mulf %202, %202 : vector<4x2048xf32>
    %cst_50 = arith.constant dense<0.000000e+00> : vector<4xf32>
    %204 = vector.multi_reduction <add>, %203, %cst_50 [1] : vector<4x2048xf32> to vector<4xf32>
    %205 = vector.shape_cast %204 : vector<4xf32> to vector<4x1xf32>
    %cst_51 = arith.constant 3.906250e-03 : f32
    %206 = vector.broadcast %cst_51 : f32 to vector<4x1xf32>
    %207 = arith.mulf %205, %206 : vector<4x1xf32>
    %cst_52 = arith.constant 9.99999974E-6 : f32
    %208 = vector.broadcast %cst_52 : f32 to vector<4x1xf32>
    %209 = arith.addf %207, %208 : vector<4x1xf32>
    %210 = math.rsqrt %209 : vector<4x1xf32>
    %211 = vector.broadcast %210 : vector<4x1xf32> to vector<4x2048xf32>
    %212 = arith.mulf %198, %211 : vector<4x2048xf32>
    %cst_53 = arith.constant 0.000000e+00 : f32
    %213 = vector.broadcast %cst_53 : f32 to vector<4x2048xf32>
    %214 = arith.maximumf %212, %213 : vector<4x2048xf32>
    %215 = arith.truncf %214 : vector<4x2048xf32> to vector<4x2048xbf16>
    %216 = vector.extract_strided_slice %215 {offsets = [0, 0], sizes = [4, 16], strides = [1, 1]} : vector<4x2048xbf16> to vector<4x16xbf16>
    %217 = vector.extract_strided_slice %216 {offsets = [0, 1], sizes = [4, 1], strides = [1, 1]} : vector<4x16xbf16> to vector<4x1xbf16>
    %218 = vector.extract_strided_slice %216 {offsets = [0, 0], sizes = [4, 15], strides = [1, 1]} : vector<4x16xbf16> to vector<4x15xbf16>
    %219 = tpu.concatenate %217, %218 in 1 : vector<4x1xbf16>, vector<4x15xbf16> -> vector<4x16xbf16>
    %220 = vector.extract_strided_slice %216 {offsets = [0, 1], sizes = [4, 15], strides = [1, 1]} : vector<4x16xbf16> to vector<4x15xbf16>
    %221 = vector.extract_strided_slice %216 {offsets = [0, 14], sizes = [4, 1], strides = [1, 1]} : vector<4x16xbf16> to vector<4x1xbf16>
    %222 = tpu.concatenate %220, %221 in 1 : vector<4x15xbf16>, vector<4x1xbf16> -> vector<4x16xbf16>
    %223 = tpu.concatenate %219, %216, %222 in 0 : vector<4x16xbf16>, vector<4x16xbf16>, vector<4x16xbf16> -> vector<12x16xbf16>
    %c0_54 = arith.constant 0 : index
    %c128_55 = arith.constant 128 : index
    %224 = vector.load %arg6[%c0_54, %c128_55] : memref<12x2304xbf16, #tpu.memory_space<vmem>>, vector<12x16xbf16>
    tpu.vector_store %arg6[%c0_54, %c128_55], %223 {strides = array<i32>} : memref<12x2304xbf16, #tpu.memory_space<vmem>>, vector<12x16xbf16>,
    %225 = vector.extract_strided_slice %215 {offsets = [0, 128], sizes = [4, 16], strides = [1, 1]} : vector<4x2048xbf16> to vector<4x16xbf16>
    %226 = vector.extract_strided_slice %225 {offsets = [0, 1], sizes = [4, 1], strides = [1, 1]} : vector<4x16xbf16> to vector<4x1xbf16>
    %227 = vector.extract_strided_slice %225 {offsets = [0, 0], sizes = [4, 15], strides = [1, 1]} : vector<4x16xbf16> to vector<4x15xbf16>
    %228 = tpu.concatenate %226, %227 in 1 : vector<4x1xbf16>, vector<4x15xbf16> -> vector<4x16xbf16>
    %229 = vector.extract_strided_slice %225 {offsets = [0, 1], sizes = [4, 15], strides = [1, 1]} : vector<4x16xbf16> to vector<4x15xbf16>
    %230 = vector.extract_strided_slice %225 {offsets = [0, 14], sizes = [4, 1], strides = [1, 1]} : vector<4x16xbf16> to vector<4x1xbf16>
    %231 = tpu.concatenate %229, %230 in 1 : vector<4x15xbf16>, vector<4x1xbf16> -> vector<4x16xbf16>
    %232 = tpu.concatenate %228, %225, %231 in 0 : vector<4x16xbf16>, vector<4x16xbf16>, vector<4x16xbf16> -> vector<12x16xbf16>
    %c0_56 = arith.constant 0 : index
    %c256_57 = arith.constant 256 : index
    %233 = vector.load %arg6[%c0_56, %c256_57] : memref<12x2304xbf16, #tpu.memory_space<vmem>>, vector<12x16xbf16>
    tpu.vector_store %arg6[%c0_56, %c256_57], %232 {strides = array<i32>} : memref<12x2304xbf16, #tpu.memory_space<vmem>>, vector<12x16xbf16>,
    %234 = vector.extract_strided_slice %215 {offsets = [0, 256], sizes = [4, 16], strides = [1, 1]} : vector<4x2048xbf16> to vector<4x16xbf16>
    %235 = vector.extract_strided_slice %234 {offsets = [0, 1], sizes = [4, 1], strides = [1, 1]} : vector<4x16xbf16> to vector<4x1xbf16>
    %236 = vector.extract_strided_slice %234 {offsets = [0, 0], sizes = [4, 15], strides = [1, 1]} : vector<4x16xbf16> to vector<4x15xbf16>
    %237 = tpu.concatenate %235, %236 in 1 : vector<4x1xbf16>, vector<4x15xbf16> -> vector<4x16xbf16>
    %238 = vector.extract_strided_slice %234 {offsets = [0, 1], sizes = [4, 15], strides = [1, 1]} : vector<4x16xbf16> to vector<4x15xbf16>
    %239 = vector.extract_strided_slice %234 {offsets = [0, 14], sizes = [4, 1], strides = [1, 1]} : vector<4x16xbf16> to vector<4x1xbf16>
    %240 = tpu.concatenate %238, %239 in 1 : vector<4x15xbf16>, vector<4x1xbf16> -> vector<4x16xbf16>
    %241 = tpu.concatenate %237, %234, %240 in 0 : vector<4x16xbf16>, vector<4x16xbf16>, vector<4x16xbf16> -> vector<12x16xbf16>
    %c0_58 = arith.constant 0 : index
    %c384_59 = arith.constant 384 : index
    %242 = vector.load %arg6[%c0_58, %c384_59] : memref<12x2304xbf16, #tpu.memory_space<vmem>>, vector<12x16xbf16>
    tpu.vector_store %arg6[%c0_58, %c384_59], %241 {strides = array<i32>} : memref<12x2304xbf16, #tpu.memory_space<vmem>>, vector<12x16xbf16>,
    %243 = vector.extract_strided_slice %215 {offsets = [0, 384], sizes = [4, 16], strides = [1, 1]} : vector<4x2048xbf16> to vector<4x16xbf16>
    %244 = vector.extract_strided_slice %243 {offsets = [0, 1], sizes = [4, 1], strides = [1, 1]} : vector<4x16xbf16> to vector<4x1xbf16>
    %245 = vector.extract_strided_slice %243 {offsets = [0, 0], sizes = [4, 15], strides = [1, 1]} : vector<4x16xbf16> to vector<4x15xbf16>
    %246 = tpu.concatenate %244, %245 in 1 : vector<4x1xbf16>, vector<4x15xbf16> -> vector<4x16xbf16>
    %247 = vector.extract_strided_slice %243 {offsets = [0, 1], sizes = [4, 15], strides = [1, 1]} : vector<4x16xbf16> to vector<4x15xbf16>
    %248 = vector.extract_strided_slice %243 {offsets = [0, 14], sizes = [4, 1], strides = [1, 1]} : vector<4x16xbf16> to vector<4x1xbf16>
    %249 = tpu.concatenate %247, %248 in 1 : vector<4x15xbf16>, vector<4x1xbf16> -> vector<4x16xbf16>
    %250 = tpu.concatenate %246, %243, %249 in 0 : vector<4x16xbf16>, vector<4x16xbf16>, vector<4x16xbf16> -> vector<12x16xbf16>
    %c0_60 = arith.constant 0 : index
    %c512_61 = arith.constant 512 : index
    %251 = vector.load %arg6[%c0_60, %c512_61] : memref<12x2304xbf16, #tpu.memory_space<vmem>>, vector<12x16xbf16>
    tpu.vector_store %arg6[%c0_60, %c512_61], %250 {strides = array<i32>} : memref<12x2304xbf16, #tpu.memory_space<vmem>>, vector<12x16xbf16>,
    %252 = vector.extract_strided_slice %215 {offsets = [0, 512], sizes = [4, 16], strides = [1, 1]} : vector<4x2048xbf16> to vector<4x16xbf16>
    %253 = vector.extract_strided_slice %252 {offsets = [0, 1], sizes = [4, 1], strides = [1, 1]} : vector<4x16xbf16> to vector<4x1xbf16>
    %254 = vector.extract_strided_slice %252 {offsets = [0, 0], sizes = [4, 15], strides = [1, 1]} : vector<4x16xbf16> to vector<4x15xbf16>
    %255 = tpu.concatenate %253, %254 in 1 : vector<4x1xbf16>, vector<4x15xbf16> -> vector<4x16xbf16>
    %256 = vector.extract_strided_slice %252 {offsets = [0, 1], sizes = [4, 15], strides = [1, 1]} : vector<4x16xbf16> to vector<4x15xbf16>
    %257 = vector.extract_strided_slice %252 {offsets = [0, 14], sizes = [4, 1], strides = [1, 1]} : vector<4x16xbf16> to vector<4x1xbf16>
    %258 = tpu.concatenate %256, %257 in 1 : vector<4x15xbf16>, vector<4x1xbf16> -> vector<4x16xbf16>
    %259 = tpu.concatenate %255, %252, %258 in 0 : vector<4x16xbf16>, vector<4x16xbf16>, vector<4x16xbf16> -> vector<12x16xbf16>
    %c0_62 = arith.constant 0 : index
    %c640_63 = arith.constant 640 : index
    %260 = vector.load %arg6[%c0_62, %c640_63] : memref<12x2304xbf16, #tpu.memory_space<vmem>>, vector<12x16xbf16>
    tpu.vector_store %arg6[%c0_62, %c640_63], %259 {strides = array<i32>} : memref<12x2304xbf16, #tpu.memory_space<vmem>>, vector<12x16xbf16>,
    %261 = vector.extract_strided_slice %215 {offsets = [0, 640], sizes = [4, 16], strides = [1, 1]} : vector<4x2048xbf16> to vector<4x16xbf16>
    %262 = vector.extract_strided_slice %261 {offsets = [0, 1], sizes = [4, 1], strides = [1, 1]} : vector<4x16xbf16> to vector<4x1xbf16>
    %263 = vector.extract_strided_slice %261 {offsets = [0, 0], sizes = [4, 15], strides = [1, 1]} : vector<4x16xbf16> to vector<4x15xbf16>
    %264 = tpu.concatenate %262, %263 in 1 : vector<4x1xbf16>, vector<4x15xbf16> -> vector<4x16xbf16>
    %265 = vector.extract_strided_slice %261 {offsets = [0, 1], sizes = [4, 15], strides = [1, 1]} : vector<4x16xbf16> to vector<4x15xbf16>
    %266 = vector.extract_strided_slice %261 {offsets = [0, 14], sizes = [4, 1], strides = [1, 1]} : vector<4x16xbf16> to vector<4x1xbf16>
    %267 = tpu.concatenate %265, %266 in 1 : vector<4x15xbf16>, vector<4x1xbf16> -> vector<4x16xbf16>
    %268 = tpu.concatenate %264, %261, %267 in 0 : vector<4x16xbf16>, vector<4x16xbf16>, vector<4x16xbf16> -> vector<12x16xbf16>
    %c0_64 = arith.constant 0 : index
    %c768_65 = arith.constant 768 : index
    %269 = vector.load %arg6[%c0_64, %c768_65] : memref<12x2304xbf16, #tpu.memory_space<vmem>>, vector<12x16xbf16>
    tpu.vector_store %arg6[%c0_64, %c768_65], %268 {strides = array<i32>} : memref<12x2304xbf16, #tpu.memory_space<vmem>>, vector<12x16xbf16>,
    %270 = vector.extract_strided_slice %215 {offsets = [0, 768], sizes = [4, 16], strides = [1, 1]} : vector<4x2048xbf16> to vector<4x16xbf16>
    %271 = vector.extract_strided_slice %270 {offsets = [0, 1], sizes = [4, 1], strides = [1, 1]} : vector<4x16xbf16> to vector<4x1xbf16>
    %272 = vector.extract_strided_slice %270 {offsets = [0, 0], sizes = [4, 15], strides = [1, 1]} : vector<4x16xbf16> to vector<4x15xbf16>
    %273 = tpu.concatenate %271, %272 in 1 : vector<4x1xbf16>, vector<4x15xbf16> -> vector<4x16xbf16>
    %274 = vector.extract_strided_slice %270 {offsets = [0, 1], sizes = [4, 15], strides = [1, 1]} : vector<4x16xbf16> to vector<4x15xbf16>
    %275 = vector.extract_strided_slice %270 {offsets = [0, 14], sizes = [4, 1], strides = [1, 1]} : vector<4x16xbf16> to vector<4x1xbf16>
    %276 = tpu.concatenate %274, %275 in 1 : vector<4x15xbf16>, vector<4x1xbf16> -> vector<4x16xbf16>
    %277 = tpu.concatenate %273, %270, %276 in 0 : vector<4x16xbf16>, vector<4x16xbf16>, vector<4x16xbf16> -> vector<12x16xbf16>
    %c0_66 = arith.constant 0 : index
    %c896_67 = arith.constant 896 : index
    %278 = vector.load %arg6[%c0_66, %c896_67] : memref<12x2304xbf16, #tpu.memory_space<vmem>>, vector<12x16xbf16>
    tpu.vector_store %arg6[%c0_66, %c896_67], %277 {strides = array<i32>} : memref<12x2304xbf16, #tpu.memory_space<vmem>>, vector<12x16xbf16>,
    %279 = vector.extract_strided_slice %215 {offsets = [0, 896], sizes = [4, 16], strides = [1, 1]} : vector<4x2048xbf16> to vector<4x16xbf16>
    %280 = vector.extract_strided_slice %279 {offsets = [0, 1], sizes = [4, 1], strides = [1, 1]} : vector<4x16xbf16> to vector<4x1xbf16>
    %281 = vector.extract_strided_slice %279 {offsets = [0, 0], sizes = [4, 15], strides = [1, 1]} : vector<4x16xbf16> to vector<4x15xbf16>
    %282 = tpu.concatenate %280, %281 in 1 : vector<4x1xbf16>, vector<4x15xbf16> -> vector<4x16xbf16>
    %283 = vector.extract_strided_slice %279 {offsets = [0, 1], sizes = [4, 15], strides = [1, 1]} : vector<4x16xbf16> to vector<4x15xbf16>
    %284 = vector.extract_strided_slice %279 {offsets = [0, 14], sizes = [4, 1], strides = [1, 1]} : vector<4x16xbf16> to vector<4x1xbf16>
    %285 = tpu.concatenate %283, %284 in 1 : vector<4x15xbf16>, vector<4x1xbf16> -> vector<4x16xbf16>
    %286 = tpu.concatenate %282, %279, %285 in 0 : vector<4x16xbf16>, vector<4x16xbf16>, vector<4x16xbf16> -> vector<12x16xbf16>
    %c0_68 = arith.constant 0 : index
    %c1024_69 = arith.constant 1024 : index
    %287 = vector.load %arg6[%c0_68, %c1024_69] : memref<12x2304xbf16, #tpu.memory_space<vmem>>, vector<12x16xbf16>
    tpu.vector_store %arg6[%c0_68, %c1024_69], %286 {strides = array<i32>} : memref<12x2304xbf16, #tpu.memory_space<vmem>>, vector<12x16xbf16>,
    %288 = vector.extract_strided_slice %215 {offsets = [0, 1024], sizes = [4, 16], strides = [1, 1]} : vector<4x2048xbf16> to vector<4x16xbf16>
    %289 = vector.extract_strided_slice %288 {offsets = [0, 1], sizes = [4, 1], strides = [1, 1]} : vector<4x16xbf16> to vector<4x1xbf16>
    %290 = vector.extract_strided_slice %288 {offsets = [0, 0], sizes = [4, 15], strides = [1, 1]} : vector<4x16xbf16> to vector<4x15xbf16>
    %291 = tpu.concatenate %289, %290 in 1 : vector<4x1xbf16>, vector<4x15xbf16> -> vector<4x16xbf16>
    %292 = vector.extract_strided_slice %288 {offsets = [0, 1], sizes = [4, 15], strides = [1, 1]} : vector<4x16xbf16> to vector<4x15xbf16>
    %293 = vector.extract_strided_slice %288 {offsets = [0, 14], sizes = [4, 1], strides = [1, 1]} : vector<4x16xbf16> to vector<4x1xbf16>
    %294 = tpu.concatenate %292, %293 in 1 : vector<4x15xbf16>, vector<4x1xbf16> -> vector<4x16xbf16>
    %295 = tpu.concatenate %291, %288, %294 in 0 : vector<4x16xbf16>, vector<4x16xbf16>, vector<4x16xbf16> -> vector<12x16xbf16>
    %c0_70 = arith.constant 0 : index
    %c1152_71 = arith.constant 1152 : index
    %296 = vector.load %arg6[%c0_70, %c1152_71] : memref<12x2304xbf16, #tpu.memory_space<vmem>>, vector<12x16xbf16>
    tpu.vector_store %arg6[%c0_70, %c1152_71], %295 {strides = array<i32>} : memref<12x2304xbf16, #tpu.memory_space<vmem>>, vector<12x16xbf16>,
    %297 = vector.extract_strided_slice %215 {offsets = [0, 1152], sizes = [4, 16], strides = [1, 1]} : vector<4x2048xbf16> to vector<4x16xbf16>
    %298 = vector.extract_strided_slice %297 {offsets = [0, 1], sizes = [4, 1], strides = [1, 1]} : vector<4x16xbf16> to vector<4x1xbf16>
    %299 = vector.extract_strided_slice %297 {offsets = [0, 0], sizes = [4, 15], strides = [1, 1]} : vector<4x16xbf16> to vector<4x15xbf16>
    %300 = tpu.concatenate %298, %299 in 1 : vector<4x1xbf16>, vector<4x15xbf16> -> vector<4x16xbf16>
    %301 = vector.extract_strided_slice %297 {offsets = [0, 1], sizes = [4, 15], strides = [1, 1]} : vector<4x16xbf16> to vector<4x15xbf16>
    %302 = vector.extract_strided_slice %297 {offsets = [0, 14], sizes = [4, 1], strides = [1, 1]} : vector<4x16xbf16> to vector<4x1xbf16>
    %303 = tpu.concatenate %301, %302 in 1 : vector<4x15xbf16>, vector<4x1xbf16> -> vector<4x16xbf16>
    %304 = tpu.concatenate %300, %297, %303 in 0 : vector<4x16xbf16>, vector<4x16xbf16>, vector<4x16xbf16> -> vector<12x16xbf16>
    %c0_72 = arith.constant 0 : index
    %c1280_73 = arith.constant 1280 : index
    %305 = vector.load %arg6[%c0_72, %c1280_73] : memref<12x2304xbf16, #tpu.memory_space<vmem>>, vector<12x16xbf16>
    tpu.vector_store %arg6[%c0_72, %c1280_73], %304 {strides = array<i32>} : memref<12x2304xbf16, #tpu.memory_space<vmem>>, vector<12x16xbf16>,
    %306 = vector.extract_strided_slice %215 {offsets = [0, 1280], sizes = [4, 16], strides = [1, 1]} : vector<4x2048xbf16> to vector<4x16xbf16>
    %307 = vector.extract_strided_slice %306 {offsets = [0, 1], sizes = [4, 1], strides = [1, 1]} : vector<4x16xbf16> to vector<4x1xbf16>
    %308 = vector.extract_strided_slice %306 {offsets = [0, 0], sizes = [4, 15], strides = [1, 1]} : vector<4x16xbf16> to vector<4x15xbf16>
    %309 = tpu.concatenate %307, %308 in 1 : vector<4x1xbf16>, vector<4x15xbf16> -> vector<4x16xbf16>
    %310 = vector.extract_strided_slice %306 {offsets = [0, 1], sizes = [4, 15], strides = [1, 1]} : vector<4x16xbf16> to vector<4x15xbf16>
    %311 = vector.extract_strided_slice %306 {offsets = [0, 14], sizes = [4, 1], strides = [1, 1]} : vector<4x16xbf16> to vector<4x1xbf16>
    %312 = tpu.concatenate %310, %311 in 1 : vector<4x15xbf16>, vector<4x1xbf16> -> vector<4x16xbf16>
    %313 = tpu.concatenate %309, %306, %312 in 0 : vector<4x16xbf16>, vector<4x16xbf16>, vector<4x16xbf16> -> vector<12x16xbf16>
    %c0_74 = arith.constant 0 : index
    %c1408_75 = arith.constant 1408 : index
    %314 = vector.load %arg6[%c0_74, %c1408_75] : memref<12x2304xbf16, #tpu.memory_space<vmem>>, vector<12x16xbf16>
    tpu.vector_store %arg6[%c0_74, %c1408_75], %313 {strides = array<i32>} : memref<12x2304xbf16, #tpu.memory_space<vmem>>, vector<12x16xbf16>,
    %315 = vector.extract_strided_slice %215 {offsets = [0, 1408], sizes = [4, 16], strides = [1, 1]} : vector<4x2048xbf16> to vector<4x16xbf16>
    %316 = vector.extract_strided_slice %315 {offsets = [0, 1], sizes = [4, 1], strides = [1, 1]} : vector<4x16xbf16> to vector<4x1xbf16>
    %317 = vector.extract_strided_slice %315 {offsets = [0, 0], sizes = [4, 15], strides = [1, 1]} : vector<4x16xbf16> to vector<4x15xbf16>
    %318 = tpu.concatenate %316, %317 in 1 : vector<4x1xbf16>, vector<4x15xbf16> -> vector<4x16xbf16>
    %319 = vector.extract_strided_slice %315 {offsets = [0, 1], sizes = [4, 15], strides = [1, 1]} : vector<4x16xbf16> to vector<4x15xbf16>
    %320 = vector.extract_strided_slice %315 {offsets = [0, 14], sizes = [4, 1], strides = [1, 1]} : vector<4x16xbf16> to vector<4x1xbf16>
    %321 = tpu.concatenate %319, %320 in 1 : vector<4x15xbf16>, vector<4x1xbf16> -> vector<4x16xbf16>
    %322 = tpu.concatenate %318, %315, %321 in 0 : vector<4x16xbf16>, vector<4x16xbf16>, vector<4x16xbf16> -> vector<12x16xbf16>
    %c0_76 = arith.constant 0 : index
    %c1536_77 = arith.constant 1536 : index
    %323 = vector.load %arg6[%c0_76, %c1536_77] : memref<12x2304xbf16, #tpu.memory_space<vmem>>, vector<12x16xbf16>
    tpu.vector_store %arg6[%c0_76, %c1536_77], %322 {strides = array<i32>} : memref<12x2304xbf16, #tpu.memory_space<vmem>>, vector<12x16xbf16>,
    %324 = vector.extract_strided_slice %215 {offsets = [0, 1536], sizes = [4, 16], strides = [1, 1]} : vector<4x2048xbf16> to vector<4x16xbf16>
    %325 = vector.extract_strided_slice %324 {offsets = [0, 1], sizes = [4, 1], strides = [1, 1]} : vector<4x16xbf16> to vector<4x1xbf16>
    %326 = vector.extract_strided_slice %324 {offsets = [0, 0], sizes = [4, 15], strides = [1, 1]} : vector<4x16xbf16> to vector<4x15xbf16>
    %327 = tpu.concatenate %325, %326 in 1 : vector<4x1xbf16>, vector<4x15xbf16> -> vector<4x16xbf16>
    %328 = vector.extract_strided_slice %324 {offsets = [0, 1], sizes = [4, 15], strides = [1, 1]} : vector<4x16xbf16> to vector<4x15xbf16>
    %329 = vector.extract_strided_slice %324 {offsets = [0, 14], sizes = [4, 1], strides = [1, 1]} : vector<4x16xbf16> to vector<4x1xbf16>
    %330 = tpu.concatenate %328, %329 in 1 : vector<4x15xbf16>, vector<4x1xbf16> -> vector<4x16xbf16>
    %331 = tpu.concatenate %327, %324, %330 in 0 : vector<4x16xbf16>, vector<4x16xbf16>, vector<4x16xbf16> -> vector<12x16xbf16>
    %c0_78 = arith.constant 0 : index
    %c1664_79 = arith.constant 1664 : index
    %332 = vector.load %arg6[%c0_78, %c1664_79] : memref<12x2304xbf16, #tpu.memory_space<vmem>>, vector<12x16xbf16>
    tpu.vector_store %arg6[%c0_78, %c1664_79], %331 {strides = array<i32>} : memref<12x2304xbf16, #tpu.memory_space<vmem>>, vector<12x16xbf16>,
    %333 = vector.extract_strided_slice %215 {offsets = [0, 1664], sizes = [4, 16], strides = [1, 1]} : vector<4x2048xbf16> to vector<4x16xbf16>
    %334 = vector.extract_strided_slice %333 {offsets = [0, 1], sizes = [4, 1], strides = [1, 1]} : vector<4x16xbf16> to vector<4x1xbf16>
    %335 = vector.extract_strided_slice %333 {offsets = [0, 0], sizes = [4, 15], strides = [1, 1]} : vector<4x16xbf16> to vector<4x15xbf16>
    %336 = tpu.concatenate %334, %335 in 1 : vector<4x1xbf16>, vector<4x15xbf16> -> vector<4x16xbf16>
    %337 = vector.extract_strided_slice %333 {offsets = [0, 1], sizes = [4, 15], strides = [1, 1]} : vector<4x16xbf16> to vector<4x15xbf16>
    %338 = vector.extract_strided_slice %333 {offsets = [0, 14], sizes = [4, 1], strides = [1, 1]} : vector<4x16xbf16> to vector<4x1xbf16>
    %339 = tpu.concatenate %337, %338 in 1 : vector<4x15xbf16>, vector<4x1xbf16> -> vector<4x16xbf16>
    %340 = tpu.concatenate %336, %333, %339 in 0 : vector<4x16xbf16>, vector<4x16xbf16>, vector<4x16xbf16> -> vector<12x16xbf16>
    %c0_80 = arith.constant 0 : index
    %c1792_81 = arith.constant 1792 : index
    %341 = vector.load %arg6[%c0_80, %c1792_81] : memref<12x2304xbf16, #tpu.memory_space<vmem>>, vector<12x16xbf16>
    tpu.vector_store %arg6[%c0_80, %c1792_81], %340 {strides = array<i32>} : memref<12x2304xbf16, #tpu.memory_space<vmem>>, vector<12x16xbf16>,
    %342 = vector.extract_strided_slice %215 {offsets = [0, 1792], sizes = [4, 16], strides = [1, 1]} : vector<4x2048xbf16> to vector<4x16xbf16>
    %343 = vector.extract_strided_slice %342 {offsets = [0, 1], sizes = [4, 1], strides = [1, 1]} : vector<4x16xbf16> to vector<4x1xbf16>
    %344 = vector.extract_strided_slice %342 {offsets = [0, 0], sizes = [4, 15], strides = [1, 1]} : vector<4x16xbf16> to vector<4x15xbf16>
    %345 = tpu.concatenate %343, %344 in 1 : vector<4x1xbf16>, vector<4x15xbf16> -> vector<4x16xbf16>
    %346 = vector.extract_strided_slice %342 {offsets = [0, 1], sizes = [4, 15], strides = [1, 1]} : vector<4x16xbf16> to vector<4x15xbf16>
    %347 = vector.extract_strided_slice %342 {offsets = [0, 14], sizes = [4, 1], strides = [1, 1]} : vector<4x16xbf16> to vector<4x1xbf16>
    %348 = tpu.concatenate %346, %347 in 1 : vector<4x15xbf16>, vector<4x1xbf16> -> vector<4x16xbf16>
    %349 = tpu.concatenate %345, %342, %348 in 0 : vector<4x16xbf16>, vector<4x16xbf16>, vector<4x16xbf16> -> vector<12x16xbf16>
    %c0_82 = arith.constant 0 : index
    %c1920_83 = arith.constant 1920 : index
    %350 = vector.load %arg6[%c0_82, %c1920_83] : memref<12x2304xbf16, #tpu.memory_space<vmem>>, vector<12x16xbf16>
    tpu.vector_store %arg6[%c0_82, %c1920_83], %349 {strides = array<i32>} : memref<12x2304xbf16, #tpu.memory_space<vmem>>, vector<12x16xbf16>,
    %351 = vector.extract_strided_slice %215 {offsets = [0, 1920], sizes = [4, 16], strides = [1, 1]} : vector<4x2048xbf16> to vector<4x16xbf16>
    %352 = vector.extract_strided_slice %351 {offsets = [0, 1], sizes = [4, 1], strides = [1, 1]} : vector<4x16xbf16> to vector<4x1xbf16>
    %353 = vector.extract_strided_slice %351 {offsets = [0, 0], sizes = [4, 15], strides = [1, 1]} : vector<4x16xbf16> to vector<4x15xbf16>
    %354 = tpu.concatenate %352, %353 in 1 : vector<4x1xbf16>, vector<4x15xbf16> -> vector<4x16xbf16>
    %355 = vector.extract_strided_slice %351 {offsets = [0, 1], sizes = [4, 15], strides = [1, 1]} : vector<4x16xbf16> to vector<4x15xbf16>
    %356 = vector.extract_strided_slice %351 {offsets = [0, 14], sizes = [4, 1], strides = [1, 1]} : vector<4x16xbf16> to vector<4x1xbf16>
    %357 = tpu.concatenate %355, %356 in 1 : vector<4x15xbf16>, vector<4x1xbf16> -> vector<4x16xbf16>
    %358 = tpu.concatenate %354, %351, %357 in 0 : vector<4x16xbf16>, vector<4x16xbf16>, vector<4x16xbf16> -> vector<12x16xbf16>
    %c0_84 = arith.constant 0 : index
    %c2048_85 = arith.constant 2048 : index
    %359 = vector.load %arg6[%c0_84, %c2048_85] : memref<12x2304xbf16, #tpu.memory_space<vmem>>, vector<12x16xbf16>
    tpu.vector_store %arg6[%c0_84, %c2048_85], %358 {strides = array<i32>} : memref<12x2304xbf16, #tpu.memory_space<vmem>>, vector<12x16xbf16>,
    %360 = vector.extract_strided_slice %215 {offsets = [0, 128], sizes = [4, 16], strides = [1, 1]} : vector<4x2048xbf16> to vector<4x16xbf16>
    %361 = vector.extract_strided_slice %360 {offsets = [0, 1], sizes = [4, 1], strides = [1, 1]} : vector<4x16xbf16> to vector<4x1xbf16>
    %362 = vector.extract_strided_slice %360 {offsets = [0, 0], sizes = [4, 15], strides = [1, 1]} : vector<4x16xbf16> to vector<4x15xbf16>
    %363 = tpu.concatenate %361, %362 in 1 : vector<4x1xbf16>, vector<4x15xbf16> -> vector<4x16xbf16>
    %364 = vector.extract_strided_slice %360 {offsets = [0, 1], sizes = [4, 15], strides = [1, 1]} : vector<4x16xbf16> to vector<4x15xbf16>
    %365 = vector.extract_strided_slice %360 {offsets = [0, 14], sizes = [4, 1], strides = [1, 1]} : vector<4x16xbf16> to vector<4x1xbf16>
    %366 = tpu.concatenate %364, %365 in 1 : vector<4x15xbf16>, vector<4x1xbf16> -> vector<4x16xbf16>
    %367 = tpu.concatenate %363, %360, %366 in 0 : vector<4x16xbf16>, vector<4x16xbf16>, vector<4x16xbf16> -> vector<12x16xbf16>
    %c0_86 = arith.constant 0 : index
    %c0_87 = arith.constant 0 : index
    %368 = vector.load %arg6[%c0_86, %c0_87] : memref<12x2304xbf16, #tpu.memory_space<vmem>>, vector<12x16xbf16>
    tpu.vector_store %arg6[%c0_86, %c0_87], %367 {strides = array<i32>} : memref<12x2304xbf16, #tpu.memory_space<vmem>>, vector<12x16xbf16>,
    %369 = vector.extract_strided_slice %215 {offsets = [0, 1792], sizes = [4, 16], strides = [1, 1]} : vector<4x2048xbf16> to vector<4x16xbf16>
    %370 = vector.extract_strided_slice %369 {offsets = [0, 1], sizes = [4, 1], strides = [1, 1]} : vector<4x16xbf16> to vector<4x1xbf16>
    %371 = vector.extract_strided_slice %369 {offsets = [0, 0], sizes = [4, 15], strides = [1, 1]} : vector<4x16xbf16> to vector<4x15xbf16>
    %372 = tpu.concatenate %370, %371 in 1 : vector<4x1xbf16>, vector<4x15xbf16> -> vector<4x16xbf16>
    %373 = vector.extract_strided_slice %369 {offsets = [0, 1], sizes = [4, 15], strides = [1, 1]} : vector<4x16xbf16> to vector<4x15xbf16>
    %374 = vector.extract_strided_slice %369 {offsets = [0, 14], sizes = [4, 1], strides = [1, 1]} : vector<4x16xbf16> to vector<4x1xbf16>
    %375 = tpu.concatenate %373, %374 in 1 : vector<4x15xbf16>, vector<4x1xbf16> -> vector<4x16xbf16>
    %376 = tpu.concatenate %372, %369, %375 in 0 : vector<4x16xbf16>, vector<4x16xbf16>, vector<4x16xbf16> -> vector<12x16xbf16>
    %c0_88 = arith.constant 0 : index
    %c2176_89 = arith.constant 2176 : index
    %377 = vector.load %arg6[%c0_88, %c2176_89] : memref<12x2304xbf16, #tpu.memory_space<vmem>>, vector<12x16xbf16>
    tpu.vector_store %arg6[%c0_88, %c2176_89], %376 {strides = array<i32>} : memref<12x2304xbf16, #tpu.memory_space<vmem>>, vector<12x16xbf16>,
    %c0_90 = arith.constant 0 : index
    %c0_91 = arith.constant 0 : index
    %c0_92 = arith.constant 0 : index
    %378 = vector.load %arg3[%c0_90, %c0_91, %c0_92] : memref<3x4x12xbf16, #tpu.memory_space<vmem>>, vector<1x4x12xbf16>
    %379 = vector.shape_cast %378 : vector<1x4x12xbf16> to vector<4x12xbf16>
    %c0_93 = arith.constant 0 : index
    %c0_94 = arith.constant 0 : index
    %380 = vector.load %arg6[%c0_93, %c0_94] : memref<12x2304xbf16, #tpu.memory_space<vmem>>, vector<12x2048xbf16>
    %cst_95 = arith.constant dense<0.000000e+00> : vector<4x2048xf32>
    %381 = tpu.matmul %379, %380, %cst_95 {dimension_numbers = #tpu.dot_dimension_numbers<[1], [0], [0], [1], [0, 0, 1, 1], [], []>} : vector<4x12xbf16>, vector<12x2048xbf16>, vector<4x2048xf32> -> vector<4x2048xf32>
    %c1_96 = arith.constant 1 : index
    %c0_97 = arith.constant 0 : index
    %c0_98 = arith.constant 0 : index
    %382 = vector.load %arg3[%c1_96, %c0_97, %c0_98] : memref<3x4x12xbf16, #tpu.memory_space<vmem>>, vector<1x4x12xbf16>
    %383 = vector.shape_cast %382 : vector<1x4x12xbf16> to vector<4x12xbf16>
    %c0_99 = arith.constant 0 : index
    %c128_100 = arith.constant 128 : index
    %384 = vector.load %arg6[%c0_99, %c128_100] : memref<12x2304xbf16, #tpu.memory_space<vmem>>, vector<12x2048xbf16>
    %cst_101 = arith.constant dense<0.000000e+00> : vector<4x2048xf32>
    %385 = tpu.matmul %383, %384, %cst_101 {dimension_numbers = #tpu.dot_dimension_numbers<[1], [0], [0], [1], [0, 0, 1, 1], [], []>} : vector<4x12xbf16>, vector<12x2048xbf16>, vector<4x2048xf32> -> vector<4x2048xf32>
    %386 = arith.addf %381, %385 : vector<4x2048xf32>
    %c2_102 = arith.constant 2 : index
    %c0_103 = arith.constant 0 : index
    %c0_104 = arith.constant 0 : index
    %387 = vector.load %arg3[%c2_102, %c0_103, %c0_104] : memref<3x4x12xbf16, #tpu.memory_space<vmem>>, vector<1x4x12xbf16>
    %388 = vector.shape_cast %387 : vector<1x4x12xbf16> to vector<4x12xbf16>
    %c0_105 = arith.constant 0 : index
    %c256_106 = arith.constant 256 : index
    %389 = vector.load %arg6[%c0_105, %c256_106] : memref<12x2304xbf16, #tpu.memory_space<vmem>>, vector<12x2048xbf16>
    %cst_107 = arith.constant dense<0.000000e+00> : vector<4x2048xf32>
    %390 = tpu.matmul %388, %389, %cst_107 {dimension_numbers = #tpu.dot_dimension_numbers<[1], [0], [0], [1], [0, 0, 1, 1], [], []>} : vector<4x12xbf16>, vector<12x2048xbf16>, vector<4x2048xf32> -> vector<4x2048xf32>
    %391 = arith.addf %386, %390 : vector<4x2048xf32>
    %cst_108 = arith.constant 0.000000e+00 : f32
    %392 = vector.shape_cast %2 : vector<1x2048xi1> to vector<1x2048xi1>
    %393 = vector.broadcast %392 : vector<1x2048xi1> to vector<4x2048xi1>
    %394 = vector.broadcast %cst_108 : f32 to vector<4x2048xf32>
    %395 = arith.select %393, %391, %394 : vector<4x2048xi1>, vector<4x2048xf32>
    %cst_109 = arith.constant dense<0.000000e+00> : vector<4xf32>
    %396 = vector.multi_reduction <add>, %395, %cst_109 [1] : vector<4x2048xf32> to vector<4xf32>
    %397 = vector.shape_cast %396 : vector<4xf32> to vector<4x1xf32>
    %cst_110 = arith.constant 3.906250e-03 : f32
    %398 = vector.broadcast %cst_110 : f32 to vector<4x1xf32>
    %399 = arith.mulf %397, %398 : vector<4x1xf32>
    %400 = vector.broadcast %399 : vector<4x1xf32> to vector<4x2048xf32>
    %401 = arith.subf %391, %400 : vector<4x2048xf32>
    %cst_111 = arith.constant 0.000000e+00 : f32
    %402 = vector.shape_cast %2 : vector<1x2048xi1> to vector<1x2048xi1>
    %403 = vector.broadcast %402 : vector<1x2048xi1> to vector<4x2048xi1>
    %404 = vector.broadcast %cst_111 : f32 to vector<4x2048xf32>
    %405 = arith.select %403, %401, %404 : vector<4x2048xi1>, vector<4x2048xf32>
    %406 = arith.mulf %405, %405 : vector<4x2048xf32>
    %cst_112 = arith.constant dense<0.000000e+00> : vector<4xf32>
    %407 = vector.multi_reduction <add>, %406, %cst_112 [1] : vector<4x2048xf32> to vector<4xf32>
    %408 = vector.shape_cast %407 : vector<4xf32> to vector<4x1xf32>
    %cst_113 = arith.constant 3.906250e-03 : f32
    %409 = vector.broadcast %cst_113 : f32 to vector<4x1xf32>
    %410 = arith.mulf %408, %409 : vector<4x1xf32>
    %cst_114 = arith.constant 9.99999974E-6 : f32
    %411 = vector.broadcast %cst_114 : f32 to vector<4x1xf32>
    %412 = arith.addf %410, %411 : vector<4x1xf32>
    %413 = math.rsqrt %412 : vector<4x1xf32>
    %414 = vector.broadcast %413 : vector<4x1xf32> to vector<4x2048xf32>
    %415 = arith.mulf %401, %414 : vector<4x2048xf32>
    %416 = vector.extract_strided_slice %415 {offsets = [0, 0], sizes = [4, 16], strides = [1, 1]} : vector<4x2048xf32> to vector<4x16xf32>
    %417 = vector.extract_strided_slice %415 {offsets = [0, 128], sizes = [4, 16], strides = [1, 1]} : vector<4x2048xf32> to vector<4x16xf32>
    %418 = vector.extract_strided_slice %415 {offsets = [0, 256], sizes = [4, 16], strides = [1, 1]} : vector<4x2048xf32> to vector<4x16xf32>
    %419 = vector.extract_strided_slice %415 {offsets = [0, 384], sizes = [4, 16], strides = [1, 1]} : vector<4x2048xf32> to vector<4x16xf32>
    %420 = vector.extract_strided_slice %415 {offsets = [0, 512], sizes = [4, 16], strides = [1, 1]} : vector<4x2048xf32> to vector<4x16xf32>
    %421 = vector.extract_strided_slice %415 {offsets = [0, 640], sizes = [4, 16], strides = [1, 1]} : vector<4x2048xf32> to vector<4x16xf32>
    %422 = vector.extract_strided_slice %415 {offsets = [0, 768], sizes = [4, 16], strides = [1, 1]} : vector<4x2048xf32> to vector<4x16xf32>
    %423 = vector.extract_strided_slice %415 {offsets = [0, 896], sizes = [4, 16], strides = [1, 1]} : vector<4x2048xf32> to vector<4x16xf32>
    %424 = tpu.concatenate %416, %417, %418, %419, %420, %421, %422, %423 in 1 : vector<4x16xf32>, vector<4x16xf32>, vector<4x16xf32>, vector<4x16xf32>, vector<4x16xf32>, vector<4x16xf32>, vector<4x16xf32>, vector<4x16xf32> -> vector<4x128xf32>
    %c0_115 = arith.constant 0 : index
    %c0_116 = arith.constant 0 : index
    %c0_117 = arith.constant 0 : index
    %425 = vector.load %arg1[%c0_115, %c0_116, %c0_117] : memref<1x4x256xf32, #tpu.memory_space<vmem>>, vector<1x4x128xf32>
    %426 = vector.shape_cast %425 : vector<1x4x128xf32> to vector<4x128xf32>
    %427 = arith.addf %426, %424 : vector<4x128xf32>
    %c0_118 = arith.constant 0 : index
    %c0_119 = arith.constant 0 : index
    %c0_120 = arith.constant 0 : index
    %428 = vector.load %arg5[%c0_118, %c0_119, %c0_120] : memref<1x4x256xf32, #tpu.memory_space<vmem>>, vector<1x4x128xf32>
    %429 = vector.shape_cast %428 : vector<1x4x128xf32> to vector<4x128xf32>
    %430 = vector.shape_cast %427 : vector<4x128xf32> to vector<1x4x128xf32>
    tpu.vector_store %arg5[%c0_118, %c0_119, %c0_120], %430 {strides = array<i32>} : memref<1x4x256xf32, #tpu.memory_space<vmem>>, vector<1x4x128xf32>,
    %431 = vector.extract_strided_slice %415 {offsets = [0, 1024], sizes = [4, 16], strides = [1, 1]} : vector<4x2048xf32> to vector<4x16xf32>
    %432 = vector.extract_strided_slice %415 {offsets = [0, 1152], sizes = [4, 16], strides = [1, 1]} : vector<4x2048xf32> to vector<4x16xf32>
    %433 = vector.extract_strided_slice %415 {offsets = [0, 1280], sizes = [4, 16], strides = [1, 1]} : vector<4x2048xf32> to vector<4x16xf32>
    %434 = vector.extract_strided_slice %415 {offsets = [0, 1408], sizes = [4, 16], strides = [1, 1]} : vector<4x2048xf32> to vector<4x16xf32>
    %435 = vector.extract_strided_slice %415 {offsets = [0, 1536], sizes = [4, 16], strides = [1, 1]} : vector<4x2048xf32> to vector<4x16xf32>
    %436 = vector.extract_strided_slice %415 {offsets = [0, 1664], sizes = [4, 16], strides = [1, 1]} : vector<4x2048xf32> to vector<4x16xf32>
    %437 = vector.extract_strided_slice %415 {offsets = [0, 1792], sizes = [4, 16], strides = [1, 1]} : vector<4x2048xf32> to vector<4x16xf32>
    %438 = vector.extract_strided_slice %415 {offsets = [0, 1920], sizes = [4, 16], strides = [1, 1]} : vector<4x2048xf32> to vector<4x16xf32>
    %439 = tpu.concatenate %431, %432, %433, %434, %435, %436, %437, %438 in 1 : vector<4x16xf32>, vector<4x16xf32>, vector<4x16xf32>, vector<4x16xf32>, vector<4x16xf32>, vector<4x16xf32>, vector<4x16xf32>, vector<4x16xf32> -> vector<4x128xf32>
    %c0_121 = arith.constant 0 : index
    %c0_122 = arith.constant 0 : index
    %c128_123 = arith.constant 128 : index
    %440 = vector.load %arg1[%c0_121, %c0_122, %c128_123] : memref<1x4x256xf32, #tpu.memory_space<vmem>>, vector<1x4x128xf32>
    %441 = vector.shape_cast %440 : vector<1x4x128xf32> to vector<4x128xf32>
    %442 = arith.addf %441, %439 : vector<4x128xf32>
    %c0_124 = arith.constant 0 : index
    %c0_125 = arith.constant 0 : index
    %c128_126 = arith.constant 128 : index
    %443 = vector.load %arg5[%c0_124, %c0_125, %c128_126] : memref<1x4x256xf32, #tpu.memory_space<vmem>>, vector<1x4x128xf32>
    %444 = vector.shape_cast %443 : vector<1x4x128xf32> to vector<4x128xf32>
    %445 = vector.shape_cast %442 : vector<4x128xf32> to vector<1x4x128xf32>
    tpu.vector_store %arg5[%c0_124, %c0_125, %c128_126], %445 {strides = array<i32>} : memref<1x4x256xf32, #tpu.memory_space<vmem>>, vector<1x4x128xf32>,
    return
  }
  func.func @transform_0(%arg0: i32) -> (i32, i32, i32) {
    %c0_i32 = arith.constant 0 : i32
    %c0_i32_0 = arith.constant 0 : i32
    %c0_i32_1 = arith.constant 0 : i32
    return %arg0, %c0_i32, %c0_i32_0 : i32, i32, i32
  }
  func.func @transform_1(%arg0: i32) -> (i32, i32, i32) {
    %c0_i32 = arith.constant 0 : i32
    %c0_i32_0 = arith.constant 0 : i32
    %c0_i32_1 = arith.constant 0 : i32
    %c0_i32_2 = arith.constant 0 : i32
    return %c0_i32, %c0_i32_0, %c0_i32_1 : i32, i32, i32
  }
  func.func @transform_2(%arg0: i32) -> (i32, i32, i32) {
    %c0_i32 = arith.constant 0 : i32
    %c0_i32_0 = arith.constant 0 : i32
    %c0_i32_1 = arith.constant 0 : i32
    %c0_i32_2 = arith.constant 0 : i32
    return %c0_i32, %c0_i32_0, %c0_i32_1 : i32, i32, i32
  }
  func.func @transform_3(%arg0: i32) -> (i32, i32) {
    %c0_i32 = arith.constant 0 : i32
    %c0_i32_0 = arith.constant 0 : i32
    %c0_i32_1 = arith.constant 0 : i32
    return %c0_i32, %c0_i32_0 : i32, i32
  }
  func.func @transform_4(%arg0: i32) -> (i32, i32, i32) {
    %c0_i32 = arith.constant 0 : i32
    %c0_i32_0 = arith.constant 0 : i32
    %c0_i32_1 = arith.constant 0 : i32
    return %arg0, %c0_i32, %c0_i32_0 : i32, i32, i32
  }
}

</mosaic_0001>

<bundles_post_ra>
// kernel: tile.8
= control target key start
LH: loop header
LB: loop body
LE: loop exit
PB: predicated region body
PF: predicated region fallthrough
CT: control target
= control target key end

     0   :  { %s28_s0 = inlined_call_operand.vmem [shape: f32[128], index: 0, kind: input, shape index: {}]   ;;  %s29_s1 = inlined_call_operand.vmem [shape: f32[16,128], index: 1, kind: output, shape index: {}]  }
   0x1   :  { %v4_v0 = vld [vmem:[%s28_s0] ss:$0 sm:$0xff] }
   0x2   :  { %5 = vst [vmem:[%s29_s1] sm:$0xff] %v4_v0  ;;  %8 = vst [vmem:[%s29_s1 + $0x8] sm:$0xff] %v4_v0 }

// kernel: residual_block.1
= control target key start
LH: loop header
LB: loop body
LE: loop exit
PB: predicated region body
PF: predicated region fallthrough
CT: control target
= control target key end

     0   :  { %s4910_s15 = smov 0   ;;  %s6364_s0 = inlined_call_operand.vmem [shape: f32[2,4,256], index: 0, kind: input, shape index: {}]   ;;  %s6365_s1 = inlined_call_operand.vmem [shape: bf16[3,4,12], index: 1, kind: input, shape index: {}]   ;;  %s6366_s2 = inlined_call_operand.vmem [shape: bf16[3,4,12], index: 2, kind: input, shape index: {}]   ;;  %s6367_s3 = inlined_call_operand.vmem [shape: f32[1,2048], index: 3, kind: input, shape index: {}]   ;;  %s6368_s4 = inlined_call_operand.vmem [shape: f32[2,4,256], index: 4, kind: output, shape index: {}]  }
   0x1 LB: > { %s4425_s16 = sadd.s32 4294967295, %s4859_s15   ;;  %p4429_p0 = scmp.ge.s32.totalorder %s4859_s15, 1  ;;  %s4859_s15 = sphi %s4910_s15, %s14_s15  }
   0x2   : > { %p162_p1 = scmp.lt.s32.totalorder %s4859_s15, 3 }
   0x4   : > { %p163_p2 = pnand %p4429_p0, %p162_p1 }
   0x5   : > { %p188_p3 = scmp.lt.s32.totalorder (!%p163_p2), %s4425_s16, 1  ;;  %s4861_s21 = smov (!%p163_p2), 111  }
   0x6   : > { %166 = sbr.rel (%p163_p2) target bundleno = 1780 (0x6f4), region = 36  ;;  %s4862_s22 = smov (!%p163_p2), 127  }
   0x7   : > { %s4863_s23 = smov (!%p163_p2), 113   ;;  %s4864_s24 = smov (!%p163_p2), 1  }
   0x8   : > { %s4865_s25 = smov (!%p163_p2), 95   ;;  %s4866_s26 = smov (!%p163_p2), 112  }
   0x9   : > { %s4867_s27 = smov (!%p163_p2), 79   ;;  %s4868_s28 = smov (!%p163_p2), 97  }
   0xa   : > { %s4869_s29 = smov (!%p163_p2), 96   ;;  %s4870_s30 = smov (!%p163_p2), 81  }
   0xb   : > { %s6533_s16 = smov (!%p188_p3, %s4425_s16), 1  ;;  %s4871_s5 = smov 63   ;;  %v4879_v3 = vmov 0   ;;  %vm6376_vm0 = vcmask 7168   ;;  %vm6375_vm1 = vcmask 121856   ;;  %vm6374_vm2 = vcmask 1041408  }
   0xc   : > { %s6369_s17 = sshll.u32 %s6533_s16, 3  ;;  %s4872_s6 = smov 80   ;;  %855 = vmatprep.mubr.bf16.mxu0 %v4879_v3  ;;  %896 = vmatprep.mubr.bf16.mxu1 %v4879_v3  ;;  %vm222_vm3 = vcmask 1043456   ;;  %vm6373_vm4 = vcmask 125952   ;;  %vm6372_vm5 = vcmask 123904   ;;  %vm6371_vm6 = vcmask 1045504  }
   0xd   : > { %s4926_s20 = scalar_lea.vmem %s6364_s0, %s6369_s17  ;;  %s4873_s7 = smov 47   ;;  %v5030_v58 = vld [vmem:[%s6365_s1 + $0x2] sm:$0x3]  ;;  %vm6370_vm7 = vcmask 97280  }
   0xe   : > { %v203_v0 = vld [vmem:[%s4926_s20] sm:$0xf]  ;;  %s4874_s8 = smov 65   ;;  %s4875_s9 = smov 64   ;;  %v411_v4 = vld [vmem:[%s4926_s20 + $0x4] sm:$0xf] }
   0xf   : > { %v204_v1 = vpack.c.bf16 %v203_v0, %v203_v0  ;;  %s4876_s10 = smov 49   ;;  %s4877_s11 = smov 31   ;;  %v412_v5 = vpack.c.bf16 %v411_v4, %v411_v4  ;;  %v613_v7 = vld [vmem:[%s4926_s20] sm:$0xf]  ;;  %v642_v9 = vld [vmem:[%s4926_s20 + $0x4] sm:$0xf] }
  0x10   : > { %s4878_s12 = smov 48   ;;  %s4880_s13 = smov 15   ;;  %v614_v8 = vpack.c.bf16 %v613_v7, %v613_v7  ;;  %v643_v11 = vpack.c.bf16 %v642_v9, %v642_v9 }
  0x11   : > { %236 = vrot.lane.b32.xlu1 %v204_v1, %s4861_s21  ;;  %206 = vrot.lane.b32.xlu0 %v204_v1, %s4862_s22  ;;  %v4933_v2 = vrot.slane %v204_v1, 6  ;;  %s4881_s14 = smov 33   ;;  %s4882_s18 = smov 32   ;;  %v4966_v6 = vrot.slane %v412_v5, 6 }
  0x12   : > { %s4883_s19 = smov 17   ;;  %s4884_s17 = smov 16   ;;  %v624_v10 = vrot.slane %v614_v8, 6  ;;  %v653_v12 = vrot.slane %v643_v11, 6 }
  0x15   : > { %238 = vrot.lane.b32.xlu1 %v204_v1, %s4863_s23  ;;  %208 = vrot.lane.b32.xlu0 %v204_v1, %s4864_s24 }
  0x19   : > { %261 = vrot.lane.b32.xlu1 %v204_v1, %s4865_s25  ;;  %244 = vrot.lane.b32.xlu0 %v4933_v2, %s4866_s26 }
  0x1d   : > { %286 = vrot.lane.b32.xlu1 %v204_v1, %s4867_s27  ;;  %263 = vrot.lane.b32.xlu0 %v204_v1, %s4868_s28 }
  0x21   : > { %269 = vrot.lane.b32.xlu1 %v4933_v2, %s4869_s29  ;;  %288 = vrot.lane.b32.xlu0 %v204_v1, %s4870_s30 }
  0x25   : > { %311 = vrot.lane.b32.xlu1 %v204_v1, %s4871_s5  ;;  %294 = vrot.lane.b32.xlu0 %v4933_v2, %s4872_s6 }
  0x29   : > { %336 = vrot.lane.b32.xlu1 %v204_v1, %s4873_s7  ;;  %313 = vrot.lane.b32.xlu0 %v204_v1, %s4874_s8 }
  0x2d   : > { %319 = vrot.lane.b32.xlu1 %v4933_v2, %s4875_s9  ;;  %338 = vrot.lane.b32.xlu0 %v204_v1, %s4876_s10 }
  0x31   : > { %361 = vrot.lane.b32.xlu1 %v204_v1, %s4877_s11  ;;  %344 = vrot.lane.b32.xlu0 %v4933_v2, %s4878_s12 }
  0x35   : > { %386 = vrot.lane.b32.xlu1 %v204_v1, %s4880_s13  ;;  %363 = vrot.lane.b32.xlu0 %v204_v1, %s4881_s14 }
  0x39   : > { %369 = vrot.lane.b32.xlu1 %v4933_v2, %s4882_s18  ;;  %388 = vrot.lane.b32.xlu0 %v204_v1, %s4883_s19 }
  0x3d   : > { %414 = vrot.lane.b32.xlu1 %v412_v5, %s4862_s22  ;;  %394 = vrot.lane.b32.xlu0 %v4933_v2, %s4884_s17 }
  0x41   : > { %438 = vrot.lane.b32.xlu1 %v412_v5, %s4861_s21  ;;  %416 = vrot.lane.b32.xlu0 %v412_v5, %s4864_s24 }
  0x45   : > { %446 = vrot.lane.b32.xlu1 %v4966_v6, %s4866_s26  ;;  %440 = vrot.lane.b32.xlu0 %v412_v5, %s4863_s23 }
  0x49   : > { %465 = vrot.lane.b32.xlu1 %v412_v5, %s4868_s28  ;;  %463 = vrot.lane.b32.xlu0 %v412_v5, %s4865_s25 }
  0x4d   : > { %490 = vrot.lane.b32.xlu1 %v412_v5, %s4870_s30  ;;  %488 = vrot.lane.b32.xlu0 %v412_v5, %s4867_s27 }
  0x51   : > { %496 = vrot.lane.b32.xlu1 %v4966_v6, %s4872_s6  ;;  %471 = vrot.lane.b32.xlu0 %v4966_v6, %s4869_s29 }
  0x55   : > { %515 = vrot.lane.b32.xlu1 %v412_v5, %s4874_s8  ;;  %513 = vrot.lane.b32.xlu0 %v412_v5, %s4871_s5 }
  0x59   : > { %540 = vrot.lane.b32.xlu1 %v412_v5, %s4876_s10  ;;  %538 = vrot.lane.b32.xlu0 %v412_v5, %s4873_s7 }
  0x5d   : > { %546 = vrot.lane.b32.xlu1 %v4966_v6, %s4878_s12  ;;  %521 = vrot.lane.b32.xlu0 %v4966_v6, %s4875_s9 }
  0x61   : > { %565 = vrot.lane.b32.xlu1 %v412_v5, %s4881_s14  ;;  %563 = vrot.lane.b32.xlu0 %v412_v5, %s4877_s11 }
  0x65   : > { %590 = vrot.lane.b32.xlu1 %v412_v5, %s4883_s19  ;;  %588 = vrot.lane.b32.xlu0 %v412_v5, %s4880_s13 }
  0x69   : > { %596 = vrot.lane.b32.xlu1 %v4966_v6, %s4884_s17  ;;  %571 = vrot.lane.b32.xlu0 %v4966_v6, %s4882_s18 }
  0x6d   : > { %618 = vrot.lane.b32.xlu1 %v614_v8, %s4863_s23  ;;  %616 = vrot.lane.b32.xlu0 %v614_v8, %s4861_s21 }
  0x71   : > { %625 = vrot.lane.b32.xlu0 %v624_v10, %s4866_s26  ;;  %645 = vrot.lane.b32.xlu1 %v643_v11, %s4877_s11 }
  0x75   : > { %647 = vrot.lane.b32.xlu0 %v643_v11, %s4881_s14  ;;  %654 = vrot.lane.b32.xlu1 %v653_v12, %s4882_s18 }
  0x83   : > { %v237_v13 = vpop.permute.xlu1 %236  ;;  %v207_v14 = vpop.permute.xlu0 %206 }
  0x87   : > { %v239_v15 = vpop.permute.xlu1 %238  ;;  %v209_v16 = vpop.permute.xlu0 %208 }
  0x88   : > { %v243_v17 = vsel %vm6375_vm1, %v237_v13, %v239_v15  ;;  %v213_v18 = vsel %vm6376_vm0, %v207_v14, %v209_v16  ;;  %v215_v19 = vsel %vm6375_vm1, %v207_v14, %v209_v16  ;;  %v242_v22 = vsel %vm6376_vm0, %v237_v13, %v239_v15 }
  0x89   : > { %v218_v20 = vrot.slane %v215_v19, 4  ;;  %v221_v21 = vsel %vm6374_vm2, %v213_v18, %v4933_v2  ;;  %v247_v23 = vrot.slane %v243_v17, 4 }
  0x8b   : > { %v224_v24 = vsel %vm222_vm3, %v221_v21, %v218_v20  ;;  %v262_v25 = vpop.permute.xlu1 %261  ;;  %v245_v26 = vpop.permute.xlu0 %244 }
  0x8c   : > { %v4434_v27 = vcombine.low %v224_v24, %v224_v24  ;;  %v4435_v28 = vcombine.high %v224_v24, %v224_v24  ;;  %v249_v29 = vsel %vm6374_vm2, %v242_v22, %v245_v26 }
  0x8d   : > { %v251_v30 = vsel %vm222_vm3, %v249_v29, %v247_v23 }
  0x8e   : > { %233 = vst.msk [vmem:[#allocation2 + $0x4] sm:$0xf] %vm6373_vm4, %v4434_v27  ;;  %v4436_v31 = vcombine.low %v251_v30, %v251_v30  ;;  %v4437_v32 = vcombine.high %v251_v30, %v251_v30 }
  0x8f   : > { %235 = vst.msk [vmem:[#allocation2 + $0x4c] sm:$0x3] %vm6372_vm5, %v4435_v28  ;;  %v287_v33 = vpop.permute.xlu1 %286  ;;  %v264_v34 = vpop.permute.xlu0 %263 }
  0x90   : > { %259 = vst.msk [vmem:[#allocation2 + $0x8] sm:$0xf] %vm6373_vm4, %v4436_v31  ;;  %v268_v35 = vsel %vm6375_vm1, %v262_v25, %v264_v34  ;;  %v267_v36 = vsel %vm6376_vm0, %v262_v25, %v264_v34 }
  0x91   : > { %260 = vst.msk [vmem:[#allocation2 + $0x50] sm:$0x3] %vm6372_vm5, %v4437_v32  ;;  %v272_v37 = vrot.slane %v268_v35, 4 }
  0x93   : > { %v270_v38 = vpop.permute.xlu1 %269  ;;  %v289_v39 = vpop.permute.xlu0 %288 }
  0x94   : > { %v274_v40 = vsel %vm6374_vm2, %v267_v36, %v270_v38  ;;  %v293_v41 = vsel %vm6375_vm1, %v287_v33, %v289_v39  ;;  %v292_v46 = vsel %vm6376_vm0, %v287_v33, %v289_v39 }
  0x95   : > { %v276_v42 = vsel %vm222_vm3, %v274_v40, %v272_v37  ;;  %v297_v45 = vrot.slane %v293_v41, 4 }
  0x96   : > { %v4438_v43 = vcombine.low %v276_v42, %v276_v42  ;;  %v4439_v44 = vcombine.high %v276_v42, %v276_v42  ;;  %v4736_v51 = vld [vmem:[#allocation2 + $0x4] ss:$72 sps:$4 sm:$0x3f]  }
  0x97   : > { %v312_v47 = vpop.permute.xlu1 %311  ;;  %v295_v48 = vpop.permute.xlu0 %294  ;;  %v776_v55 = vsel %vm6371_vm6, %v4736_v51, 0 }
  0x98   : > { %v4734_v49 = vld [vmem:[#allocation2 + $0x8] ss:$72 sps:$4 sm:$0x3f]   ;;  %284 = vst.msk [vmem:[#allocation2 + $0xc] sm:$0xf] %vm6373_vm4, %v4438_v43  ;;  %v299_v50 = vsel %vm6374_vm2, %v292_v46, %v295_v48 }
  0x99   : > { %285 = vst.msk [vmem:[#allocation2 + $0x54] sm:$0x3] %vm6372_vm5, %v4439_v44  ;;  %v301_v52 = vsel %vm222_vm3, %v299_v50, %v297_v45  ;;  %4487 = vmatprep.subr.msk.bf16.mxu0 %vm6371_vm6, %v4734_v49 }
  0x9a   : > { %v4440_v53 = vcombine.low %v301_v52, %v301_v52  ;;  %v4441_v54 = vcombine.high %v301_v52, %v301_v52  ;;  %838 = vmatpush1.bf16.msra.mxu0 %v776_v55 }
  0x9b   : > { %v337_v56 = vpop.permute.xlu1 %336  ;;  %v314_v57 = vpop.permute.xlu0 %313 }
  0x9c   : > { %309 = vst.msk [vmem:[#allocation2 + $0x10] sm:$0xf] %vm6373_vm4, %v4440_v53  ;;  %v318_v59 = vsel %vm6375_vm1, %v312_v47, %v314_v57  ;;  %v317_v60 = vsel %vm6376_vm0, %v312_v47, %v314_v57 }
  0x9d   : > { %310 = vst.msk [vmem:[#allocation2 + $0x58] sm:$0x3] %vm6372_vm5, %v4441_v54  ;;  %4488 = vmatmul.mubr.msk.bf16.vlgmr.msra.gmra.mxu0 %vm6370_vm7, %v5030_v58  ;;  %v322_v61 = vrot.slane %v318_v59, 4 }
  0x9e   : > { %937 = vmatprep.mubr.bf16.mxu0 %v4879_v3 }
  0x9f   : > { %v320_v62 = vpop.permute.xlu1 %319  ;;  %v339_v63 = vpop.permute.xlu0 %338 }
  0xa0   : > { %v324_v0 = vsel %vm6374_vm2, %v317_v60, %v320_v62  ;;  %v343_v1 = vsel %vm6375_vm1, %v337_v56, %v339_v63  ;;  %v342_v8 = vsel %vm6376_vm0, %v337_v56, %v339_v63  ;;  %v4739_v13 = vld [vmem:[#allocation2 + $0xc] ss:$72 sps:$4 sm:$0x3f]  }
  0xa1   : > { %v326_v2 = vsel %vm222_vm3, %v324_v0, %v322_v61  ;;  %v347_v7 = vrot.slane %v343_v1, 4  ;;  %v782_v17 = vsel %vm6371_vm6, %v4739_v13, 0 }
  0xa2   : > { %v4442_v4 = vcombine.low %v326_v2, %v326_v2  ;;  %v4443_v5 = vcombine.high %v326_v2, %v326_v2 }
  0xa3   : > { %v362_v9 = vpop.permute.xlu1 %361  ;;  %v345_v10 = vpop.permute.xlu0 %344 }
  0xa4   : > { %v4737_v11 = vld [vmem:[#allocation2 + $0x10] ss:$72 sps:$4 sm:$0x3f]   ;;  %334 = vst.msk [vmem:[#allocation2 + $0x14] sm:$0xf] %vm6373_vm4, %v4442_v4  ;;  %v349_v12 = vsel %vm6374_vm2, %v342_v8, %v345_v10 }
  0xa5   : > { %335 = vst.msk [vmem:[#allocation2 + $0x5c] sm:$0x3] %vm6372_vm5, %v4443_v5  ;;  %v351_v14 = vsel %vm222_vm3, %v349_v12, %v347_v7  ;;  %4489 = vmatprep.subr.msk.bf16.mxu1 %vm6371_vm6, %v4737_v11 }
  0xa6   : > { %v4444_v15 = vcombine.low %v351_v14, %v351_v14  ;;  %v4445_v16 = vcombine.high %v351_v14, %v351_v14  ;;  %879 = vmatpush1.bf16.msra.mxu1 %v782_v17 }
  0xa7   : > { %v387_v18 = vpop.permute.xlu1 %386  ;;  %v364_v19 = vpop.permute.xlu0 %363 }
  0xa8   : > { %359 = vst.msk [vmem:[#allocation2 + $0x18] sm:$0xf] %vm6373_vm4, %v4444_v15  ;;  %v368_v20 = vsel %vm6375_vm1, %v362_v9, %v364_v19  ;;  %v367_v21 = vsel %vm6376_vm0, %v362_v9, %v364_v19 }
  0xa9   : > { %360 = vst.msk [vmem:[#allocation2 + $0x60] sm:$0x3] %vm6372_vm5, %v4445_v16  ;;  %4490 = vmatmul.mubr.msk.bf16.vlgmr.msra.gmra.mxu1 %vm6370_vm7, %v5030_v58  ;;  %v372_v22 = vrot.slane %v368_v20, 4 }
  0xaa   : > { %978 = vmatprep.mubr.bf16.mxu1 %v4879_v3 }
  0xab   : > { %v370_v23 = vpop.permute.xlu1 %369  ;;  %v389_v24 = vpop.permute.xlu0 %388 }
  0xac   : > { %v374_v25 = vsel %vm6374_vm2, %v367_v21, %v370_v23  ;;  %v393_v26 = vsel %vm6375_vm1, %v387_v18, %v389_v24  ;;  %v392_v31 = vsel %vm6376_vm0, %v387_v18, %v389_v24 }
  0xad   : > { %v376_v27 = vsel %vm222_vm3, %v374_v25, %v372_v22  ;;  %v397_v30 = vrot.slane %v393_v26, 4 }
  0xae   : > { %v4446_v28 = vcombine.low %v376_v27, %v376_v27  ;;  %v4447_v29 = vcombine.high %v376_v27, %v376_v27 }
  0xaf   : > { %v415_v32 = vpop.permute.xlu1 %414  ;;  %v395_v33 = vpop.permute.xlu0 %394  ;;  %v692_v34 = vld [vmem:[#allocation2 + $0x14] sm:$0xff] }
  0xb0   : > { %v700_v35 = vld [vmem:[#allocation2 + $0x5c] sm:$0x33]  ;;  %384 = vst.msk [vmem:[#allocation2 + $0x1c] sm:$0xf] %vm6373_vm4, %v4446_v28  ;;  %v399_v37 = vsel %vm6374_vm2, %v392_v31, %v395_v33 }
  0xb1   : > { %v4740_v36 = vld [vmem:[#allocation2 + $0x18] ss:$72 sps:$4 sm:$0x3f]   ;;  %385 = vst.msk [vmem:[#allocation2 + $0x64] sm:$0x3] %vm6372_vm5, %v4447_v29  ;;  %v4475_v38 = vcombine.low %v692_v34, %v700_v35  ;;  %v401_v39 = vsel %vm222_vm3, %v399_v37, %v397_v30 }
  0xb2   : > { %4491 = vmatprep.subr.msk.bf16.mxu0 %vm6371_vm6, %v4740_v36  ;;  %v4448_v40 = vcombine.low %v401_v39, %v401_v39  ;;  %v4449_v41 = vcombine.high %v401_v39, %v401_v39 }
  0xb3   : > { %v788_v42 = vsel %vm6371_vm6, %v4475_v38, 0  ;;  %v439_v43 = vpop.permute.xlu1 %438  ;;  %v417_v44 = vpop.permute.xlu0 %416 }
  0xb4   : > { %920 = vmatpush1.bf16.msra.mxu0 %v788_v42  ;;  %409 = vst.msk [vmem:[#allocation2 + $0x20] sm:$0xf] %vm6373_vm4, %v4448_v40  ;;  %v420_v45 = vsel %vm6376_vm0, %v415_v32, %v417_v44  ;;  %v421_v46 = vsel %vm6375_vm1, %v415_v32, %v417_v44 }
  0xb5   : > { %410 = vst.msk [vmem:[#allocation2 + $0x68] sm:$0x3] %vm6372_vm5, %v4449_v41  ;;  %v424_v47 = vrot.slane %v421_v46, 4  ;;  %v426_v48 = vsel %vm6374_vm2, %v420_v45, %v4966_v6 }
  0xb7   : > { %4492 = vmatmul.mubr.msk.bf16.vlgmr.msra.gmra.mxu0 %vm6370_vm7, %v5030_v58  ;;  %v428_v49 = vsel %vm222_vm3, %v426_v48, %v424_v47  ;;  %v447_v50 = vpop.permute.xlu1 %446  ;;  %v441_v51 = vpop.permute.xlu0 %440 }
  0xb8   : > { %1019 = vmatprep.mubr.bf16.mxu0 %v4879_v3  ;;  %v4450_v52 = vcombine.low %v428_v49, %v428_v49  ;;  %v4451_v53 = vcombine.high %v428_v49, %v428_v49  ;;  %v444_v54 = vsel %vm6376_vm0, %v439_v43, %v441_v51  ;;  %v445_v55 = vsel %vm6375_vm1, %v439_v43, %v441_v51  ;;  %v4744_v0 = vld [vmem:[#allocation2 + $0x1c] ss:$72 sps:$4 sm:$0x3f]  }
  0xb9   : > { %v449_v56 = vrot.slane %v445_v55, 4  ;;  %v451_v57 = vsel %vm6374_vm2, %v444_v54, %v447_v50  ;;  %v794_v1 = vsel %vm6371_vm6, %v4744_v0, 0 }
  0xba   : > { %436 = vst.msk [vmem:[#allocation2 + $0x24] sm:$0xf] %vm6373_vm4, %v4450_v52 }
  0xbb   : > { %437 = vst.msk [vmem:[#allocation2 + $0x6c] sm:$0x3] %vm6372_vm5, %v4451_v53  ;;  %v453_v6 = vsel %vm222_vm3, %v451_v57, %v449_v56  ;;  %v466_v59 = vpop.permute.xlu1 %465  ;;  %v464_v60 = vpop.permute.xlu0 %463 }
  0xbc   : > { %v4742_v61 = vld [vmem:[#allocation2 + $0x20] ss:$72 sps:$4 sm:$0x3f]   ;;  %v4452_v62 = vcombine.low %v453_v6, %v453_v6  ;;  %v4453_v63 = vcombine.high %v453_v6, %v453_v6  ;;  %v470_v5 = vsel %vm6375_vm1, %v464_v60, %v466_v59  ;;  %v469_v8 = vsel %vm6376_vm0, %v464_v60, %v466_v59 }
  0xbd   : > { %4493 = vmatprep.subr.msk.bf16.mxu1 %vm6371_vm6, %v4742_v61  ;;  %v474_v9 = vrot.slane %v470_v5, 4 }
  0xbe   : > { %461 = vst.msk [vmem:[#allocation2 + $0x28] sm:$0xf] %vm6373_vm4, %v4452_v62  ;;  %961 = vmatpush1.bf16.msra.mxu1 %v794_v1 }
  0xbf   : > { %462 = vst.msk [vmem:[#allocation2 + $0x70] sm:$0x3] %vm6372_vm5, %v4453_v63  ;;  %v491_v2 = vpop.permute.xlu1 %490  ;;  %v489_v4 = vpop.permute.xlu0 %488 }
  0xc0   : > { %v495_v7 = vsel %vm6375_vm1, %v489_v4, %v491_v2  ;;  %v494_v10 = vsel %vm6376_vm0, %v489_v4, %v491_v2 }
  0xc1   : > { %4494 = vmatmul.mubr.msk.bf16.vlgmr.msra.gmra.mxu1 %vm6370_vm7, %v5030_v58  ;;  %v499_v11 = vrot.slane %v495_v7, 4 }
  0xc2   : > { %1060 = vmatprep.mubr.bf16.mxu1 %v4879_v3  ;;  %v4747_v23 = vld [vmem:[#allocation2 + $0x24] ss:$72 sps:$4 sm:$0x3f]  }
  0xc3   : > { %v497_v12 = vpop.permute.xlu1 %496  ;;  %v472_v13 = vpop.permute.xlu0 %471  ;;  %v800_v26 = vsel %vm6371_vm6, %v4747_v23, 0 }
  0xc4   : > { %v501_v14 = vsel %vm6374_vm2, %v494_v10, %v497_v12  ;;  %v476_v15 = vsel %vm6374_vm2, %v469_v8, %v472_v13 }
  0xc5   : > { %v503_v16 = vsel %vm222_vm3, %v501_v14, %v499_v11  ;;  %v478_v17 = vsel %vm222_vm3, %v476_v15, %v474_v9 }
  0xc6   : > { %v4745_v18 = vld [vmem:[#allocation2 + $0x28] ss:$72 sps:$4 sm:$0x3f]   ;;  %v4456_v19 = vcombine.low %v503_v16, %v503_v16  ;;  %v4457_v20 = vcombine.high %v503_v16, %v503_v16  ;;  %v4454_v21 = vcombine.low %v478_v17, %v478_v17  ;;  %v4455_v22 = vcombine.high %v478_v17, %v478_v17 }
  0xc7   : > { %v516_v24 = vpop.permute.xlu1 %515  ;;  %v514_v25 = vpop.permute.xlu0 %513  ;;  %4495 = vmatprep.subr.msk.bf16.mxu0 %vm6371_vm6, %v4745_v18 }
  0xc8   : > { %511 = vst.msk [vmem:[#allocation2 + $0x30] sm:$0xf] %vm6373_vm4, %v4456_v19  ;;  %486 = vst.msk [vmem:[#allocation2 + $0x2c] sm:$0xf] %vm6373_vm4, %v4454_v21  ;;  %1002 = vmatpush1.bf16.msra.mxu0 %v800_v26  ;;  %v520_v27 = vsel %vm6375_vm1, %v514_v25, %v516_v24  ;;  %v519_v33 = vsel %vm6376_vm0, %v514_v25, %v516_v24  ;;  %v681_v21 = vld [vmem:[#allocation2 + $0x50] sm:$0x33] }
  0xc9   : > { %512 = vst.msk [vmem:[#allocation2 + $0x78] sm:$0x3] %vm6372_vm5, %v4457_v20  ;;  %487 = vst.msk [vmem:[#allocation2 + $0x74] sm:$0x3] %vm6372_vm5, %v4455_v22  ;;  %v524_v31 = vrot.slane %v520_v27, 4  ;;  %v5144_v20 = vld [vmem:[#allocation2 + $0x8] sm:$0xff] }
  0xcb   : > { %v541_v28 = vpop.permute.xlu1 %540  ;;  %v539_v29 = vpop.permute.xlu0 %538  ;;  %4496 = vmatmul.mubr.msk.bf16.vlgmr.msra.gmra.mxu0 %vm6370_vm7, %v5030_v58 }
  0xcc   : > { %v545_v30 = vsel %vm6375_vm1, %v539_v29, %v541_v28  ;;  %1101 = vmatprep.mubr.bf16.mxu0 %v4879_v3  ;;  %v544_v34 = vsel %vm6376_vm0, %v539_v29, %v541_v28 }
  0xcd   : > { %v549_v32 = vrot.slane %v545_v30, 4 }
  0xcf   : > { %v547_v35 = vpop.permute.xlu1 %546  ;;  %v522_v36 = vpop.permute.xlu0 %521 }
  0xd0   : > { %v4748_v37 = vld [vmem:[#allocation2 + $0x30] ss:$72 sps:$4 sm:$0x3f]   ;;  %v551_v38 = vsel %vm6374_vm2, %v544_v34, %v547_v35  ;;  %v526_v39 = vsel %vm6374_vm2, %v519_v33, %v522_v36  ;;  %v4750_v40 = vld [vmem:[#allocation2 + $0x2c] ss:$72 sps:$4 sm:$0x3f]  }
  0xd1   : > { %v553_v41 = vsel %vm222_vm3, %v551_v38, %v549_v32  ;;  %v528_v42 = vsel %vm222_vm3, %v526_v39, %v524_v31  ;;  %4497 = vmatprep.subr.msk.bf16.mxu1 %vm6371_vm6, %v4748_v37  ;;  %v806_v48 = vsel %vm6371_vm6, %v4750_v40, 0  ;;  %v4506_v31 = vcombine.high %v5144_v20, %v681_v21  ;;  %v5156_v34 = vld [vmem:[#allocation2 + $0x18] sm:$0xff]  ;;  %v683_v35 = vld [vmem:[#allocation2 + $0x60] sm:$0x33]  ;;  %v5165_v40 = vld [vmem:[#allocation2 + $0x10] sm:$0xff] }
  0xd2   : > { %v4460_v43 = vcombine.low %v553_v41, %v553_v41  ;;  %v4461_v44 = vcombine.high %v553_v41, %v553_v41  ;;  %v4458_v45 = vcombine.low %v528_v42, %v528_v42  ;;  %v4459_v46 = vcombine.high %v528_v42, %v528_v42  ;;  %1043 = vmatpush1.bf16.msra.mxu1 %v806_v48  ;;  %v682_v41 = vld [vmem:[#allocation2 + $0x58] sm:$0x33]  ;;  %v4760_v42 = vld [vmem:[#allocation2 + $0x4] ss:$72 sps:$4 sm:$0x3f]  }
  0xd3   : > { %v566_v47 = vpop.permute.xlu1 %565  ;;  %v564_v49 = vpop.permute.xlu0 %563  ;;  %v4505_v32 = vcombine.low %v5144_v20, %v681_v21  ;;  %v4510_v39 = vcombine.high %v5156_v34, %v683_v35  ;;  %v5177_v48 = vld [vmem:[#allocation2 + $0x20] sm:$0xff] }
  0xd4   : > { %561 = vst.msk [vmem:[#allocation2 + $0x38] sm:$0xf] %vm6373_vm4, %v4460_v43  ;;  %536 = vst.msk [vmem:[#allocation2 + $0x34] sm:$0xf] %vm6373_vm4, %v4458_v45  ;;  %v570_v50 = vsel %vm6375_vm1, %v564_v49, %v566_v47  ;;  %v569_v56 = vsel %vm6376_vm0, %v564_v49, %v566_v47  ;;  %v671_v45 = vld [vmem:[%s6365_s1] sm:$0x3]  ;;  %v4507_v47 = vcombine.low %v5165_v40, %v682_v41 }
  0xd5   : > { %562 = vst.msk [vmem:[#allocation2 + $0x80] sm:$0x3] %vm6372_vm5, %v4461_v44  ;;  %537 = vst.msk [vmem:[#allocation2 + $0x7c] sm:$0x3] %vm6372_vm5, %v4459_v46  ;;  %4498 = vmatmul.mubr.msk.bf16.vlgmr.msra.gmra.mxu1 %vm6370_vm7, %v5030_v58  ;;  %v574_v54 = vrot.slane %v570_v50, 4  ;;  %v1225_v38 = vsel %vm6371_vm6, %v4505_v32, 0  ;;  %v4509_v46 = vcombine.low %v5156_v34, %v683_v35 }
  0xd6   : > { %1142 = vmatprep.mubr.bf16.mxu1 %v4879_v3  ;;  %v5179_v49 = vld [vmem:[#allocation2 + $0x28] sm:$0xff]  ;;  %v685_v50 = vld [vmem:[#allocation2 + $0x70] sm:$0x33] }
  0xd7   : > { %v591_v51 = vpop.permute.xlu1 %590  ;;  %v589_v52 = vpop.permute.xlu0 %588 }
  0xd8   : > { %v595_v53 = vsel %vm6375_vm1, %v589_v52, %v591_v51  ;;  %v594_v57 = vsel %vm6376_vm0, %v589_v52, %v591_v51  ;;  %v684_v51 = vld [vmem:[#allocation2 + $0x68] sm:$0x33]  ;;  %v1237_v52 = vsel %vm6371_vm6, %v4509_v46, 0 }
  0xd9   : > { %v599_v55 = vrot.slane %v595_v53, 4  ;;  %v1231_v53 = vsel %vm6371_vm6, %v4507_v47, 0 }
  0xdb   : > { %v597_v6 = vpop.permute.xlu1 %596  ;;  %v572_v59 = vpop.permute.xlu0 %571 }
  0xdc   : > { %v4751_v60 = vld [vmem:[#allocation2 + $0x38] ss:$72 sps:$4 sm:$0x3f]   ;;  %v601_v61 = vsel %vm6374_vm2, %v594_v57, %v597_v6  ;;  %v576_v62 = vsel %vm6374_vm2, %v569_v56, %v572_v59  ;;  %v4753_v63 = vld [vmem:[#allocation2 + $0x34] ss:$72 sps:$4 sm:$0x3f]   ;;  %v4511_v56 = vcombine.low %v5177_v48, %v684_v51  ;;  %v4513_v57 = vcombine.low %v5179_v49, %v685_v50 }
  0xdd   : > { %v603_v0 = vsel %vm222_vm3, %v601_v61, %v599_v55  ;;  %v578_v1 = vsel %vm222_vm3, %v576_v62, %v574_v54  ;;  %4499 = vmatprep.subr.msk.bf16.mxu0 %vm6371_vm6, %v4751_v60  ;;  %v812_v10 = vsel %vm6371_vm6, %v4753_v63, 0  ;;  %v4514_v54 = vcombine.high %v5179_v49, %v685_v50  ;;  %v5194_v6 = vld [vmem:[#allocation2 + $0x30] sm:$0xff]  ;;  %v686_v59 = vld [vmem:[#allocation2 + $0x78] sm:$0x33] }
  0xde   : > { %v4464_v2 = vcombine.low %v603_v0, %v603_v0  ;;  %v4465_v4 = vcombine.high %v603_v0, %v603_v0  ;;  %v4462_v5 = vcombine.low %v578_v1, %v578_v1  ;;  %v4463_v7 = vcombine.high %v578_v1, %v578_v1  ;;  %1084 = vmatpush1.bf16.msra.mxu0 %v812_v10 }
  0xdf   : > { %v619_v8 = vpop.permute.xlu1 %618  ;;  %v617_v9 = vpop.permute.xlu0 %616  ;;  %4519 = vmatprep.subr.msk.bf16.mxu0 %vm6371_vm6, %v4760_v42  ;;  %v4512_v55 = vcombine.high %v5177_v48, %v684_v51  ;;  %v1243_v62 = vsel %vm6371_vm6, %v4511_v56, 0  ;;  %v1249_v63 = vsel %vm6371_vm6, %v4513_v57, 0  ;;  %v4516_v0 = vcombine.high %v5194_v6, %v686_v59 }
  0xe0   : > { %611 = vst.msk [vmem:[#allocation2 + $0x40] sm:$0xf] %vm6373_vm4, %v4464_v2  ;;  %586 = vst.msk [vmem:[#allocation2 + $0x3c] sm:$0xf] %vm6373_vm4, %v4462_v5  ;;  %v623_v11 = vsel %vm6375_vm1, %v617_v9, %v619_v8  ;;  %v622_v12 = vsel %vm6376_vm0, %v617_v9, %v619_v8  ;;  %v4515_v2 = vcombine.low %v5194_v6, %v686_v59  ;;  %v1604_v5 = vld [vmem:[#allocation2 + $0x50] sm:$0x33] }
  0xe1   : > { %612 = vst.msk [vmem:[#allocation2 + $0x88] sm:$0x3] %vm6372_vm5, %v4465_v4  ;;  %587 = vst.msk [vmem:[#allocation2 + $0x84] sm:$0x3] %vm6372_vm5, %v4463_v7  ;;  %v628_v13 = vrot.slane %v623_v11, 4  ;;  %4500 = vmatmul.mubr.msk.bf16.vlgmr.msra.gmra.mxu0 %vm6370_vm7, %v5030_v58  ;;  %v4537_v10 = vcombine.high %v5144_v20, %v1604_v5 }
  0xe2   : > { %1298 = vmatprep.mubr.bf16.mxu0 %v4879_v3  ;;  %v1605_v7 = vld [vmem:[#allocation2 + $0x58] sm:$0x33]  ;;  %v1255_v8 = vsel %vm6371_vm6, %v4515_v2, 0 }
  0xe3   : > { %v626_v14 = vpop.permute.xlu0 %625  ;;  %v646_v15 = vpop.permute.xlu1 %645  ;;  %v4539_v11 = vcombine.high %v5165_v40, %v1605_v7 }
  0xe4   : > { %v630_v16 = vsel %vm6374_vm2, %v622_v12, %v626_v14  ;;  %v4536_v12 = vcombine.low %v5144_v20, %v1604_v5  ;;  %v1606_v14 = vld [vmem:[#allocation2 + $0x60] sm:$0x33] }
  0xe5   : > { %v632_v17 = vsel %vm222_vm3, %v630_v16, %v628_v13  ;;  %v4538_v13 = vcombine.low %v5165_v40, %v1605_v7  ;;  %v4540_v20 = vcombine.low %v5156_v34, %v1606_v14 }
  0xe6   : > { %v4466_v18 = vcombine.low %v632_v17, %v632_v17  ;;  %v4467_v19 = vcombine.high %v632_v17, %v632_v17  ;;  %v1680_v16 = vsel %vm6371_vm6, %v4536_v12, 0 }
  0xe7   : > { %v648_v22 = vpop.permute.xlu0 %647  ;;  %v655_v23 = vpop.permute.xlu1 %654  ;;  %v5196_v60 = vld [vmem:[#allocation2 + $0x38] sm:$0xff]  ;;  %v1686_v17 = vsel %vm6371_vm6, %v4538_v13, 0 }
  0xe8   : > { %v4754_v24 = vld [vmem:[#allocation2 + $0x40] ss:$72 sps:$4 sm:$0x3f]   ;;  %640 = vst.msk [vmem:[#allocation2] sm:$0xf] %vm6373_vm4, %v4466_v18  ;;  %v651_v25 = vsel %vm6376_vm0, %v646_v15, %v648_v22  ;;  %v652_v26 = vsel %vm6375_vm1, %v646_v15, %v648_v22  ;;  %v4541_v18 = vcombine.high %v5156_v34, %v1606_v14 }
  0xe9   : > { %641 = vst.msk [vmem:[#allocation2 + $0x48] sm:$0x3] %vm6372_vm5, %v4467_v19  ;;  %v4756_v27 = vld [vmem:[#allocation2 + $0x3c] ss:$72 sps:$4 sm:$0x3f]   ;;  %v657_v28 = vrot.slane %v652_v26, 4  ;;  %v659_v29 = vsel %vm6374_vm2, %v651_v25, %v655_v23  ;;  %4501 = vmatprep.subr.msk.bf16.mxu1 %vm6371_vm6, %v4754_v24 }
  0xea   : > { %v818_v30 = vsel %vm6371_vm6, %v4756_v27, 0  ;;  %v687_v61 = vld [vmem:[#allocation2 + $0x80] sm:$0x33]  ;;  %v1607_v15 = vld [vmem:[#allocation2 + $0x68] sm:$0x33]  ;;  %v1692_v25 = vsel %vm6371_vm6, %v4540_v20, 0 }
  0xeb   : > { %v661_v33 = vsel %vm222_vm3, %v659_v29, %v657_v28  ;;  %1125 = vmatpush1.bf16.msra.mxu1 %v818_v30  ;;  %v4518_v1 = vcombine.high %v5196_v60, %v687_v61  ;;  %v4517_v4 = vcombine.low %v5196_v60, %v687_v61  ;;  %v4543_v19 = vcombine.high %v5177_v48, %v1607_v15  ;;  %v4535_v22 = vld [vmem:[%s6365_s1 + $0x4] sm:$0x3]  ;;  %v1608_v23 = vld [vmem:[#allocation2 + $0x70] sm:$0x33]  ;;  %v1609_v24 = vld [vmem:[#allocation2 + $0x78] sm:$0x33] }
  0xec   : > { %v4468_v36 = vcombine.low %v661_v33, %v661_v33  ;;  %v4469_v37 = vcombine.high %v661_v33, %v661_v33  ;;  %4521 = vmatprep.subr.msk.bf16.mxu1 %vm6371_vm6, %v4506_v31  ;;  %v4542_v21 = vcombine.low %v5177_v48, %v1607_v15  ;;  %v4545_v27 = vcombine.high %v5179_v49, %v1608_v23  ;;  %v1610_v31 = vld [vmem:[#allocation2 + $0x80] sm:$0x33] }
  0xed   : > { %v1261_v9 = vsel %vm6371_vm6, %v4517_v4, 0  ;;  %v4547_v28 = vcombine.high %v5194_v6, %v1609_v24  ;;  %v4544_v29 = vcombine.low %v5179_v49, %v1608_v23  ;;  %v4546_v30 = vcombine.low %v5194_v6, %v1609_v24 }
  0xee   : > { %669 = vst.msk [vmem:[#allocation2 + $0x44] sm:$0xf] %vm6373_vm4, %v4468_v36  ;;  %4502 = vmatmul.mubr.msk.bf16.vlgmr.msra.gmra.mxu1 %vm6370_vm7, %v5030_v58  ;;  %v4508_v58 = vcombine.high %v5165_v40, %v682_v41  ;;  %v1698_v26 = vsel %vm6371_vm6, %v4542_v21, 0  ;;  %v4549_v34 = vcombine.high %v5196_v60, %v1610_v31  ;;  %v4548_v36 = vcombine.low %v5196_v60, %v1610_v31 }
  0xef   : > { %670 = vst.msk [vmem:[#allocation2 + $0x8c] sm:$0x3] %vm6372_vm5, %v4469_v37  ;;  %1322 = vmatpush1.bf16.msra.mxu1 %v1225_v38  ;;  %1339 = vmatprep.mubr.bf16.mxu1 %v4879_v3  ;;  %v1704_v32 = vsel %vm6371_vm6, %v4544_v29, 0  ;;  %v1710_v33 = vsel %vm6371_vm6, %v4546_v30, 0  ;;  %v199_v30 = vld [vmem:[%s6367_s3] sm:$0xff] }
  0xf0   : > { %4525 = vmatprep.subr.msk.bf16.mxu1 %vm6371_vm6, %v4510_v39  ;;  %v4762_v43 = vld [vmem:[#allocation2] ss:$72 sps:$4 sm:$0x3f]   ;;  %v1716_v38 = vsel %vm6371_vm6, %v4548_v36, 0  ;;  %vm201_vm8 = vcmp.ne.f32.partialorder %v199_v30, 0.0 }
  0xf1   : > { %v1219_v44 = vsel %vm6371_vm6, %v4762_v43, 0  ;;  %v4790_v37 = vld [vmem:[#allocation2 + $0x40] ss:$72 sps:$4 sm:$0x3f]  }
  0xf2   : > { %1281 = vmatpush1.bf16.msra.mxu0 %v1219_v44  ;;  %v1722_v39 = vsel %vm6371_vm6, %v4790_v37, 0 }
  0xf3   : > { %4523 = vmatprep.subr.msk.bf16.mxu0 %vm6371_vm6, %v4508_v58 }
  0xf5   : > { %4520 = vmatmul.mubr.msk.bf16.vlgmr.msra.gmra.mxu0 %vm6370_vm7, %v671_v45 }
  0xf6   : > { %4522 = vmatmul.mubr.msk.bf16.vlgmr.msra.gmra.mxu1 %vm6370_vm7, %v671_v45  ;;  %1363 = vmatpush1.bf16.msra.mxu0 %v1231_v53  ;;  %v4787_v35 = vld [vmem:[#allocation2 + $0x44] ss:$72 sps:$4 sm:$0x3f]  }
  0xf7   : > { %1404 = vmatpush1.bf16.msra.mxu1 %v1237_v52  ;;  %4527 = vmatprep.subr.msk.bf16.mxu0 %vm6371_vm6, %v4512_v55 }
  0xf8   : > { %4529 = vmatprep.subr.msk.bf16.mxu1 %vm6371_vm6, %v4514_v54  ;;  %1380 = vmatprep.mubr.bf16.mxu0 %v4879_v3 }
  0xf9   : > { %1421 = vmatprep.mubr.bf16.mxu1 %v4879_v3 }
  0xfd   : > { %4524 = vmatmul.mubr.msk.bf16.vlgmr.msra.gmra.mxu0 %vm6370_vm7, %v671_v45 }
  0xfe   : > { %4526 = vmatmul.mubr.msk.bf16.vlgmr.msra.gmra.mxu1 %vm6370_vm7, %v671_v45  ;;  %1445 = vmatpush1.bf16.msra.mxu0 %v1243_v62 }
  0xff   : > { %1486 = vmatpush1.bf16.msra.mxu1 %v1249_v63  ;;  %4531 = vmatprep.subr.msk.bf16.mxu0 %vm6371_vm6, %v4516_v0 }
 0x100   : > { %4533 = vmatprep.subr.msk.bf16.mxu1 %vm6371_vm6, %v4518_v1  ;;  %1462 = vmatprep.mubr.bf16.mxu0 %v4879_v3 }
 0x101   : > { %1503 = vmatprep.mubr.bf16.mxu1 %v4879_v3 }
 0x105   : > { %4528 = vmatmul.mubr.msk.bf16.vlgmr.msra.gmra.mxu0 %vm6370_vm7, %v671_v45 }
 0x106   : > { %4530 = vmatmul.mubr.msk.bf16.vlgmr.msra.gmra.mxu1 %vm6370_vm7, %v671_v45  ;;  %1527 = vmatpush1.bf16.msra.mxu0 %v1255_v8 }
 0x107   : > { %1568 = vmatpush1.bf16.msra.mxu1 %v1261_v9  ;;  %4552 = vmatprep.subr.msk.bf16.mxu0 %vm6371_vm6, %v4537_v10 }
 0x108   : > { %4554 = vmatprep.subr.msk.bf16.mxu1 %vm6371_vm6, %v4539_v11  ;;  %1544 = vmatprep.mubr.bf16.mxu0 %v4879_v3 }
 0x109   : > { %1585 = vmatprep.mubr.bf16.mxu1 %v4879_v3 }
 0x10d   : > { %4532 = vmatmul.mubr.msk.bf16.vlgmr.msra.gmra.mxu0 %vm6370_vm7, %v671_v45 }
 0x10e   : > { %4534 = vmatmul.mubr.msk.bf16.vlgmr.msra.gmra.mxu1 %vm6370_vm7, %v671_v45  ;;  %1742 = vmatpush1.bf16.msra.mxu0 %v1680_v16 }
 0x10f   : > { %1783 = vmatpush1.bf16.msra.mxu1 %v1686_v17  ;;  %4556 = vmatprep.subr.msk.bf16.mxu0 %vm6371_vm6, %v4541_v18 }
 0x110   : > { %4558 = vmatprep.subr.msk.bf16.mxu1 %vm6371_vm6, %v4543_v19  ;;  %1759 = vmatprep.mubr.bf16.mxu0 %v4879_v3 }
 0x111   : > { %1800 = vmatprep.mubr.bf16.mxu1 %v4879_v3 }
 0x115   : > { %4553 = vmatmul.mubr.msk.bf16.vlgmr.msra.gmra.mxu0 %vm6370_vm7, %v4535_v22 }
 0x116   : > { %4555 = vmatmul.mubr.msk.bf16.vlgmr.msra.gmra.mxu1 %vm6370_vm7, %v4535_v22  ;;  %1824 = vmatpush1.bf16.msra.mxu0 %v1692_v25 }
 0x117   : > { %1865 = vmatpush1.bf16.msra.mxu1 %v1698_v26  ;;  %4560 = vmatprep.subr.msk.bf16.mxu0 %vm6371_vm6, %v4545_v27  ;;  %v2073_v27 = vlaneseq }
 0x118   : > { %4562 = vmatprep.subr.msk.bf16.mxu1 %vm6371_vm6, %v4547_v28  ;;  %1841 = vmatprep.mubr.bf16.mxu0 %v4879_v3 }
 0x119   : > { %1882 = vmatprep.mubr.bf16.mxu1 %v4879_v3 }
 0x11d   : > { %4557 = vmatmul.mubr.msk.bf16.vlgmr.msra.gmra.mxu0 %vm6370_vm7, %v4535_v22 }
 0x11e   : > { %4559 = vmatmul.mubr.msk.bf16.vlgmr.msra.gmra.mxu1 %vm6370_vm7, %v4535_v22  ;;  %1906 = vmatpush1.bf16.msra.mxu0 %v1704_v32 }
 0x11f   : > { %1947 = vmatpush1.bf16.msra.mxu1 %v1710_v33  ;;  %4564 = vmatprep.subr.msk.bf16.mxu0 %vm6371_vm6, %v4549_v34  ;;  %v5320_v33 = vshrl.u32 %v2073_v27, 7 }
 0x120   : > { %4566 = vmatprep.subr.msk.bf16.mxu1 %vm6371_vm6, %v4787_v35  ;;  %1923 = vmatprep.mubr.bf16.mxu0 %v4879_v3 }
 0x121   : > { %1964 = vmatprep.mubr.bf16.mxu1 %v4879_v3  ;;  %v2103_v30 = vsub.s32 7, %v5320_v33 }
 0x125   : > { %4561 = vmatmul.mubr.msk.bf16.vlgmr.msra.gmra.mxu0 %vm6370_vm7, %v4535_v22 }
 0x126   : > { %4563 = vmatmul.mubr.msk.bf16.vlgmr.msra.gmra.mxu1 %vm6370_vm7, %v4535_v22  ;;  %1988 = vmatpush1.bf16.msra.mxu0 %v1716_v38  ;;  %v2075_v38 = vsub.s32 0, %v5320_v33 }
 0x127   : > { %2029 = vmatpush1.bf16.msra.mxu1 %v1722_v39  ;;  %2005 = vmatprep.mubr.bf16.mxu0 %v4879_v3  ;;  %v2071_v39 = vsel %vm201_vm8, 1, %v4879_v3 }
 0x128   : > { %2046 = vmatprep.mubr.bf16.mxu1 %v4879_v3 }
 0x12d   : > { %4565 = vmatmul.mubr.msk.bf16.vlgmr.msra.gmra.mxu0 %vm6370_vm7, %v4535_v22 }
 0x12e   : > { %4567 = vmatmul.mubr.msk.bf16.vlgmr.msra.gmra.mxu1 %vm6370_vm7, %v4535_v22  ;;  %2921 = vmatprep.mubr.bf16.mxu0 %v4879_v3 }
 0x12f   : > { %2962 = vmatprep.mubr.bf16.mxu1 %v4879_v3 }
 0x15d   : > { %v5269_v40 = vpop.f32.mrf.mxu0 }
 0x15f   : > { %v5271_v41 = vpop.f32.mrf.mxu0 }
 0x161   : > { %v861_v42 = vpop.f32.mrf.mxu0 }
 0x163   : > { %v862_v43 = vpop.f32.mrf.mxu0 }
 0x169   : > { %v5273_v44 = vpop.f32.mrf.mxu1 }
 0x16b   : > { %v5275_v58 = vpop.f32.mrf.mxu1 }
 0x16d   : > { %v902_v45 = vpop.f32.mrf.mxu1 }
 0x16e   : > { %v2083_v45 = vsub.s32 2, %v5320_v33 }
 0x16f   : > { %v903_v46 = vpop.f32.mrf.mxu1 }
 0x170   : > { %v2079_v46 = vsub.s32 1, %v5320_v33 }
 0x177   : > { %v5277_v47 = vpop.f32.mrf.mxu0 }
 0x179   : > { %v5279_v48 = vpop.f32.mrf.mxu0 }
 0x17b   : > { %v943_v49 = vpop.f32.mrf.mxu0 }
 0x17d   : > { %v944_v50 = vpop.f32.mrf.mxu0 }
 0x181   : > { %v5281_v51 = vpop.f32.mrf.mxu1 }
 0x183   : > { %v5283_v52 = vpop.f32.mrf.mxu1 }
 0x185   : > { %v984_v53 = vpop.f32.mrf.mxu1 }
 0x186   : > { %v5336_v53 = vrot.slane %v2071_v39, %v2075_v38 }
 0x187   : > { %v985_v54 = vpop.f32.mrf.mxu1 }
 0x188   : > { %v2087_v54 = vsub.s32 3, %v5320_v33  ;;  %vm2137_vm9 = vcmp.eq.s32.totalorder %v5336_v53, 1 }
 0x18b   : > { %v5285_v55 = vpop.f32.mrf.mxu0 }
 0x18d   : > { %v5287_v56 = vpop.f32.mrf.mxu0 }
 0x18f   : > { %v1025_v57 = vpop.f32.mrf.mxu0 }
 0x191   : > { %v1026_v6 = vpop.f32.mrf.mxu0 }
 0x195   : > { %v5289_v59 = vpop.f32.mrf.mxu1 }
 0x197   : > { %v5291_v60 = vpop.f32.mrf.mxu1 }
 0x199   : > { %v1066_v61 = vpop.f32.mrf.mxu1 }
 0x19a   : > { %v5341_v61 = vrot.slane %v2071_v39, %v2083_v45 }
 0x19b   : > { %v1067_v62 = vpop.f32.mrf.mxu1 }
 0x19c   : > { %v5345_v62 = vrot.slane %v2071_v39, %v2079_v46  ;;  %vm2139_vm10 = vcmp.eq.s32.totalorder %v5341_v61, 1 }
 0x19e   : > { %vm2138_vm11 = vcmp.eq.s32.totalorder %v5345_v62, 1 }
 0x1a1   : > { %v5293_v63 = vpop.f32.mrf.mxu0 }
 0x1a3   : > { %v5295_v0 = vpop.f32.mrf.mxu0 }
 0x1a5   : > { %v1107_v1 = vpop.f32.mrf.mxu0 }
 0x1a7   : > { %v1108_v2 = vpop.f32.mrf.mxu0 }
 0x1ae   : > { %v5297_v4 = vpop.f32.mrf.mxu1 }
 0x1b0   : > { %v5299_v5 = vpop.f32.mrf.mxu1 }
 0x1b2   : > { %v1148_v7 = vpop.f32.mrf.mxu1 }
 0x1b4   : > { %v1149_v8 = vpop.f32.mrf.mxu1 }
 0x1b5   : > { %v1300_v9 = vpop.f32.mrf.mxu0 }
 0x1b6   : > { %v1341_v10 = vpop.f32.mrf.mxu1  ;;  %v1301_v1 = vadd.f32 %v1300_v9, %v5269_v40  ;;  %v2099_v9 = vsub.s32 6, %v5320_v33 }
 0x1b7   : > { %v1302_v11 = vpop.f32.mrf.mxu0  ;;  %v1342_v2 = vadd.f32 %v1341_v10, %v5273_v44  ;;  %v2095_v10 = vsub.s32 5, %v5320_v33 }
 0x1b8   : > { %v1343_v12 = vpop.f32.mrf.mxu1 }
 0x1b9   : > { %v1304_v13 = vpop.f32.mrf.mxu0 }
 0x1ba   : > { %v1345_v14 = vpop.f32.mrf.mxu1  ;;  %v5352_v13 = vrot.slane %v2071_v39, %v2087_v54 }
 0x1bb   : > { %v1305_v15 = vpop.f32.mrf.mxu0  ;;  %v2091_v14 = vsub.s32 4, %v5320_v33 }
 0x1bc   : > { %v1346_v16 = vpop.f32.mrf.mxu1  ;;  %v1303_v15 = vadd.f32 %v1302_v11, %v5271_v41  ;;  %v200_v41 = vld [vmem:[%s6367_s3 + $0x8] sm:$0xff]  ;;  %vm2140_vm12 = vcmp.eq.s32.totalorder %v5352_v13, 1 }
 0x1bd   : > { %v5301_v17 = vpop.f32.mrf.mxu0  ;;  %v1344_v16 = vadd.f32 %v1343_v12, %v5275_v58  ;;  %v5378_v27 = vrot.slane %v2071_v39, %v2091_v14  ;;  %vm202_vm13 = vcmp.ne.f32.partialorder %v200_v41, 0.0 }
 0x1be   : > { %v5303_v18 = vpop.f32.mrf.mxu1 }
 0x1bf   : > { %v5305_v19 = vpop.f32.mrf.mxu0  ;;  %vm2141_vm14 = vcmp.eq.s32.totalorder %v5378_v27, 1 }
 0x1c0   : > { %v5307_v20 = vpop.f32.mrf.mxu1 }
 0x1c1   : > { %v1386_v21 = vpop.f32.mrf.mxu0 }
 0x1c2   : > { %v1427_v22 = vpop.f32.mrf.mxu1 }
 0x1c3   : > { %v1387_v23 = vpop.f32.mrf.mxu0 }
 0x1c4   : > { %v1428_v24 = vpop.f32.mrf.mxu1 }
 0x1c5   : > { %v5309_v25 = vpop.f32.mrf.mxu0 }
 0x1c6   : > { %v5311_v26 = vpop.f32.mrf.mxu1 }
 0x1c7   : > { %v5313_v28 = vpop.f32.mrf.mxu0 }
 0x1c8   : > { %v5315_v29 = vpop.f32.mrf.mxu1 }
 0x1c9   : > { %v1468_v31 = vpop.f32.mrf.mxu0 }
 0x1ca   : > { %v1509_v32 = vpop.f32.mrf.mxu1 }
 0x1cb   : > { %v1469_v34 = vpop.f32.mrf.mxu0 }
 0x1cc   : > { %v1510_v35 = vpop.f32.mrf.mxu1 }
 0x1cd   : > { %v5322_v36 = vpop.f32.mrf.mxu0 }
 0x1ce   : > { %v5324_v37 = vpop.f32.mrf.mxu1 }
 0x1cf   : > { %v5328_v42 = vpop.f32.mrf.mxu0 }
 0x1d0   : > { %v5330_v43 = vpop.f32.mrf.mxu1 }
 0x1d1   : > { %v1550_v49 = vpop.f32.mrf.mxu0 }
 0x1d2   : > { %v1591_v50 = vpop.f32.mrf.mxu1 }
 0x1d3   : > { %v1551_v57 = vpop.f32.mrf.mxu0 }
 0x1d4   : > { %v1592_v6 = vpop.f32.mrf.mxu1  ;;  %v5391_v57 = vrot.slane %v2071_v39, %v2099_v9 }
 0x1d5   : > { %v1761_v7 = vpop.f32.mrf.mxu0  ;;  %v5395_v6 = vrot.slane %v2071_v39, %v2095_v10 }
 0x1d6   : > { %v1802_v8 = vpop.f32.mrf.mxu1  ;;  %v5357_v21 = vadd.f32 %v1761_v7, %v1301_v1  ;;  %v1383_v1 = vadd.f32 %v5301_v17, %v5277_v47  ;;  %v5412_v47 = vsel %vm202_vm13, 1, %v4879_v3  ;;  %vm6386_vm15 = vcmp.eq.s32.totalorder %v5391_v57, 1 }
 0x1d7   : > { %v5359_v22 = vadd.f32 %v1802_v8, %v1342_v2  ;;  %v1763_v40 = vpop.f32.mrf.mxu0  ;;  %v1424_v2 = vadd.f32 %v5303_v18, %v5281_v51  ;;  %v1385_v51 = vadd.f32 %v5305_v19, %v5279_v48  ;;  %vm2142_vm8 = vcmp.eq.s32.totalorder %v5395_v6, 1 }
 0x1d8   : > { %v1804_v44 = vpop.f32.mrf.mxu1  ;;  %v2153_v58 = vsel %vm2137_vm9, %v5357_v21, 0.0  ;;  %v5371_v11 = vadd.f32 %v1763_v40, %v1303_v15 }
 0x1d9   : > { %v5373_v12 = vadd.f32 %v1804_v44, %v1344_v16  ;;  %v1765_v23 = vpop.f32.mrf.mxu0  ;;  %v2155_v31 = vsel %vm2139_vm10, %v5359_v22, 0.0  ;;  %v2169_v34 = vsel %vm222_vm3, %v2153_v58, 0.0  ;;  %v5408_v44 = vrot.slane %v2071_v39, %v2103_v30 }
 0x1da   : > { %v1806_v24 = vpop.f32.mrf.mxu1  ;;  %v2154_v32 = vsel %vm2138_vm11, %v5371_v11, 0.0  ;;  %v2172_v15 = vsel %vm222_vm3, %v2155_v31, 0.0  ;;  %v1426_v23 = vadd.f32 %v5307_v20, %v5283_v52 }
 0x1db   : > { %v2170_v35 = vsel %vm222_vm3, %v2154_v32, 0.0  ;;  %v1766_v49 = vpop.f32.mrf.mxu0  ;;  %v2156_v8 = vsel %vm2140_vm12, %v5373_v12, 0.0  ;;  %vm6384_vm13 = vcmp.eq.s32.totalorder %v5408_v44, 1 }
 0x1dc   : > { %v1807_v50 = vpop.f32.mrf.mxu1  ;;  %v2171_v7 = vadd.f32 %v2170_v35, %v2169_v34  ;;  %v2174_v24 = vsel %vm222_vm3, %v2156_v8, 0.0  ;;  %v5437_v35 = vrot.slane %v5412_v47, %v2075_v38  ;;  %v5454_v38 = vrot.slane %v5412_v47, %v2079_v46 }
 0x1dd   : > { %v1843_v16 = vpop.f32.mrf.mxu0  ;;  %v5468_v46 = vrot.slane %v5412_v47, %v2087_v54 }
 0x1de   : > { %v1884_v40 = vpop.f32.mrf.mxu1  ;;  %v2173_v17 = vadd.f32 %v2172_v15, %v2171_v7  ;;  %v5416_v18 = vadd.f32 %v1843_v16, %v1383_v1  ;;  %v5449_v15 = vrot.slane %v5412_v47, %v2083_v45  ;;  %v1465_v16 = vadd.f32 %v5309_v25, %v5285_v55 }
 0x1df   : > { %v5418_v58 = vadd.f32 %v1884_v40, %v1424_v2  ;;  %v1845_v39 = vpop.f32.mrf.mxu0  ;;  %v1506_v40 = vadd.f32 %v5311_v26, %v5289_v59  ;;  %vm6385_vm7 = vcmp.eq.s32.totalorder %v5437_v35, 1  ;;  %v1467_v55 = vadd.f32 %v5313_v28, %v5287_v56 }
 0x1e0   : > { %v1886_v41 = vpop.f32.mrf.mxu1  ;;  %v2175_v31 = vadd.f32 %v2174_v24, %v2173_v17  ;;  %v2157_v48 = vsel %vm2141_vm14, %v5416_v18, 0.0  ;;  %v5428_v19 = vadd.f32 %v1845_v39, %v1385_v51  ;;  %v1508_v39 = vadd.f32 %v5315_v29, %v5291_v60 }
 0x1e1   : > { %v2176_v32 = vsel %vm222_vm3, %v2157_v48, 0.0  ;;  %v5431_v34 = vadd.f32 %v1886_v41, %v1426_v23  ;;  %v1847_v52 = vpop.f32.mrf.mxu0  ;;  %v2159_v50 = vsel %vm6386_vm15, %v5418_v58, 0.0  ;;  %vm6383_vm6 = vcmp.eq.s32.totalorder %v5449_v15, 1 }
 0x1e2   : > { %v1888_v20 = vpop.f32.mrf.mxu1  ;;  %v2177_v49 = vadd.f32 %v2176_v32, %v2175_v31  ;;  %v2158_v1 = vsel %vm2142_vm8, %v5428_v19, 0.0  ;;  %v2180_v23 = vsel %vm222_vm3, %v2159_v50, 0.0  ;;  %vm6378_vm5 = vcmp.eq.s32.totalorder %v5454_v38, 1 }
 0x1e3   : > { %v2178_v2 = vsel %vm222_vm3, %v2158_v1, 0.0  ;;  %v1848_v7 = vpop.f32.mrf.mxu0  ;;  %v2160_v17 = vsel %vm6384_vm13, %v5431_v34, 0.0  ;;  %vm6377_vm4 = vcmp.eq.s32.totalorder %v5468_v46, 1  ;;  %v5493_v20 = vrot.slane %v5412_v47, %v2091_v14 }
 0x1e4   : > { %v1889_v8 = vpop.f32.mrf.mxu1  ;;  %v2179_v51 = vadd.f32 %v2178_v2, %v2177_v49  ;;  %v2182_v41 = vsel %vm222_vm3, %v2160_v17, 0.0  ;;  %v5510_v14 = vrot.slane %v5412_v47, %v2095_v10  ;;  %v5524_v10 = vrot.slane %v5412_v47, %v2103_v30 }
 0x1e5   : > { %v1925_v45 = vpop.f32.mrf.mxu0  ;;  %vm6382_vm2 = vcmp.eq.s32.totalorder %v5493_v20, 1 }
 0x1e6   : > { %v1966_v24 = vpop.f32.mrf.mxu1  ;;  %v2181_v59 = vadd.f32 %v2180_v23, %v2179_v51  ;;  %v5472_v25 = vadd.f32 %v1925_v45, %v1465_v16  ;;  %v5505_v16 = vrot.slane %v5412_v47, %v2099_v9  ;;  %v1588_v51 = vadd.f32 %v5324_v37, %v5297_v4 }
 0x1e7   : > { %v5474_v26 = vadd.f32 %v1966_v24, %v1506_v40  ;;  %v1927_v31 = vpop.f32.mrf.mxu0  ;;  %v1547_v40 = vadd.f32 %v5322_v36, %v5293_v63  ;;  %v1549_v63 = vadd.f32 %v5328_v42, %v5295_v0  ;;  %vm6381_vm0 = vcmp.eq.s32.totalorder %v5510_v14, 1 }
 0x1e8   : > { %v1968_v54 = vpop.f32.mrf.mxu1  ;;  %v2183_v48 = vadd.f32 %v2182_v41, %v2181_v59  ;;  %v2161_v56 = vsel %vm6385_vm7, %v5472_v25, 0.0  ;;  %v5484_v28 = vadd.f32 %v1927_v31, %v1467_v55  ;;  %v1590_v55 = vadd.f32 %v5330_v43, %v5299_v5 }
 0x1e9   : > { %v2184_v32 = vsel %vm222_vm3, %v2161_v56, 0.0  ;;  %v5487_v52 = vadd.f32 %v1968_v54, %v1508_v39  ;;  %v1929_v60 = vpop.f32.mrf.mxu0  ;;  %v2163_v50 = vsel %vm6383_vm6, %v5474_v26, 0.0  ;;  %vm6380_vm1 = vcmp.eq.s32.totalorder %v5505_v16, 1 }
 0x1ea   : > { %v1970_v29 = vpop.f32.mrf.mxu1  ;;  %v2185_v49 = vadd.f32 %v2184_v32, %v2183_v48  ;;  %v2162_v1 = vsel %vm6378_vm5, %v5484_v28, 0.0  ;;  %v2188_v45 = vsel %vm222_vm3, %v2163_v50, 0.0 }
 0x1eb   : > { %v2186_v2 = vsel %vm222_vm3, %v2162_v1, 0.0  ;;  %v1930_v7 = vpop.f32.mrf.mxu0  ;;  %v2164_v23 = vsel %vm6377_vm4, %v5487_v52, 0.0  ;;  %vm6379_vm4 = vcmp.eq.s32.totalorder %v5524_v10, 1 }
 0x1ec   : > { %v1971_v8 = vpop.f32.mrf.mxu1  ;;  %v2187_v17 = vadd.f32 %v2186_v2, %v2185_v49  ;;  %v2190_v59 = vsel %vm222_vm3, %v2164_v23, 0.0 }
 0x1ed   : > { %v2007_v9 = vpop.f32.mrf.mxu0 }
 0x1ee   : > { %v2048_v24 = vpop.f32.mrf.mxu1  ;;  %v2189_v4 = vadd.f32 %v2188_v45, %v2187_v17  ;;  %v5528_v36 = vadd.f32 %v2007_v9, %v1547_v40 }
 0x1ef   : > { %v5530_v37 = vadd.f32 %v2048_v24, %v1588_v51  ;;  %v2009_v39 = vpop.f32.mrf.mxu0 }
 0x1f0   : > { %v2050_v33 = vpop.f32.mrf.mxu1  ;;  %v2191_v30 = vadd.f32 %v2190_v59, %v2189_v4  ;;  %v2165_v0 = vsel %vm6382_vm2, %v5528_v36, 0.0  ;;  %v5540_v42 = vadd.f32 %v2009_v39, %v1549_v63 }
 0x1f1   : > { %v2192_v47 = vsel %vm222_vm3, %v2165_v0, 0.0  ;;  %v5543_v41 = vadd.f32 %v2050_v33, %v1590_v55  ;;  %v2011_v5 = vpop.f32.mrf.mxu0  ;;  %v2167_v54 = vsel %vm6380_vm1, %v5530_v37, 0.0 }
 0x1f2   : > { %v2052_v43 = vpop.f32.mrf.mxu1  ;;  %v2193_v31 = vadd.f32 %v2192_v47, %v2191_v30  ;;  %v2166_v48 = vsel %vm6381_vm0, %v5540_v42, 0.0  ;;  %v2196_v50 = vsel %vm222_vm3, %v2167_v54, 0.0 }
 0x1f3   : > { %v2194_v56 = vsel %vm222_vm3, %v2166_v48, 0.0  ;;  %v2012_v32 = vpop.f32.mrf.mxu0  ;;  %v2168_v49 = vsel %vm6379_vm4, %v5543_v41, 0.0 }
 0x1f4   : > { %v2053_v60 = vpop.f32.mrf.mxu1  ;;  %v2195_v29 = vadd.f32 %v2194_v56, %v2193_v31  ;;  %v2198_v2 = vsel %vm222_vm3, %v2168_v49, 0.0 }
 0x1f6   : > { %v2197_v1 = vadd.f32 %v2196_v50, %v2195_v29 }
 0x1f8   : > { %v2199_v7 = vadd.f32 %v2198_v2, %v2197_v1 }
 0x1fa   : > { %2200 = vadd.xlane.f32.xlu0 %v2199_v7 }
 0x283   : > { %v2201_v8 = vpop.xlane.xlu0 %2200 }
 0x284   : > { %v2202_v40 = vmul.f32 0.00390625, %v2201_v8 }
 0x286   : > { %v5559_v51 = vsub.f32 %v5357_v21, %v2202_v40  ;;  %v5562_v17 = vsub.f32 %v5371_v11, %v2202_v40  ;;  %v5565_v23 = vsub.f32 %v5359_v22, %v2202_v40  ;;  %v5568_v45 = vsub.f32 %v5373_v12, %v2202_v40 }
 0x287   : > { %v5577_v21 = vsub.f32 %v5416_v18, %v2202_v40  ;;  %v5583_v12 = vsub.f32 %v5428_v19, %v2202_v40  ;;  %v5589_v59 = vsub.f32 %v5418_v58, %v2202_v40  ;;  %v5597_v19 = vsub.f32 %v5431_v34, %v2202_v40 }
 0x288   : > { %v2219_v9 = vsel %vm2137_vm9, %v5559_v51, 0.0  ;;  %v2220_v24 = vsel %vm2138_vm11, %v5562_v17, 0.0  ;;  %v2221_v11 = vsel %vm2139_vm10, %v5565_v23, 0.0  ;;  %v2222_v4 = vsel %vm2140_vm12, %v5568_v45, 0.0 }
 0x289   : > { %v2235_v22 = vmul.f32 %v2219_v9, %v2219_v9  ;;  %v2236_v63 = vmul.f32 %v2220_v24, %v2220_v24  ;;  %v2237_v55 = vmul.f32 %v2221_v11, %v2221_v11  ;;  %v2223_v18 = vsel %vm2141_vm14, %v5577_v21, 0.0 }
 0x28a   : > { %v2238_v39 = vmul.f32 %v2222_v4, %v2222_v4  ;;  %v2224_v0 = vsel %vm2142_vm8, %v5583_v12, 0.0  ;;  %v2239_v5 = vmul.f32 %v2223_v18, %v2223_v18  ;;  %v5604_v43 = vsub.f32 %v5472_v25, %v2202_v40 }
 0x28b   : > { %v2251_v33 = vsel %vm222_vm3, %v2235_v22, 0.0  ;;  %v2252_v30 = vsel %vm222_vm3, %v2236_v63, 0.0  ;;  %v2254_v58 = vsel %vm222_vm3, %v2237_v55, 0.0  ;;  %v2225_v31 = vsel %vm6386_vm15, %v5589_v59, 0.0 }
 0x28c   : > { %v2253_v47 = vadd.f32 %v2252_v30, %v2251_v33  ;;  %v2240_v48 = vmul.f32 %v2224_v0, %v2224_v0  ;;  %v2256_v34 = vsel %vm222_vm3, %v2238_v39, 0.0  ;;  %v5611_v56 = vsub.f32 %v5484_v28, %v2202_v40 }
 0x28d   : > { %v2226_v32 = vsel %vm6384_vm13, %v5597_v19, 0.0  ;;  %v2241_v29 = vmul.f32 %v2225_v31, %v2225_v31  ;;  %v2258_v25 = vsel %vm222_vm3, %v2239_v5, 0.0  ;;  %v5618_v49 = vsub.f32 %v5474_v26, %v2202_v40 }
 0x28e   : > { %v2255_v54 = vadd.f32 %v2254_v58, %v2253_v47  ;;  %v2227_v50 = vsel %vm6385_vm7, %v5604_v43, 0.0  ;;  %v2242_v2 = vmul.f32 %v2226_v32, %v2226_v32  ;;  %v2260_v28 = vsel %vm222_vm3, %v2240_v48, 0.0 }
 0x28f   : > { %v5625_v7 = vsub.f32 %v5487_v52, %v2202_v40  ;;  %v2228_v8 = vsel %vm6378_vm5, %v5611_v56, 0.0  ;;  %v2243_v24 = vmul.f32 %v2227_v50, %v2227_v50  ;;  %v2262_v26 = vsel %vm222_vm3, %v2241_v29, 0.0 }
 0x290   : > { %v2257_v60 = vadd.f32 %v2256_v34, %v2255_v54  ;;  %v5632_v11 = vsub.f32 %v5528_v36, %v2202_v40  ;;  %v2229_v22 = vsel %vm6383_vm6, %v5618_v49, 0.0  ;;  %v2244_v4 = vmul.f32 %v2228_v8, %v2228_v8 }
 0x291   : > { %v2264_v52 = vsel %vm222_vm3, %v2242_v2, 0.0  ;;  %v5639_v55 = vsub.f32 %v5540_v42, %v2202_v40  ;;  %vm6387_vm5 = vcmp.eq.s32.totalorder %v5468_v46, 1  ;;  %v2245_v33 = vmul.f32 %v2229_v22, %v2229_v22 }
 0x292   : > { %v2259_v1 = vadd.f32 %v2258_v25, %v2257_v60  ;;  %v2230_v18 = vsel %vm6387_vm5, %v5625_v7, 0.0  ;;  %v2266_v36 = vsel %vm222_vm3, %v2243_v24, 0.0  ;;  %v5646_v30 = vsub.f32 %v5530_v37, %v2202_v40 }
 0x293   : > { %v2231_v0 = vsel %vm6382_vm2, %v5632_v11, 0.0  ;;  %v2246_v5 = vmul.f32 %v2230_v18, %v2230_v18  ;;  %v2268_v42 = vsel %vm222_vm3, %v2244_v4, 0.0  ;;  %v5653_v58 = vsub.f32 %v5543_v41, %v2202_v40 }
 0x294   : > { %v2261_v9 = vadd.f32 %v2260_v28, %v2259_v1  ;;  %v2232_v31 = vsel %vm6381_vm0, %v5639_v55, 0.0  ;;  %v2247_v48 = vmul.f32 %v2231_v0, %v2231_v0  ;;  %v2270_v37 = vsel %vm222_vm3, %v2245_v33, 0.0 }
 0x295   : > { %v2233_v34 = vsel %vm6380_vm1, %v5646_v30, 0.0  ;;  %v2248_v60 = vmul.f32 %v2232_v31, %v2232_v31  ;;  %v2272_v29 = vsel %vm222_vm3, %v2246_v5, 0.0  ;;  %v2234_v41 = vsel %vm6379_vm4, %v5653_v58, 0.0 }
 0x296   : > { %v2263_v63 = vadd.f32 %v2262_v26, %v2261_v9  ;;  %v2249_v25 = vmul.f32 %v2233_v34, %v2233_v34  ;;  %v2274_v50 = vsel %vm222_vm3, %v2247_v48, 0.0  ;;  %v2250_v2 = vmul.f32 %v2234_v41, %v2234_v41 }
 0x297   : > { %v2276_v28 = vsel %vm222_vm3, %v2248_v60, 0.0  ;;  %vm6388_vm5 = vcmask 7168   ;;  %vm6389_vm4 = vcmask 121856   ;;  %vm6390_vm1 = vcmask 1041408  }
 0x298   : > { %v2265_v39 = vadd.f32 %v2264_v52, %v2263_v63  ;;  %v2278_v9 = vsel %vm222_vm3, %v2249_v25, 0.0  ;;  %v2280_v26 = vsel %vm222_vm3, %v2250_v2, 0.0  ;;  %vm6391_vm0 = vmmov %vm6388_vm5 }
 0x299   : > { %vm6392_vm2 = vmmov %vm6389_vm4 }
 0x29a   : > { %v2267_v47 = vadd.f32 %v2266_v36, %v2265_v39  ;;  %vm6393_vm6 = vmmov %vm6390_vm1 }
 0x29c   : > { %v2269_v54 = vadd.f32 %v2268_v42, %v2267_v47 }
 0x29e   : > { %v2271_v32 = vadd.f32 %v2270_v37, %v2269_v54 }
 0x2a0   : > { %v2273_v40 = vadd.f32 %v2272_v29, %v2271_v32 }
 0x2a2   : > { %v2275_v1 = vadd.f32 %v2274_v50, %v2273_v40 }
 0x2a4   : > { %v2277_v8 = vadd.f32 %v2276_v28, %v2275_v1 }
 0x2a6   : > { %v2279_v24 = vadd.f32 %v2278_v9, %v2277_v8 }
 0x2a8   : > { %v2281_v22 = vadd.f32 %v2280_v26, %v2279_v24 }
 0x2aa   : > { %2282 = vadd.xlane.f32.xlu1 %v2281_v22 }
 0x333   : > { %v2283_v63 = vpop.xlane.xlu1 %2282 }
 0x334   : > { %v2284_v4 = vmul.f32 0.00390625, %v2283_v63 }
 0x336   : > { %v2285_v52 = vadd.f32 1e-05, %v2284_v4 }
 0x338   : > { %4849 = vrsqrt.f32 %v2285_v52 }
 0x345   : > { %v5670_v18 = vpop.eup %4849 }
 0x346   : > { %v2287_v39 = vmul.f32 %v5670_v18, %v5559_v51  ;;  %v2288_v33 = vmul.f32 %v5670_v18, %v5562_v17  ;;  %v2289_v5 = vmul.f32 %v5670_v18, %v5565_v23  ;;  %v2290_v51 = vmul.f32 %v5670_v18, %v5568_v45 }
 0x347   : > { %v2291_v54 = vmul.f32 %v5670_v18, %v5577_v21  ;;  %v2292_v37 = vmul.f32 %v5670_v18, %v5583_v12  ;;  %v2293_v32 = vmul.f32 %v5670_v18, %v5589_v59  ;;  %v2294_v29 = vmul.f32 %v5670_v18, %v5597_v19 }
 0x348   : > { %v2303_v36 = vmax.f32 %v2287_v39, 0.0  ;;  %v2304_v47 = vmax.f32 %v2288_v33, 0.0  ;;  %v2305_v31 = vmax.f32 %v2289_v5, 0.0  ;;  %v2306_v23 = vmax.f32 %v2290_v51, 0.0 }
 0x349   : > { %v2307_v45 = vmax.f32 %v2291_v54, 0.0  ;;  %v2308_v21 = vmax.f32 %v2292_v37, 0.0  ;;  %v2309_v12 = vmax.f32 %v2293_v32, 0.0  ;;  %v2310_v59 = vmax.f32 %v2294_v29, 0.0 }
 0x34a   : > { %v5676_v0 = vpack.c.bf16 %v2303_v36, %v2303_v36  ;;  %v5684_v42 = vpack.c.bf16 %v2304_v47, %v2304_v47  ;;  %v5692_v17 = vpack.c.bf16 %v2305_v31, %v2305_v31  ;;  %v5700_v48 = vpack.c.bf16 %v2306_v23, %v2306_v23 }
 0x34b   : > { %v5708_v34 = vpack.c.bf16 %v2307_v45, %v2307_v45  ;;  %v5716_v60 = vpack.c.bf16 %v2308_v21, %v2308_v21  ;;  %v5724_v41 = vpack.c.bf16 %v2309_v12, %v2309_v12  ;;  %v2295_v40 = vmul.f32 %v5670_v18, %v5604_v43 }
 0x34c   : > { %2338 = vrot.lane.b32.xlu1 %v5676_v0, %s4864_s24  ;;  %2336 = vrot.lane.b32.xlu0 %v5676_v0, %s4862_s22  ;;  %v5732_v25 = vpack.c.bf16 %v2310_v59, %v2310_v59  ;;  %v2296_v50 = vmul.f32 %v5670_v18, %v5611_v56  ;;  %v2297_v2 = vmul.f32 %v5670_v18, %v5618_v49  ;;  %v2344_v47 = vrot.slane %v5676_v0, 6 }
 0x34d   : > { %v2311_v19 = vmax.f32 %v2295_v40, 0.0  ;;  %v2298_v8 = vmul.f32 %v5670_v18, %v5625_v7  ;;  %v2299_v24 = vmul.f32 %v5670_v18, %v5632_v11  ;;  %v2300_v22 = vmul.f32 %v5670_v18, %v5639_v55 }
 0x34e   : > { %v2312_v43 = vmax.f32 %v2296_v50, 0.0  ;;  %v2313_v56 = vmax.f32 %v2297_v2, 0.0  ;;  %v2301_v4 = vmul.f32 %v5670_v18, %v5646_v30  ;;  %v2302_v39 = vmul.f32 %v5670_v18, %v5653_v58 }
 0x34f   : > { %v5740_v1 = vpack.c.bf16 %v2311_v19, %v2311_v19  ;;  %v2314_v49 = vmax.f32 %v2298_v8, 0.0  ;;  %v2315_v7 = vmax.f32 %v2299_v24, 0.0  ;;  %v2316_v11 = vmax.f32 %v2300_v22, 0.0 }
 0x350   : > { %2363 = vrot.lane.b32.xlu1 %v5684_v42, %s4864_s24  ;;  %2361 = vrot.lane.b32.xlu0 %v5684_v42, %s4862_s22  ;;  %v5748_v28 = vpack.c.bf16 %v2312_v43, %v2312_v43  ;;  %v5756_v9 = vpack.c.bf16 %v2313_v56, %v2313_v56  ;;  %v2317_v55 = vmax.f32 %v2301_v4, 0.0  ;;  %v2318_v30 = vmax.f32 %v2302_v39, 0.0 }
 0x351   : > { %v5764_v26 = vpack.c.bf16 %v2314_v49, %v2314_v49  ;;  %v5772_v63 = vpack.c.bf16 %v2315_v7, %v2315_v7  ;;  %v5780_v52 = vpack.c.bf16 %v2316_v11, %v2316_v11  ;;  %v2369_v37 = vrot.slane %v5684_v42, 6 }
 0x352   : > { %v5788_v33 = vpack.c.bf16 %v2317_v55, %v2317_v55  ;;  %v5794_v36 = vpack.c.bf16 %v2318_v30, %v2318_v30  ;;  %v2394_v43 = vrot.slane %v5692_v17, 6  ;;  %v2419_v11 = vrot.slane %v5700_v48, 6 }
 0x354   : > { %2388 = vrot.lane.b32.xlu1 %v5692_v17, %s4864_s24  ;;  %2386 = vrot.lane.b32.xlu0 %v5692_v17, %s4862_s22 }
 0x358   : > { %2413 = vrot.lane.b32.xlu1 %v5700_v48, %s4864_s24  ;;  %2411 = vrot.lane.b32.xlu0 %v5700_v48, %s4862_s22 }
 0x35c   : > { %2438 = vrot.lane.b32.xlu1 %v5708_v34, %s4864_s24  ;;  %2436 = vrot.lane.b32.xlu0 %v5708_v34, %s4862_s22 }
 0x360   : > { %2463 = vrot.lane.b32.xlu1 %v5716_v60, %s4864_s24  ;;  %2461 = vrot.lane.b32.xlu0 %v5716_v60, %s4862_s22 }
 0x364   : > { %2488 = vrot.lane.b32.xlu1 %v5724_v41, %s4864_s24  ;;  %2486 = vrot.lane.b32.xlu0 %v5724_v41, %s4862_s22 }
 0x368   : > { %2513 = vrot.lane.b32.xlu1 %v5732_v25, %s4864_s24  ;;  %2511 = vrot.lane.b32.xlu0 %v5732_v25, %s4862_s22 }
 0x36c   : > { %2538 = vrot.lane.b32.xlu1 %v5740_v1, %s4864_s24  ;;  %2536 = vrot.lane.b32.xlu0 %v5740_v1, %s4862_s22 }
 0x370   : > { %2563 = vrot.lane.b32.xlu1 %v5748_v28, %s4864_s24  ;;  %2561 = vrot.lane.b32.xlu0 %v5748_v28, %s4862_s22 }
 0x374   : > { %2588 = vrot.lane.b32.xlu1 %v5756_v9, %s4864_s24  ;;  %2586 = vrot.lane.b32.xlu0 %v5756_v9, %s4862_s22 }
 0x378   : > { %2613 = vrot.lane.b32.xlu1 %v5764_v26, %s4864_s24  ;;  %2611 = vrot.lane.b32.xlu0 %v5764_v26, %s4862_s22 }
 0x37c   : > { %2638 = vrot.lane.b32.xlu1 %v5772_v63, %s4864_s24  ;;  %2636 = vrot.lane.b32.xlu0 %v5772_v63, %s4862_s22 }
 0x380   : > { %2663 = vrot.lane.b32.xlu1 %v5780_v52, %s4864_s24  ;;  %2661 = vrot.lane.b32.xlu0 %v5780_v52, %s4862_s22 }
 0x384   : > { %2688 = vrot.lane.b32.xlu1 %v5788_v33, %s4864_s24  ;;  %2686 = vrot.lane.b32.xlu0 %v5788_v33, %s4862_s22 }
 0x388   : > { %2713 = vrot.lane.b32.xlu1 %v5794_v36, %s4864_s24  ;;  %2711 = vrot.lane.b32.xlu0 %v5794_v36, %s4862_s22 }
 0x3be   : > { %v2339_v58 = vpop.permute.xlu1 %2338  ;;  %v2337_v18 = vpop.permute.xlu0 %2336 }
 0x3bf   : > { %v2342_v5 = vsel %vm6388_vm5, %v2337_v18, %v2339_v58  ;;  %v2343_v31 = vsel %vm6389_vm4, %v2337_v18, %v2339_v58  ;;  %vm6394_vm5 = vcmask 125952   ;;  %vm6395_vm4 = vcmask 123904  }
 0x3c0   : > { %v2346_v51 = vrot.slane %v2343_v31, 4  ;;  %v2348_v23 = vsel %vm6390_vm1, %v2342_v5, %v2344_v47  ;;  %vm6396_vm1 = vmmov %vm6391_vm0 }
 0x3c2   : > { %v2350_v54 = vsel %vm222_vm3, %v2348_v23, %v2346_v51  ;;  %v2364_v45 = vpop.permute.xlu1 %2363  ;;  %v2362_v21 = vpop.permute.xlu0 %2361  ;;  %v2444_v51 = vrot.slane %v5708_v34, 6  ;;  %v2469_v34 = vrot.slane %v5716_v60, 6  ;;  %v5846_v60 = vld [vmem:[%s6366_s2 + $0x2] sm:$0x3] }
 0x3c3   : > { %v4568_v32 = vcombine.low %v2350_v54, %v2350_v54  ;;  %v4569_v12 = vcombine.high %v2350_v54, %v2350_v54  ;;  %v2367_v29 = vsel %vm6391_vm0, %v2362_v21, %v2364_v45  ;;  %v2368_v59 = vsel %vm6392_vm2, %v2362_v21, %v2364_v45  ;;  %vm6397_vm0 = vmmov %vm6392_vm2 }
 0x3c4   : > { %v2371_v0 = vrot.slane %v2368_v59, 4  ;;  %v2373_v40 = vsel %vm6393_vm6, %v2367_v29, %v2369_v37  ;;  %vm6398_vm2 = vmmov %vm6393_vm6 }
 0x3c5   : > { %2358 = vst.msk [vmem:[#allocation2 + $0x4] sm:$0xf] %vm6394_vm5, %v4568_v32  ;;  %vm6399_vm6 = vmmov %vm6394_vm5 }
 0x3c6   : > { %2359 = vst.msk [vmem:[#allocation2 + $0x4c] sm:$0x3] %vm6395_vm4, %v4569_v12  ;;  %v2375_v19 = vsel %vm222_vm3, %v2373_v40, %v2371_v0  ;;  %v2389_v50 = vpop.permute.xlu1 %2388  ;;  %v2387_v42 = vpop.permute.xlu0 %2386  ;;  %vm6400_vm5 = vmmov %vm6395_vm4 }
 0x3c7   : > { %v4570_v2 = vcombine.low %v2375_v19, %v2375_v19  ;;  %v4571_v56 = vcombine.high %v2375_v19, %v2375_v19  ;;  %v2392_v8 = vsel %vm6396_vm1, %v2387_v42, %v2389_v50  ;;  %v2393_v49 = vsel %vm6397_vm0, %v2387_v42, %v2389_v50  ;;  %vm6401_vm4 = vmmov %vm6399_vm6 }
 0x3c8   : > { %v2396_v24 = vrot.slane %v2393_v49, 4  ;;  %v2398_v7 = vsel %vm6398_vm2, %v2392_v8, %v2394_v43  ;;  %vm6402_vm13 = vmmov %vm6400_vm5 }
 0x3c9   : > { %2383 = vst.msk [vmem:[#allocation2 + $0x8] sm:$0xf] %vm6399_vm6, %v4570_v2  ;;  %vm6403_vm6 = vmmov %vm6401_vm4 }
 0x3ca   : > { %2384 = vst.msk [vmem:[#allocation2 + $0x50] sm:$0x3] %vm6400_vm5, %v4571_v56  ;;  %v2400_v17 = vsel %vm222_vm3, %v2398_v7, %v2396_v24  ;;  %v2414_v22 = vpop.permute.xlu1 %2413  ;;  %v2412_v4 = vpop.permute.xlu0 %2411  ;;  %v2494_v7 = vrot.slane %v5724_v41, 6 }
 0x3cb   : > { %2735 = vst.msk [vmem:[#allocation2] sm:$0xf] %vm6401_vm4, %v4570_v2  ;;  %v4572_v55 = vcombine.low %v2400_v17, %v2400_v17  ;;  %v4573_v39 = vcombine.high %v2400_v17, %v2400_v17  ;;  %v2417_v30 = vsel %vm6396_vm1, %v2412_v4, %v2414_v22  ;;  %v2418_v58 = vsel %vm6397_vm0, %v2412_v4, %v2414_v22  ;;  %vm6405_vm4 = vmmov %vm6397_vm0 }
 0x3cc   : > { %2736 = vst.msk [vmem:[#allocation2 + $0x48] sm:$0x3] %vm6402_vm13, %v4571_v56  ;;  %v2421_v18 = vrot.slane %v2418_v58, 4  ;;  %v2423_v47 = vsel %vm6398_vm2, %v2417_v30, %v2419_v11  ;;  %vm6404_vm13 = vmmov %vm6396_vm1 }
 0x3cd   : > { %2408 = vst.msk [vmem:[#allocation2 + $0xc] sm:$0xf] %vm6403_vm6, %v4572_v55  ;;  %vm6406_vm1 = vmmov %vm6398_vm2  ;;  %v4793_v29 = vld [vmem:[#allocation2 + $0x4] ss:$72 sps:$4 sm:$0x3f]  }
 0x3ce   : > { %2409 = vst.msk [vmem:[#allocation2 + $0x54] sm:$0x3] %vm6400_vm5, %v4573_v39  ;;  %v2425_v5 = vsel %vm222_vm3, %v2423_v47, %v2421_v18  ;;  %v2439_v31 = vpop.permute.xlu1 %2438  ;;  %v2437_v48 = vpop.permute.xlu0 %2436  ;;  %vm6407_vm0 = vmmov %vm6403_vm6 }
 0x3cf   : > { %v4574_v23 = vcombine.low %v2425_v5, %v2425_v5  ;;  %v4575_v54 = vcombine.high %v2425_v5, %v2425_v5  ;;  %v2442_v45 = vsel %vm6404_vm13, %v2437_v48, %v2439_v31  ;;  %v2443_v37 = vsel %vm6405_vm4, %v2437_v48, %v2439_v31  ;;  %vm6408_vm2 = vmmov %vm6400_vm5 }
 0x3d0   : > { %v2446_v21 = vrot.slane %v2443_v37, 4  ;;  %v2448_v32 = vsel %vm6406_vm1, %v2442_v45, %v2444_v51  ;;  %vm6409_vm6 = vmmov %vm6404_vm13  ;;  %vm6411_vm13 = vcmask 1045504   ;;  %v2519_v5 = vrot.slane %v5732_v25, 6 }
 0x3d1   : > { %2433 = vst.msk [vmem:[#allocation2 + $0x10] sm:$0xf] %vm6407_vm0, %v4574_v23  ;;  %v4791_v12 = vld [vmem:[#allocation2 + $0x8] ss:$72 sps:$4 sm:$0x3f]   ;;  %vm6410_vm5 = vmmov %vm6405_vm4 }
 0x3d2   : > { %2434 = vst.msk [vmem:[#allocation2 + $0x58] sm:$0x3] %vm6408_vm2, %v4575_v54  ;;  %v2450_v59 = vsel %vm222_vm3, %v2448_v32, %v2446_v21  ;;  %v2464_v0 = vpop.permute.xlu1 %2463  ;;  %v2462_v40 = vpop.permute.xlu0 %2461  ;;  %4617 = vmatprep.subr.msk.bf16.mxu0 %vm6411_vm13, %v4791_v12  ;;  %vm6412_vm4 = vmmov %vm6406_vm1  ;;  %v2544_v12 = vrot.slane %v5740_v1, 6 }
 0x3d3   : > { %v4576_v19 = vcombine.low %v2450_v59, %v2450_v59  ;;  %v4577_v50 = vcombine.high %v2450_v59, %v2450_v59  ;;  %v2467_v43 = vsel %vm6409_vm6, %v2462_v40, %v2464_v0  ;;  %v2468_v42 = vsel %vm6410_vm5, %v2462_v40, %v2464_v0  ;;  %vm6413_vm1 = vmmov %vm6411_vm13 }
 0x3d4   : > { %v2471_v2 = vrot.slane %v2468_v42, 4  ;;  %v2473_v56 = vsel %vm6412_vm4, %v2467_v43, %v2469_v34  ;;  %v2842_v8 = vsel %vm6413_vm1, %v4793_v29, 0  ;;  %vm6414_vm13 = vmmov %vm6412_vm4  ;;  %vm6415_vm4 = vcmask 97280  }
 0x3d5   : > { %2458 = vst.msk [vmem:[#allocation2 + $0x14] sm:$0xf] %vm6407_vm0, %v4576_v19  ;;  %2904 = vmatpush1.bf16.msra.mxu0 %v2842_v8  ;;  %vm6416_vm1 = vmmov %vm6407_vm0  ;;  %v4796_v18 = vld [vmem:[#allocation2 + $0xc] ss:$72 sps:$4 sm:$0x3f]  }
 0x3d6   : > { %2459 = vst.msk [vmem:[#allocation2 + $0x5c] sm:$0x3] %vm6408_vm2, %v4577_v50  ;;  %v2475_v49 = vsel %vm222_vm3, %v2473_v56, %v2471_v2  ;;  %v2489_v24 = vpop.permute.xlu1 %2488  ;;  %v2487_v17 = vpop.permute.xlu0 %2486  ;;  %vm6417_vm0 = vmmov %vm6408_vm2  ;;  %v2569_v56 = vrot.slane %v5748_v28, 6 }
 0x3d7   : > { %v4578_v22 = vcombine.low %v2475_v49, %v2475_v49  ;;  %v4579_v11 = vcombine.high %v2475_v49, %v2475_v49  ;;  %v2492_v4 = vsel %vm6409_vm6, %v2487_v17, %v2489_v24  ;;  %v2493_v55 = vsel %vm6410_vm5, %v2487_v17, %v2489_v24  ;;  %vm6418_vm2 = vmmov %vm6409_vm6 }
 0x3d8   : > { %v2496_v39 = vrot.slane %v2493_v55, 4  ;;  %v2498_v30 = vsel %vm6414_vm13, %v2492_v4, %v2494_v7  ;;  %4618 = vmatmul.mubr.msk.bf16.vlgmr.msra.gmra.mxu0 %vm6415_vm4, %v5846_v60  ;;  %vm6419_vm6 = vmmov %vm6410_vm5  ;;  %vm6420_vm5 = vcmask 1045504  }
 0x3d9   : > { %2483 = vst.msk [vmem:[#allocation2 + $0x18] sm:$0xf] %vm6416_vm1, %v4578_v22  ;;  %v4794_v58 = vld [vmem:[#allocation2 + $0x10] ss:$72 sps:$4 sm:$0x3f]   ;;  %3003 = vmatprep.mubr.bf16.mxu0 %v4879_v3  ;;  %vm6421_vm4 = vmmov %vm6420_vm5 }
 0x3da   : > { %2484 = vst.msk [vmem:[#allocation2 + $0x60] sm:$0x3] %vm6417_vm0, %v4579_v11  ;;  %v2500_v41 = vsel %vm222_vm3, %v2498_v30, %v2496_v39  ;;  %v2514_v47 = vpop.permute.xlu1 %2513  ;;  %v2512_v31 = vpop.permute.xlu0 %2511  ;;  %4619 = vmatprep.subr.msk.bf16.mxu1 %vm6420_vm5, %v4794_v58  ;;  %v2848_v21 = vsel %vm6421_vm4, %v4796_v18, 0  ;;  %vm6422_vm5 = vmmov %vm6414_vm13  ;;  %v2594_v39 = vrot.slane %v5756_v9, 6 }
 0x3db   : > { %v4580_v51 = vcombine.low %v2500_v41, %v2500_v41  ;;  %v4581_v48 = vcombine.high %v2500_v41, %v2500_v41  ;;  %v2517_v23 = vsel %vm6418_vm2, %v2512_v31, %v2514_v47  ;;  %v2518_v54 = vsel %vm6419_vm6, %v2512_v31, %v2514_v47  ;;  %2945 = vmatpush1.bf16.msra.mxu1 %v2848_v21  ;;  %vm6424_vm4 = vmmov %vm6416_vm1 }
 0x3dc   : > { %v2521_v45 = vrot.slane %v2518_v54, 4  ;;  %v2523_v37 = vsel %vm6414_vm13, %v2517_v23, %v2519_v5  ;;  %vm6423_vm13 = vcmask 97280   ;;  %v2619_v54 = vrot.slane %v5764_v26, 6 }
 0x3dd   : > { %2508 = vst.msk [vmem:[#allocation2 + $0x1c] sm:$0xf] %vm6416_vm1, %v4580_v51  ;;  %vm6425_vm1 = vmmov %vm6417_vm0  ;;  %v4799_v42 = vld [vmem:[#allocation2 + $0x14] ss:$72 sps:$4 sm:$0x3f]  }
 0x3de   : > { %2509 = vst.msk [vmem:[#allocation2 + $0x64] sm:$0x3] %vm6417_vm0, %v4581_v48  ;;  %v2525_v25 = vsel %vm222_vm3, %v2523_v37, %v2521_v45  ;;  %v2539_v32 = vpop.permute.xlu1 %2538  ;;  %v2537_v29 = vpop.permute.xlu0 %2536  ;;  %4620 = vmatmul.mubr.msk.bf16.vlgmr.msra.gmra.mxu1 %vm6423_vm13, %v5846_v60  ;;  %vm6426_vm0 = vmmov %vm6418_vm2 }
 0x3df   : > { %v4582_v59 = vcombine.low %v2525_v25, %v2525_v25  ;;  %v4583_v0 = vcombine.high %v2525_v25, %v2525_v25  ;;  %v2542_v34 = vsel %vm6418_vm2, %v2537_v29, %v2539_v32  ;;  %v2543_v40 = vsel %vm6419_vm6, %v2537_v29, %v2539_v32  ;;  %3044 = vmatprep.mubr.bf16.mxu1 %v4879_v3  ;;  %vm6427_vm2 = vmmov %vm6419_vm6 }
 0x3e0   : > { %v2546_v19 = vrot.slane %v2543_v40, 4  ;;  %v2548_v50 = vsel %vm6422_vm5, %v2542_v34, %v2544_v12  ;;  %vm6428_vm6 = vcmask 1045504   ;;  %v2644_v34 = vrot.slane %v5772_v63, 6 }
 0x3e1   : > { %2533 = vst.msk [vmem:[#allocation2 + $0x20] sm:$0xf] %vm6424_vm4, %v4582_v59  ;;  %v4797_v43 = vld [vmem:[#allocation2 + $0x18] ss:$72 sps:$4 sm:$0x3f]   ;;  %vm6429_vm13 = vmmov %vm6428_vm6 }
 0x3e2   : > { %2534 = vst.msk [vmem:[#allocation2 + $0x68] sm:$0x3] %vm6425_vm1, %v4583_v0  ;;  %v2550_v1 = vsel %vm222_vm3, %v2548_v50, %v2546_v19  ;;  %v2564_v2 = vpop.permute.xlu1 %2563  ;;  %v2562_v8 = vpop.permute.xlu0 %2561  ;;  %4621 = vmatprep.subr.msk.bf16.mxu0 %vm6428_vm6, %v4797_v43  ;;  %v2854_v4 = vsel %vm6429_vm13, %v4799_v42, 0  ;;  %vm6430_vm6 = vmmov %vm6422_vm5 }
 0x3e3   : > { %v4584_v49 = vcombine.low %v2550_v1, %v2550_v1  ;;  %v4585_v24 = vcombine.high %v2550_v1, %v2550_v1  ;;  %v2567_v7 = vsel %vm6426_vm0, %v2562_v8, %v2564_v2  ;;  %v2568_v17 = vsel %vm6427_vm2, %v2562_v8, %v2564_v2  ;;  %2986 = vmatpush1.bf16.msra.mxu0 %v2854_v4  ;;  %vm6432_vm13 = vmmov %vm6424_vm4 }
 0x3e4   : > { %v2571_v22 = vrot.slane %v2568_v17, 4  ;;  %v2573_v11 = vsel %vm6422_vm5, %v2567_v7, %v2569_v56  ;;  %vm6431_vm5 = vcmask 97280  }
 0x3e5   : > { %2558 = vst.msk [vmem:[#allocation2 + $0x24] sm:$0xf] %vm6424_vm4, %v4584_v49  ;;  %vm6433_vm4 = vmmov %vm6425_vm1  ;;  %v4802_v48 = vld [vmem:[#allocation2 + $0x1c] ss:$72 sps:$4 sm:$0x3f]  }
 0x3e6   : > { %2559 = vst.msk [vmem:[#allocation2 + $0x6c] sm:$0x3] %vm6425_vm1, %v4585_v24  ;;  %v2575_v28 = vsel %vm222_vm3, %v2573_v11, %v2571_v22  ;;  %v2589_v55 = vpop.permute.xlu1 %2588  ;;  %v2587_v30 = vpop.permute.xlu0 %2586  ;;  %4622 = vmatmul.mubr.msk.bf16.vlgmr.msra.gmra.mxu0 %vm6431_vm5, %v5846_v60  ;;  %vm6434_vm1 = vmmov %vm6426_vm0  ;;  %v2669_v24 = vrot.slane %v5780_v52, 6 }
 0x3e7   : > { %v4586_v58 = vcombine.low %v2575_v28, %v2575_v28  ;;  %v4587_v18 = vcombine.high %v2575_v28, %v2575_v28  ;;  %v2592_v41 = vsel %vm6426_vm0, %v2587_v30, %v2589_v55  ;;  %v2593_v47 = vsel %vm6427_vm2, %v2587_v30, %v2589_v55  ;;  %3085 = vmatprep.mubr.bf16.mxu0 %v4879_v3  ;;  %vm6435_vm0 = vmmov %vm6427_vm2 }
 0x3e8   : > { %v2596_v5 = vrot.slane %v2593_v47, 4  ;;  %v2598_v31 = vsel %vm6430_vm6, %v2592_v41, %v2594_v39  ;;  %vm6436_vm2 = vcmask 1045504  }
 0x3e9   : > { %2583 = vst.msk [vmem:[#allocation2 + $0x28] sm:$0xf] %vm6432_vm13, %v4586_v58  ;;  %v4800_v51 = vld [vmem:[#allocation2 + $0x20] ss:$72 sps:$4 sm:$0x3f]   ;;  %vm6437_vm5 = vmmov %vm6436_vm2  ;;  %v2694_v58 = vrot.slane %v5788_v33, 6 }
 0x3ea   : > { %2584 = vst.msk [vmem:[#allocation2 + $0x70] sm:$0x3] %vm6433_vm4, %v4587_v18  ;;  %v2600_v9 = vsel %vm222_vm3, %v2598_v31, %v2596_v5  ;;  %v2614_v23 = vpop.permute.xlu1 %2613  ;;  %v2612_v45 = vpop.permute.xlu0 %2611  ;;  %4623 = vmatprep.subr.msk.bf16.mxu1 %vm6436_vm2, %v4800_v51  ;;  %v2860_v59 = vsel %vm6437_vm5, %v4802_v48, 0  ;;  %vm6438_vm2 = vmmov %vm6430_vm6 }
 0x3eb   : > { %v4588_v37 = vcombine.low %v2600_v9, %v2600_v9  ;;  %v4589_v21 = vcombine.high %v2600_v9, %v2600_v9  ;;  %v2617_v25 = vsel %vm6434_vm1, %v2612_v45, %v2614_v23  ;;  %v2618_v32 = vsel %vm6435_vm0, %v2612_v45, %v2614_v23  ;;  %3027 = vmatpush1.bf16.msra.mxu1 %v2860_v59  ;;  %vm6440_vm5 = vmmov %vm6432_vm13 }
 0x3ec   : > { %v2621_v12 = vrot.slane %v2618_v32, 4  ;;  %v2623_v29 = vsel %vm6430_vm6, %v2617_v25, %v2619_v54  ;;  %vm6439_vm6 = vcmask 97280   ;;  %v2719_v45 = vrot.slane %v5794_v36, 6 }
 0x3ed   : > { %2608 = vst.msk [vmem:[#allocation2 + $0x2c] sm:$0xf] %vm6432_vm13, %v4588_v37  ;;  %vm6441_vm13 = vmmov %vm6433_vm4  ;;  %v4805_v8 = vld [vmem:[#allocation2 + $0x24] ss:$72 sps:$4 sm:$0x3f]  }
 0x3ee   : > { %2609 = vst.msk [vmem:[#allocation2 + $0x74] sm:$0x3] %vm6433_vm4, %v4589_v21  ;;  %v2625_v26 = vsel %vm222_vm3, %v2623_v29, %v2621_v12  ;;  %v2639_v0 = vpop.permute.xlu1 %2638  ;;  %v2637_v40 = vpop.permute.xlu0 %2636  ;;  %4624 = vmatmul.mubr.msk.bf16.vlgmr.msra.gmra.mxu1 %vm6439_vm6, %v5846_v60  ;;  %vm6442_vm4 = vmmov %vm6434_vm1 }
 0x3ef   : > { %v4590_v19 = vcombine.low %v2625_v26, %v2625_v26  ;;  %v4591_v50 = vcombine.high %v2625_v26, %v2625_v26  ;;  %v2642_v43 = vsel %vm6434_vm1, %v2637_v40, %v2639_v0  ;;  %v2643_v42 = vsel %vm6435_vm0, %v2637_v40, %v2639_v0  ;;  %3126 = vmatprep.mubr.bf16.mxu1 %v4879_v3  ;;  %vm6443_vm1 = vmmov %vm6435_vm0 }
 0x3f0   : > { %v2646_v1 = vrot.slane %v2643_v42, 4  ;;  %v2648_v2 = vsel %vm6438_vm2, %v2642_v43, %v2644_v34  ;;  %vm6444_vm0 = vcmask 1045504   ;;  %v4814_v42 = vld [vmem:[#allocation2] ss:$72 sps:$4 sm:$0x3f]  }
 0x3f1   : > { %2633 = vst.msk [vmem:[#allocation2 + $0x30] sm:$0xf] %vm6440_vm5, %v4590_v19  ;;  %v4803_v56 = vld [vmem:[#allocation2 + $0x28] ss:$72 sps:$4 sm:$0x3f]   ;;  %vm6445_vm6 = vmmov %vm6444_vm0 }
 0x3f2   : > { %2634 = vst.msk [vmem:[#allocation2 + $0x78] sm:$0x3] %vm6441_vm13, %v4591_v50  ;;  %v2650_v63 = vsel %vm222_vm3, %v2648_v2, %v2646_v1  ;;  %v2664_v49 = vpop.permute.xlu1 %2663  ;;  %v2662_v7 = vpop.permute.xlu0 %2661  ;;  %4625 = vmatprep.subr.msk.bf16.mxu0 %vm6444_vm0, %v4803_v56  ;;  %v2866_v39 = vsel %vm6445_vm6, %v4805_v8, 0  ;;  %vm6446_vm0 = vmmov %vm6438_vm2  ;;  %v4812_v50 = vld [vmem:[#allocation2 + $0x4] ss:$72 sps:$4 sm:$0x3f]  }
 0x3f3   : > { %v4592_v17 = vcombine.low %v2650_v63, %v2650_v63  ;;  %v4593_v22 = vcombine.high %v2650_v63, %v2650_v63  ;;  %v2667_v11 = vsel %vm6442_vm4, %v2662_v7, %v2664_v49  ;;  %v2668_v4 = vsel %vm6443_vm1, %v2662_v7, %v2664_v49  ;;  %3068 = vmatpush1.bf16.msra.mxu0 %v2866_v39  ;;  %vm6448_vm6 = vmmov %vm6440_vm5  ;;  %v5953_v1 = vld [vmem:[#allocation2 + $0x10] sm:$0xff]  ;;  %v2750_v2 = vld [vmem:[#allocation2 + $0x58] sm:$0x33] }
 0x3f4   : > { %v2671_v28 = vrot.slane %v2668_v4, 4  ;;  %v2673_v55 = vsel %vm6438_vm2, %v2667_v11, %v2669_v24  ;;  %vm6447_vm2 = vcmask 97280   ;;  %vm6454_vm7 = vmmov %vm6448_vm6  ;;  %v4638_v8 = vcombine.high %v5953_v1, %v2750_v2  ;;  %v5960_v63 = vld [vmem:[#allocation2 + $0x8] sm:$0xff]  ;;  %v2749_v49 = vld [vmem:[#allocation2 + $0x50] sm:$0x33] }
 0x3f5   : > { %2658 = vst.msk [vmem:[#allocation2 + $0x34] sm:$0xf] %vm6440_vm5, %v4592_v17  ;;  %vm6449_vm5 = vmmov %vm6441_vm13  ;;  %v4808_v23 = vld [vmem:[#allocation2 + $0x2c] ss:$72 sps:$4 sm:$0x3f]   ;;  %v4637_v4 = vcombine.low %v5953_v1, %v2750_v2  ;;  %v5976_v39 = vld [vmem:[#allocation2 + $0x20] sm:$0xff] }
 0x3f6   : > { %2659 = vst.msk [vmem:[#allocation2 + $0x7c] sm:$0x3] %vm6441_vm13, %v4593_v22  ;;  %v2675_v52 = vsel %vm222_vm3, %v2673_v55, %v2671_v28  ;;  %v2689_v30 = vpop.permute.xlu1 %2688  ;;  %v2687_v18 = vpop.permute.xlu0 %2686  ;;  %4626 = vmatmul.mubr.msk.bf16.vlgmr.msra.gmra.mxu0 %vm6447_vm2, %v5846_v60  ;;  %vm6450_vm13 = vmmov %vm6442_vm4  ;;  %v4636_v22 = vcombine.high %v5960_v63, %v2749_v49  ;;  %v5970_v11 = vld [vmem:[%s6366_s2] sm:$0x3]  ;;  %v4635_v28 = vcombine.low %v5960_v63, %v2749_v49  ;;  %v5974_v55 = vld [vmem:[#allocation2 + $0x18] sm:$0xff] }
 0x3f7   : > { %v4594_v41 = vcombine.low %v2675_v52, %v2675_v52  ;;  %v4595_v47 = vcombine.high %v2675_v52, %v2675_v52  ;;  %v2692_v5 = vsel %vm6442_vm4, %v2687_v18, %v2689_v30  ;;  %v2693_v31 = vsel %vm6443_vm1, %v2687_v18, %v2689_v30  ;;  %3167 = vmatprep.mubr.bf16.mxu0 %v4879_v3  ;;  %vm6451_vm4 = vmmov %vm6443_vm1  ;;  %v2752_v52 = vld [vmem:[#allocation2 + $0x68] sm:$0x33]  ;;  %v2751_v30 = vld [vmem:[#allocation2 + $0x60] sm:$0x33] }
 0x3f8   : > { %v2696_v51 = vrot.slane %v2693_v31, 4  ;;  %v2698_v48 = vsel %vm6446_vm0, %v2692_v5, %v2694_v58  ;;  %vm6452_vm1 = vcmask 1045504   ;;  %vm6455_vm15 = vmmov %vm6449_vm5  ;;  %v4641_v5 = vcombine.low %v5976_v39, %v2752_v52  ;;  %v5993_v31 = vld [vmem:[#allocation2 + $0x28] sm:$0xff] }
 0x3f9   : > { %2683 = vst.msk [vmem:[#allocation2 + $0x38] sm:$0xf] %vm6448_vm6, %v4594_v41  ;;  %v4806_v9 = vld [vmem:[#allocation2 + $0x30] ss:$72 sps:$4 sm:$0x3f]   ;;  %vm6453_vm2 = vmmov %vm6452_vm1  ;;  %v4642_v41 = vcombine.high %v5976_v39, %v2752_v52 }
 0x3fa   : > { %2684 = vst.msk [vmem:[#allocation2 + $0x80] sm:$0x3] %vm6449_vm5, %v4595_v47  ;;  %v2700_v33 = vsel %vm222_vm3, %v2698_v48, %v2696_v51  ;;  %v2714_v54 = vpop.permute.xlu1 %2713  ;;  %v2712_v37 = vpop.permute.xlu0 %2711  ;;  %4627 = vmatprep.subr.msk.bf16.mxu1 %vm6452_vm1, %v4806_v9  ;;  %v2872_v26 = vsel %vm6453_vm2, %v4808_v23, 0  ;;  %vm6458_vm1 = vmmov %vm6449_vm5  ;;  %v4640_v47 = vcombine.high %v5974_v55, %v2751_v30  ;;  %v2753_v51 = vld [vmem:[#allocation2 + $0x70] sm:$0x33] }
 0x3fb   : > { %v4596_v21 = vcombine.low %v2700_v33, %v2700_v33  ;;  %v4597_v25 = vcombine.high %v2700_v33, %v2700_v33  ;;  %v2717_v32 = vsel %vm6450_vm13, %v2712_v37, %v2714_v54  ;;  %v2718_v12 = vsel %vm6451_vm4, %v2712_v37, %v2714_v54  ;;  %3109 = vmatpush1.bf16.msra.mxu1 %v2872_v26  ;;  %vm6457_vm4 = vmmov %vm6448_vm6  ;;  %v3673_v49 = vld [vmem:[#allocation2 + $0x68] sm:$0x33] }
 0x3fc   : > { %v2721_v29 = vrot.slane %v2718_v12, 4  ;;  %v2723_v59 = vsel %vm6446_vm0, %v2717_v32, %v2719_v45  ;;  %vm6456_vm13 = vcmask 97280   ;;  %vm6459_vm0 = vmmov %vm6453_vm2  ;;  %v5995_v48 = vld [vmem:[#allocation2 + $0x30] sm:$0xff]  ;;  %v4644_v54 = vcombine.high %v5993_v31, %v2753_v51 }
 0x3fd   : > { %2708 = vst.msk [vmem:[#allocation2 + $0x3c] sm:$0xf] %vm6448_vm6, %v4596_v21  ;;  %v4811_v19 = vld [vmem:[#allocation2 + $0x34] ss:$72 sps:$4 sm:$0x3f]   ;;  %vm6462_vm2 = vmmov %vm6456_vm13  ;;  %v4643_v37 = vcombine.low %v5993_v31, %v2753_v51 }
 0x3fe   : > { %2709 = vst.msk [vmem:[#allocation2 + $0x84] sm:$0x3] %vm6449_vm5, %v4597_v25  ;;  %v2725_v36 = vsel %vm222_vm3, %v2723_v59, %v2721_v29  ;;  %4628 = vmatmul.mubr.msk.bf16.vlgmr.msra.gmra.mxu1 %vm6456_vm13, %v5846_v60  ;;  %vm6463_vm6 = vmmov %vm6459_vm0  ;;  %v2754_v9 = vld [vmem:[#allocation2 + $0x78] sm:$0x33]  ;;  %v3670_v12 = vld [vmem:[#allocation2 + $0x50] sm:$0x33] }
 0x3ff   : > { %2737 = vst.msk [vmem:[#allocation2 + $0x44] sm:$0xf] %vm6454_vm7, %v4596_v21  ;;  %v4598_v0 = vcombine.low %v2725_v36, %v2725_v36  ;;  %v4599_v34 = vcombine.high %v2725_v36, %v2725_v36  ;;  %3208 = vmatprep.mubr.bf16.mxu1 %v4879_v3  ;;  %vm6460_vm7 = vmmov %vm6459_vm0  ;;  %v3285_v56 = vsel %vm6463_vm6, %v4814_v42, 0  ;;  %v4646_v45 = vcombine.high %v5995_v48, %v2754_v9 }
 0x400   : > { %2738 = vst.msk [vmem:[#allocation2 + $0x8c] sm:$0x3] %vm6455_vm15, %v4597_v25  ;;  %v2878_v43 = vsel %vm6460_vm7, %v4811_v19, 0  ;;  %vm6461_vm15 = vmmov %vm6459_vm0  ;;  %v4645_v21 = vcombine.low %v5995_v48, %v2754_v9  ;;  %v4667_v36 = vcombine.high %v5960_v63, %v3670_v12  ;;  %v3672_v19 = vld [vmem:[#allocation2 + $0x60] sm:$0x33] }
 0x401   : > { %v4809_v40 = vld [vmem:[#allocation2 + $0x38] ss:$72 sps:$4 sm:$0x3f]   ;;  %2733 = vst.msk [vmem:[#allocation2 + $0x40] sm:$0xf] %vm6457_vm4, %v4598_v0  ;;  %vm6464_vm5 = vmmov %vm6459_vm0  ;;  %v4671_v2 = vcombine.high %v5974_v55, %v3672_v19 }
 0x402   : > { %2734 = vst.msk [vmem:[#allocation2 + $0x88] sm:$0x3] %vm6458_vm1, %v4599_v34  ;;  %4629 = vmatprep.subr.msk.bf16.mxu0 %vm6459_vm0, %v4809_v40  ;;  %vm6465_vm13 = vmmov %vm6459_vm0  ;;  %v4666_v34 = vcombine.low %v5960_v63, %v3670_v12  ;;  %v3671_v40 = vld [vmem:[#allocation2 + $0x58] sm:$0x33]  ;;  %v4665_v63 = vld [vmem:[%s6366_s2 + $0x4] sm:$0x3] }
 0x403   : > { %3150 = vmatpush1.bf16.msra.mxu0 %v2878_v43  ;;  %vm6466_vm4 = vmmov %vm6459_vm0  ;;  %v4669_v42 = vcombine.high %v5953_v1, %v3671_v40 }
 0x404   : > { %4649 = vmatprep.subr.msk.bf16.mxu0 %vm6461_vm15, %v4812_v50  ;;  %vm6467_vm1 = vmmov %vm6459_vm0  ;;  %v6011_v25 = vld [vmem:[#allocation2 + $0x38] sm:$0xff] }
 0x405   : > { %v4818_v7 = vld [vmem:[#allocation2 + $0x3c] ss:$72 sps:$4 sm:$0x3f]   ;;  %vm6468_vm0 = vmmov %vm6462_vm2 }
 0x406   : > { %4630 = vmatmul.mubr.msk.bf16.vlgmr.msra.gmra.mxu0 %vm6462_vm2, %v5846_v60  ;;  %v2884_v17 = vsel %vm6466_vm4, %v4818_v7, 0  ;;  %vm6469_vm7 = vmmov %vm6468_vm0  ;;  %v2755_v32 = vld [vmem:[#allocation2 + $0x80] sm:$0x33] }
 0x407   : > { %3347 = vmatpush1.bf16.msra.mxu0 %v3285_v56  ;;  %3364 = vmatprep.mubr.bf16.mxu0 %v4879_v3  ;;  %vm6470_vm15 = vmmov %vm6467_vm1  ;;  %v4648_v26 = vcombine.high %v6011_v25, %v2755_v32  ;;  %v4647_v0 = vcombine.low %v6011_v25, %v2755_v32  ;;  %v4668_v56 = vcombine.low %v5953_v1, %v3671_v40 }
 0x408   : > { %4653 = vmatprep.subr.msk.bf16.mxu0 %vm6464_vm5, %v4638_v8  ;;  %v3297_v58 = vsel %vm6470_vm15, %v4637_v4, 0  ;;  %vm6471_vm2 = vmmov %vm6467_vm1  ;;  %v4670_v8 = vcombine.low %v5974_v55, %v3672_v19 }
 0x409   : > { %v4816_v24 = vld [vmem:[#allocation2 + $0x40] ss:$72 sps:$4 sm:$0x3f]   ;;  %v3291_v18 = vsel %vm6471_vm2, %v4635_v28, 0  ;;  %vm6472_vm6 = vmmov %vm6467_vm1  ;;  %v3675_v28 = vld [vmem:[#allocation2 + $0x78] sm:$0x33] }
 0x40a   : > { %4631 = vmatprep.subr.msk.bf16.mxu1 %vm6465_vm13, %v4816_v24  ;;  %vm6473_vm5 = vmmov %vm6467_vm1  ;;  %v3674_v24 = vld [vmem:[#allocation2 + $0x70] sm:$0x33] }
 0x40b   : > { %3191 = vmatpush1.bf16.msra.mxu1 %v2884_v17  ;;  %vm6474_vm13 = vmmov %vm6468_vm0  ;;  %v4675_v1 = vcombine.high %v5993_v31, %v3674_v24  ;;  %v4674_v4 = vcombine.low %v5993_v31, %v3674_v24  ;;  %v4848_v31 = vld [vmem:[#allocation2 + $0x40] ss:$72 sps:$4 sm:$0x3f]  }
 0x40c   : > { %4651 = vmatprep.subr.msk.bf16.mxu1 %vm6467_vm1, %v4636_v22  ;;  %vm6475_vm4 = vmmov %vm6468_vm0  ;;  %v4673_v22 = vcombine.high %v5976_v39, %v3673_v49 }
 0x40d   : > { %vm6479_vm2 = vmmov %vm6475_vm4 }
 0x40e   : > { %4632 = vmatmul.mubr.msk.bf16.vlgmr.msra.gmra.mxu1 %vm6468_vm0, %v5846_v60  ;;  %4650 = vmatmul.mubr.msk.bf16.vlgmr.msra.gmra.mxu0 %vm6469_vm7, %v5970_v11  ;;  %v4639_v60 = vcombine.low %v5974_v55, %v2751_v30  ;;  %vm6476_vm0 = vmmov %vm6467_vm1  ;;  %v3676_v55 = vld [vmem:[#allocation2 + $0x80] sm:$0x33] }
 0x40f   : > { %3429 = vmatpush1.bf16.msra.mxu0 %v3297_v58  ;;  %3388 = vmatpush1.bf16.msra.mxu1 %v3291_v18  ;;  %v3309_v33 = vsel %vm6476_vm0, %v4641_v5, 0  ;;  %vm6477_vm7 = vmmov %vm6476_vm0  ;;  %v4677_v58 = vcombine.high %v5995_v48, %v3675_v28  ;;  %v4679_v18 = vcombine.high %v6011_v25, %v3676_v55  ;;  %v4846_v5 = vld [vmem:[#allocation2 + $0x44] ss:$72 sps:$4 sm:$0x3f]  }
 0x410   : > { %4657 = vmatprep.subr.msk.bf16.mxu0 %vm6472_vm6, %v4642_v41  ;;  %4655 = vmatprep.subr.msk.bf16.mxu1 %vm6473_vm5, %v4640_v47  ;;  %v3303_v23 = vsel %vm6467_vm1, %v4639_v60, 0  ;;  %vm6478_vm15 = vmmov %vm6476_vm0  ;;  %v4678_v41 = vcombine.low %v6011_v25, %v3676_v55 }
 0x411   : > { %3405 = vmatprep.mubr.bf16.mxu1 %v4879_v3  ;;  %3446 = vmatprep.mubr.bf16.mxu0 %v4879_v3  ;;  %vm6480_vm6 = vmmov %vm6479_vm2 }
 0x412   : > { %vm6481_vm5 = vmmov %vm6476_vm0 }
 0x413   : > { %v3315_v29 = vsel %vm6481_vm5, %v4643_v37, 0  ;;  %vm6484_vm1 = vmmov %vm6476_vm0 }
 0x414   : > { %vm6490_vm5 = vmmov %vm6484_vm1  ;;  %v3752_v7 = vsel %vm6484_vm1, %v4668_v56, 0 }
 0x416   : > { %4652 = vmatmul.mubr.msk.bf16.vlgmr.msra.gmra.mxu1 %vm6474_vm13, %v5970_v11  ;;  %4654 = vmatmul.mubr.msk.bf16.vlgmr.msra.gmra.mxu0 %vm6475_vm4, %v5970_v11  ;;  %vm6482_vm13 = vmmov %vm6476_vm0 }
 0x417   : > { %3470 = vmatpush1.bf16.msra.mxu1 %v3303_v23  ;;  %3511 = vmatpush1.bf16.msra.mxu0 %v3309_v33  ;;  %v3321_v59 = vsel %vm6482_vm13, %v4645_v21, 0  ;;  %vm6483_vm4 = vmmov %vm6476_vm0 }
 0x418   : > { %4659 = vmatprep.subr.msk.bf16.mxu1 %vm6477_vm7, %v4644_v54  ;;  %4661 = vmatprep.subr.msk.bf16.mxu0 %vm6478_vm15, %v4646_v45  ;;  %vm6485_vm0 = vmmov %vm6479_vm2 }
 0x419   : > { %3487 = vmatprep.mubr.bf16.mxu1 %v4879_v3  ;;  %3528 = vmatprep.mubr.bf16.mxu0 %v4879_v3  ;;  %vm6486_vm7 = vmmov %vm6485_vm0 }
 0x41a   : > { %vm6487_vm15 = vmmov %vm6484_vm1 }
 0x41b   : > { %v3327_v50 = vsel %vm6487_vm15, %v4647_v0, 0  ;;  %vm6491_vm13 = vmmov %vm6485_vm0 }
 0x41e   : > { %4656 = vmatmul.mubr.msk.bf16.vlgmr.msra.gmra.mxu1 %vm6479_vm2, %v5970_v11  ;;  %4658 = vmatmul.mubr.msk.bf16.vlgmr.msra.gmra.mxu0 %vm6480_vm6, %v5970_v11  ;;  %vm6488_vm2 = vmmov %vm6484_vm1 }
 0x41f   : > { %3552 = vmatpush1.bf16.msra.mxu1 %v3315_v29  ;;  %3593 = vmatpush1.bf16.msra.mxu0 %v3321_v59  ;;  %v3746_v43 = vsel %vm6488_vm2, %v4666_v34, 0  ;;  %vm6489_vm6 = vmmov %vm6484_vm1 }
 0x420   : > { %4663 = vmatprep.subr.msk.bf16.mxu1 %vm6483_vm4, %v4648_v26  ;;  %4682 = vmatprep.subr.msk.bf16.mxu0 %vm6484_vm1, %v4667_v36  ;;  %vm6492_vm4 = vmmov %vm6485_vm0 }
 0x421   : > { %3569 = vmatprep.mubr.bf16.mxu1 %v4879_v3  ;;  %3610 = vmatprep.mubr.bf16.mxu0 %v4879_v3  ;;  %vm6496_vm2 = vmmov %vm6492_vm4 }
 0x426   : > { %4660 = vmatmul.mubr.msk.bf16.vlgmr.msra.gmra.mxu1 %vm6485_vm0, %v5970_v11  ;;  %4662 = vmatmul.mubr.msk.bf16.vlgmr.msra.gmra.mxu0 %vm6486_vm7, %v5970_v11  ;;  %vm6493_vm0 = vmmov %vm6484_vm1 }
 0x427   : > { %3634 = vmatpush1.bf16.msra.mxu1 %v3327_v50  ;;  %3808 = vmatpush1.bf16.msra.mxu0 %v3746_v43  ;;  %v3758_v17 = vsel %vm6493_vm0, %v4670_v8, 0  ;;  %vm6494_vm7 = vmmov %vm6493_vm0 }
 0x428   : > { %4684 = vmatprep.subr.msk.bf16.mxu1 %vm6489_vm6, %v4669_v42  ;;  %4686 = vmatprep.subr.msk.bf16.mxu0 %vm6490_vm5, %v4671_v2  ;;  %vm6495_vm15 = vmmov %vm6493_vm0 }
 0x429   : > { %3651 = vmatprep.mubr.bf16.mxu1 %v4879_v3  ;;  %3825 = vmatprep.mubr.bf16.mxu0 %v4879_v3  ;;  %vm6497_vm6 = vmmov %vm6496_vm2 }
 0x42a   : > { %vm6498_vm5 = vmmov %vm6493_vm0 }
 0x42b   : > { %vm6501_vm1 = vmmov %vm6493_vm0 }
 0x42e   : > { %4664 = vmatmul.mubr.msk.bf16.vlgmr.msra.gmra.mxu1 %vm6491_vm13, %v5970_v11  ;;  %4683 = vmatmul.mubr.msk.bf16.vlgmr.msra.gmra.mxu0 %vm6492_vm4, %v4665_v63  ;;  %v4672_v11 = vcombine.low %v5976_v39, %v3673_v49  ;;  %vm6499_vm13 = vmmov %vm6493_vm0  ;;  %v4676_v39 = vcombine.low %v5995_v48, %v3675_v28 }
 0x42f   : > { %3849 = vmatpush1.bf16.msra.mxu1 %v3752_v7  ;;  %3890 = vmatpush1.bf16.msra.mxu0 %v3758_v17  ;;  %v3770_v30 = vsel %vm6499_vm13, %v4674_v4, 0  ;;  %vm6500_vm4 = vmmov %vm6493_vm0 }
 0x430   : > { %4688 = vmatprep.subr.msk.bf16.mxu1 %vm6494_vm7, %v4673_v22  ;;  %4690 = vmatprep.subr.msk.bf16.mxu0 %vm6495_vm15, %v4675_v1  ;;  %v3764_v52 = vsel %vm6498_vm5, %v4672_v11, 0  ;;  %vm6502_vm0 = vmmov %vm6496_vm2 }
 0x431   : > { %3866 = vmatprep.mubr.bf16.mxu1 %v4879_v3  ;;  %3907 = vmatprep.mubr.bf16.mxu0 %v4879_v3  ;;  %vm6503_vm7 = vmmov %vm6502_vm0 }
 0x432   : > { %vm6504_vm15 = vmmov %vm6501_vm1 }
 0x433   : > { %v3776_v47 = vsel %vm6504_vm15, %v4676_v39, 0  ;;  %vm6507_vm5 = vmmov %vm6502_vm0  ;;  %vm6513_vm15 = vcmp.eq.s32.totalorder %v5408_v44, 1 }
 0x434   : > { %vm6508_vm13 = vmmov %vm6502_vm0 }
 0x436   : > { %4685 = vmatmul.mubr.msk.bf16.vlgmr.msra.gmra.mxu1 %vm6496_vm2, %v4665_v63  ;;  %4687 = vmatmul.mubr.msk.bf16.vlgmr.msra.gmra.mxu0 %vm6497_vm6, %v4665_v63  ;;  %vm6505_vm2 = vmmov %vm6501_vm1 }
 0x437   : > { %3931 = vmatpush1.bf16.msra.mxu1 %v3764_v52  ;;  %3972 = vmatpush1.bf16.msra.mxu0 %v3770_v30  ;;  %v3782_v60 = vsel %vm6505_vm2, %v4678_v41, 0  ;;  %vm6506_vm6 = vmmov %vm6501_vm1  ;;  %vm6514_vm2 = vcmp.eq.s32.totalorder %v5454_v38, 1 }
 0x438   : > { %4692 = vmatprep.subr.msk.bf16.mxu1 %vm6500_vm4, %v4677_v58  ;;  %4694 = vmatprep.subr.msk.bf16.mxu0 %vm6501_vm1, %v4679_v18  ;;  %vm6509_vm4 = vmmov %vm6501_vm1 }
 0x439   : > { %3948 = vmatprep.mubr.bf16.mxu1 %v4879_v3  ;;  %3989 = vmatprep.mubr.bf16.mxu0 %v4879_v3  ;;  %v3788_v51 = vsel %vm6509_vm4, %v4848_v31, 0  ;;  %vm6510_vm1 = vmmov %vm6502_vm0  ;;  %vm6518_vm4 = vcmp.eq.s32.totalorder %v5510_v14, 1 }
 0x43e   : > { %4689 = vmatmul.mubr.msk.bf16.vlgmr.msra.gmra.mxu1 %vm6502_vm0, %v4665_v63  ;;  %4691 = vmatmul.mubr.msk.bf16.vlgmr.msra.gmra.mxu0 %vm6503_vm7, %v4665_v63  ;;  %vm6511_vm0 = vcmp.eq.s32.totalorder %v5391_v57, 1  ;;  %vm6512_vm7 = vcmp.eq.s32.totalorder %v5437_v35, 1 }
 0x43f   : > { %4013 = vmatpush1.bf16.msra.mxu1 %v3776_v47  ;;  %4054 = vmatpush1.bf16.msra.mxu0 %v3782_v60 }
 0x440   : > { %4696 = vmatprep.subr.msk.bf16.mxu1 %vm6506_vm6, %v4846_v5  ;;  %4030 = vmatprep.mubr.bf16.mxu1 %v4879_v3  ;;  %vm6515_vm6 = vcmp.eq.s32.totalorder %v5449_v15, 1 }
 0x441   : > { %4071 = vmatprep.mubr.bf16.mxu0 %v4879_v3 }
 0x446   : > { %4693 = vmatmul.mubr.msk.bf16.vlgmr.msra.gmra.mxu1 %vm6507_vm5, %v4665_v63  ;;  %4695 = vmatmul.mubr.msk.bf16.vlgmr.msra.gmra.mxu0 %vm6508_vm13, %v4665_v63  ;;  %vm6516_vm5 = vcmp.eq.s32.totalorder %v5493_v20, 1  ;;  %vm6517_vm13 = vcmp.eq.s32.totalorder %v5468_v46, 1 }
 0x447   : > { %4095 = vmatpush1.bf16.msra.mxu1 %v3788_v51  ;;  %4112 = vmatprep.mubr.bf16.mxu1 %v4879_v3 }
 0x44e   : > { %4697 = vmatmul.mubr.msk.bf16.vlgmr.msra.gmra.mxu1 %vm6510_vm1, %v4665_v63  ;;  %vm6519_vm1 = vcmp.eq.s32.totalorder %v5505_v16, 1 }
 0x498   : > { %v2923_v48 = vpop.f32.mrf.mxu0 }
 0x49a   : > { %v2925_v9 = vpop.f32.mrf.mxu0 }
 0x49c   : > { %v2927_v23 = vpop.f32.mrf.mxu0 }
 0x49e   : > { %v2928_v33 = vpop.f32.mrf.mxu0  ;;  %v6081_v54 = vpop.f32.mrf.mxu1 }
 0x4a0   : > { %v6083_v45 = vpop.f32.mrf.mxu1 }
 0x4a2   : > { %v2968_v37 = vpop.f32.mrf.mxu1 }
 0x4a4   : > { %v2969_v21 = vpop.f32.mrf.mxu1 }
 0x4a6   : > { %v6085_v25 = vpop.f32.mrf.mxu0 }
 0x4a8   : > { %v6087_v32 = vpop.f32.mrf.mxu0 }
 0x4aa   : > { %v3009_v12 = vpop.f32.mrf.mxu0 }
 0x4ac   : > { %v3010_v29 = vpop.f32.mrf.mxu0 }
 0x4ae   : > { %v6089_v59 = vpop.f32.mrf.mxu1 }
 0x4b0   : > { %v6091_v3 = vpop.f32.mrf.mxu1 }
 0x4b2   : > { %v3050_v26 = vpop.f32.mrf.mxu1 }
 0x4b4   : > { %v3051_v36 = vpop.f32.mrf.mxu1 }
 0x4b6   : > { %v6093_v0 = vpop.f32.mrf.mxu0 }
 0x4b8   : > { %v6095_v34 = vpop.f32.mrf.mxu0 }
 0x4ba   : > { %v3091_v40 = vpop.f32.mrf.mxu0 }
 0x4bc   : > { %v3092_v19 = vpop.f32.mrf.mxu0 }
 0x4be   : > { %v6097_v50 = vpop.f32.mrf.mxu1 }
 0x4c0   : > { %v6099_v43 = vpop.f32.mrf.mxu1 }
 0x4c2   : > { %v3132_v42 = vpop.f32.mrf.mxu1 }
 0x4c4   : > { %v3133_v2 = vpop.f32.mrf.mxu1 }
 0x4c6   : > { %v6101_v56 = vpop.f32.mrf.mxu0 }
 0x4c8   : > { %v6103_v8 = vpop.f32.mrf.mxu0 }
 0x4ca   : > { %v3173_v63 = vpop.f32.mrf.mxu0 }
 0x4cc   : > { %v3174_v49 = vpop.f32.mrf.mxu0 }
 0x4ce   : > { %v6105_v24 = vpop.f32.mrf.mxu1  ;;  %v3366_v7 = vpop.f32.mrf.mxu0 }
 0x4d0   : > { %v6107_v17 = vpop.f32.mrf.mxu1  ;;  %v3368_v22 = vpop.f32.mrf.mxu0 }
 0x4d2   : > { %v3214_v1 = vpop.f32.mrf.mxu1  ;;  %v3370_v11 = vpop.f32.mrf.mxu0 }
 0x4d3   : > { %v3367_v1 = vadd.f32 %v3366_v7, %v2923_v48  ;;  %v3369_v11 = vadd.f32 %v3368_v22, %v2925_v9 }
 0x4d4   : > { %v3215_v4 = vpop.f32.mrf.mxu1  ;;  %v3371_v28 = vpop.f32.mrf.mxu0 }
 0x4d6   : > { %v3407_v55 = vpop.f32.mrf.mxu1  ;;  %v3448_v52 = vpop.f32.mrf.mxu0 }
 0x4d7   : > { %v3449_v48 = vadd.f32 %v3448_v52, %v6085_v25 }
 0x4d8   : > { %v3409_v30 = vpop.f32.mrf.mxu1  ;;  %v3450_v58 = vpop.f32.mrf.mxu0 }
 0x4da   : > { %v3411_v18 = vpop.f32.mrf.mxu1  ;;  %v3452_v39 = vpop.f32.mrf.mxu0 }
 0x4dc   : > { %v3412_v41 = vpop.f32.mrf.mxu1  ;;  %v3453_v47 = vpop.f32.mrf.mxu0 }
 0x4de   : > { %v3489_v60 = vpop.f32.mrf.mxu1  ;;  %v3530_v5 = vpop.f32.mrf.mxu0 }
 0x4e0   : > { %v3491_v31 = vpop.f32.mrf.mxu1  ;;  %v6109_v51 = vpop.f32.mrf.mxu0 }
 0x4e2   : > { %v3493_v23 = vpop.f32.mrf.mxu1  ;;  %v3534_v33 = vpop.f32.mrf.mxu0 }
 0x4e4   : > { %v3494_v37 = vpop.f32.mrf.mxu1  ;;  %v3535_v21 = vpop.f32.mrf.mxu0 }
 0x4e5   : > { %v3408_v21 = vadd.f32 %v3407_v55, %v6081_v54 }
 0x4e6   : > { %v6111_v12 = vpop.f32.mrf.mxu1  ;;  %v6113_v29 = vpop.f32.mrf.mxu0 }
 0x4e8   : > { %v6115_v26 = vpop.f32.mrf.mxu1  ;;  %v6117_v36 = vpop.f32.mrf.mxu0 }
 0x4ea   : > { %v3575_v40 = vpop.f32.mrf.mxu1  ;;  %v3616_v19 = vpop.f32.mrf.mxu0 }
 0x4eb   : > { %v3410_v19 = vadd.f32 %v3409_v30, %v6083_v45 }
 0x4ec   : > { %v3576_v42 = vpop.f32.mrf.mxu1  ;;  %v3617_v2 = vpop.f32.mrf.mxu0 }
 0x4ed   : > { %v3451_v42 = vadd.f32 %v3450_v58, %v6087_v32 }
 0x4ee   : > { %v6119_v63 = vpop.f32.mrf.mxu1  ;;  %v3827_v49 = vpop.f32.mrf.mxu0 }
 0x4ef   : > { %v6123_v18 = vadd.f32 %v3827_v49, %v3367_v1 }
 0x4f0   : > { %v6121_v4 = vpop.f32.mrf.mxu1  ;;  %v3829_v28 = vpop.f32.mrf.mxu0 }
 0x4f1   : > { %v6125_v39 = vadd.f32 %v3829_v28, %v3369_v11  ;;  %v4137_v9 = vsel %vm2137_vm9, %v6123_v18, 0.0 }
 0x4f2   : > { %v3657_v41 = vpop.f32.mrf.mxu1  ;;  %v3831_v47 = vpop.f32.mrf.mxu0  ;;  %v4153_v54 = vsel %vm222_vm3, %v4137_v9, 0.0 }
 0x4f3   : > { %v4138_v23 = vsel %vm2138_vm11, %v6125_v39, 0.0 }
 0x4f4   : > { %v3658_v33 = vpop.f32.mrf.mxu1  ;;  %v3832_v37 = vpop.f32.mrf.mxu0  ;;  %v4154_v7 = vsel %vm222_vm3, %v4138_v23, 0.0 }
 0x4f5   : > { %v4155_v52 = vadd.f32 %v4154_v7, %v4153_v54 }
 0x4f6   : > { %v3868_v22 = vpop.f32.mrf.mxu1  ;;  %v3909_v40 = vpop.f32.mrf.mxu0 }
 0x4f7   : > { %v6138_v2 = vadd.f32 %v3868_v22, %v3408_v21  ;;  %v6140_v49 = vadd.f32 %v3909_v40, %v3449_v48  ;;  %v3490_v21 = vadd.f32 %v3489_v60, %v6089_v59  ;;  %v3531_v48 = vadd.f32 %v3530_v5, %v6093_v0 }
 0x4f8   : > { %v3870_v55 = vpop.f32.mrf.mxu1  ;;  %v3911_v25 = vpop.f32.mrf.mxu0  ;;  %v3533_v59 = vadd.f32 %v6109_v51, %v6095_v34 }
 0x4f9   : > { %v4139_v1 = vsel %vm2139_vm10, %v6138_v2, 0.0  ;;  %v6146_v11 = vadd.f32 %v3870_v55, %v3410_v19  ;;  %v6148_v28 = vadd.f32 %v3911_v25, %v3451_v42  ;;  %v4141_v41 = vsel %vm2141_vm14, %v6140_v49, 0.0 }
 0x4fa   : > { %v4156_v45 = vsel %vm222_vm3, %v4139_v1, 0.0  ;;  %v3872_v32 = vpop.f32.mrf.mxu1  ;;  %v3913_v30 = vpop.f32.mrf.mxu0  ;;  %v4160_v22 = vsel %vm222_vm3, %v4141_v41, 0.0  ;;  %v3492_v42 = vadd.f32 %v3491_v31, %v6091_v3 }
 0x4fb   : > { %v4157_v58 = vadd.f32 %v4156_v45, %v4155_v52  ;;  %v4140_v47 = vsel %vm2140_vm12, %v6146_v11, 0.0  ;;  %v4142_v7 = vsel %vm2142_vm8, %v6148_v28, 0.0 }
 0x4fc   : > { %v4158_v23 = vsel %vm222_vm3, %v4140_v47, 0.0  ;;  %v3873_v33 = vpop.f32.mrf.mxu1  ;;  %v3914_v37 = vpop.f32.mrf.mxu0  ;;  %v4162_v0 = vsel %vm222_vm3, %v4142_v7, 0.0 }
 0x4fd   : > { %v4159_v9 = vadd.f32 %v4158_v23, %v4157_v58  ;;  %v3572_v33 = vadd.f32 %v6111_v12, %v6097_v50  ;;  %v3613_v37 = vadd.f32 %v6113_v29, %v6101_v56  ;;  %v3615_v50 = vadd.f32 %v6117_v36, %v6103_v8 }
 0x4fe   : > { %v3950_v40 = vpop.f32.mrf.mxu1  ;;  %v3991_v19 = vpop.f32.mrf.mxu0 }
 0x4ff   : > { %v4161_v54 = vadd.f32 %v4160_v22, %v4159_v9  ;;  %v6165_v55 = vadd.f32 %v3950_v40, %v3490_v21  ;;  %v6167_v25 = vadd.f32 %v3991_v19, %v3531_v48  ;;  %v3574_v40 = vadd.f32 %v6115_v26, %v6099_v43 }
 0x500   : > { %v3952_v60 = vpop.f32.mrf.mxu1  ;;  %v3993_v5 = vpop.f32.mrf.mxu0 }
 0x501   : > { %v4163_v52 = vadd.f32 %v4162_v0, %v4161_v54  ;;  %v4143_v1 = vsel %vm6511_vm0, %v6165_v55, 0.0  ;;  %v6175_v45 = vadd.f32 %v3952_v60, %v3492_v42  ;;  %v6178_v31 = vadd.f32 %v3993_v5, %v3533_v59 }
 0x502   : > { %v4164_v3 = vsel %vm222_vm3, %v4143_v1, 0.0  ;;  %v3954_v32 = vpop.f32.mrf.mxu1  ;;  %v3995_v30 = vpop.f32.mrf.mxu0  ;;  %v4145_v34 = vsel %vm6512_vm7, %v6167_v25, 0.0  ;;  %vm6520_vm0 = vcmp.eq.s32.totalorder %v5524_v10, 1 }
 0x503   : > { %v4165_v58 = vadd.f32 %v4164_v3, %v4163_v52  ;;  %v4144_v51 = vsel %vm6513_vm15, %v6175_v45, 0.0  ;;  %v4146_v48 = vsel %vm6514_vm2, %v6178_v31, 0.0  ;;  %v4168_v9 = vsel %vm222_vm3, %v4145_v34, 0.0 }
 0x504   : > { %v4166_v41 = vsel %vm222_vm3, %v4144_v51, 0.0  ;;  %v3955_v47 = vpop.f32.mrf.mxu1  ;;  %v3996_v23 = vpop.f32.mrf.mxu0  ;;  %v4170_v56 = vsel %vm222_vm3, %v4146_v48, 0.0 }
 0x505   : > { %v4167_v21 = vadd.f32 %v4166_v41, %v4165_v58  ;;  %v3654_v58 = vadd.f32 %v6119_v63, %v6105_v24  ;;  %v3656_v23 = vadd.f32 %v6121_v4, %v6107_v17 }
 0x506   : > { %v4032_v7 = vpop.f32.mrf.mxu1  ;;  %v4073_v22 = vpop.f32.mrf.mxu0 }
 0x507   : > { %v4169_v19 = vadd.f32 %v4168_v9, %v4167_v21  ;;  %v6197_v42 = vadd.f32 %v4032_v7, %v3572_v33  ;;  %v6199_v54 = vadd.f32 %v4073_v22, %v3613_v37 }
 0x508   : > { %v4034_v12 = vpop.f32.mrf.mxu1  ;;  %v4075_v29 = vpop.f32.mrf.mxu0 }
 0x509   : > { %v4171_v59 = vadd.f32 %v4170_v56, %v4169_v19  ;;  %v4147_v0 = vsel %vm6515_vm6, %v6197_v42, 0.0  ;;  %v6207_v60 = vadd.f32 %v4034_v12, %v3574_v40  ;;  %v6210_v26 = vadd.f32 %v4075_v29, %v3615_v50 }
 0x50a   : > { %v4172_v43 = vsel %vm222_vm3, %v4147_v0, 0.0  ;;  %v4036_v5 = vpop.f32.mrf.mxu1  ;;  %v4077_v52 = vpop.f32.mrf.mxu0  ;;  %v4149_v8 = vsel %vm6516_vm5, %v6199_v54, 0.0 }
 0x50b   : > { %v4173_v1 = vadd.f32 %v4172_v43, %v4171_v59  ;;  %v4148_v36 = vsel %vm6517_vm13, %v6207_v60, 0.0  ;;  %v4150_v51 = vsel %vm6518_vm4, %v6210_v26, 0.0  ;;  %v4176_v41 = vsel %vm222_vm3, %v4149_v8, 0.0 }
 0x50c   : > { %v4174_v3 = vsel %vm222_vm3, %v4148_v36, 0.0  ;;  %v4037_v32 = vpop.f32.mrf.mxu1  ;;  %v4078_v30 = vpop.f32.mrf.mxu0  ;;  %v4178_v21 = vsel %vm222_vm3, %v4150_v51, 0.0 }
 0x50d   : > { %v4175_v34 = vadd.f32 %v4174_v3, %v4173_v1 }
 0x50e   : > { %v4114_v47 = vpop.f32.mrf.mxu1 }
 0x50f   : > { %v4177_v33 = vadd.f32 %v4176_v41, %v4175_v34  ;;  %v6227_v37 = vadd.f32 %v4114_v47, %v3654_v58 }
 0x510   : > { %v4116_v48 = vpop.f32.mrf.mxu1 }
 0x511   : > { %v4179_v9 = vadd.f32 %v4178_v21, %v4177_v33  ;;  %v4151_v24 = vsel %vm6519_vm1, %v6227_v37, 0.0  ;;  %v6233_v63 = vadd.f32 %v4116_v48, %v3656_v23 }
 0x512   : > { %v4180_v7 = vsel %vm222_vm3, %v4151_v24, 0.0  ;;  %v4118_v22 = vpop.f32.mrf.mxu1 }
 0x513   : > { %v4152_v17 = vsel %vm6520_vm0, %v6233_v63, 0.0  ;;  %v4181_v4 = vadd.f32 %v4180_v7, %v4179_v9 }
 0x514   : > { %v4119_v40 = vpop.f32.mrf.mxu1  ;;  %v4182_v19 = vsel %vm222_vm3, %v4152_v17, 0.0 }
 0x515   : > { %v4183_v50 = vadd.f32 %v4182_v19, %v4181_v4 }
 0x517   : > { %4184 = vadd.xlane.f32.xlu0 %v4183_v50 }
 0x5a0   : > { %v4185_v56 = vpop.xlane.xlu0 %4184 }
 0x5a1   : > { %v4186_v12 = vmul.f32 0.00390625, %v4185_v56 }
 0x5a3   : > { %v6241_v29 = vsub.f32 %v6123_v18, %v4186_v12  ;;  %v6244_v59 = vsub.f32 %v6125_v39, %v4186_v12  ;;  %v6247_v0 = vsub.f32 %v6138_v2, %v4186_v12  ;;  %v6250_v43 = vsub.f32 %v6146_v11, %v4186_v12 }
 0x5a4   : > { %v6259_v18 = vsub.f32 %v6140_v49, %v4186_v12  ;;  %v6265_v11 = vsub.f32 %v6148_v28, %v4186_v12  ;;  %v6271_v62 = vsub.f32 %v6165_v55, %v4186_v12  ;;  %v6279_v28 = vsub.f32 %v6175_v45, %v4186_v12 }
 0x5a5   : > { %v4203_v5 = vsel %vm2137_vm9, %v6241_v29, 0.0  ;;  %v4204_v52 = vsel %vm2138_vm11, %v6244_v59, 0.0  ;;  %v4205_v39 = vsel %vm2139_vm10, %v6247_v0, 0.0  ;;  %v4206_v53 = vsel %vm2140_vm12, %v6250_v43, 0.0  ;;  %vm6522_vm10 = vmmov %vm6513_vm15 }
 0x5a6   : > { %v4219_v2 = vmul.f32 %v4203_v5, %v4203_v5  ;;  %v4220_v1 = vmul.f32 %v4204_v52, %v4204_v52  ;;  %v4221_v8 = vmul.f32 %v4205_v39, %v4205_v39  ;;  %v4207_v49 = vsel %vm2141_vm14, %v6259_v18, 0.0  ;;  %vm6523_vm11 = vmmov %vm6512_vm7 }
 0x5a7   : > { %v4222_v36 = vmul.f32 %v4206_v53, %v4206_v53  ;;  %v4208_v13 = vsel %vm2142_vm8, %v6265_v11, 0.0  ;;  %v4223_v30 = vmul.f32 %v4207_v49, %v4207_v49  ;;  %v6286_v58 = vsub.f32 %v6167_v25, %v4186_v12  ;;  %vm6524_vm12 = vmmov %vm6514_vm2 }
 0x5a8   : > { %v4235_v61 = vsel %vm222_vm3, %v4219_v2, 0.0  ;;  %v4236_v3 = vsel %vm222_vm3, %v4220_v1, 0.0  ;;  %v4238_v55 = vsel %vm222_vm3, %v4221_v8, 0.0  ;;  %vm6521_vm9 = vcmp.eq.s32.totalorder %v5391_v57, 1  ;;  %vm6525_vm14 = vmmov %vm6515_vm6 }
 0x5a9   : > { %v4237_v32 = vadd.f32 %v4236_v3, %v4235_v61  ;;  %v4209_v27 = vsel %vm6521_vm9, %v6271_v62, 0.0  ;;  %v4224_v51 = vmul.f32 %v4208_v13, %v4208_v13  ;;  %v4240_v45 = vsel %vm222_vm3, %v4222_v36, 0.0  ;;  %vm6526_vm8 = vmmov %vm6517_vm13 }
 0x5aa   : > { %v4196_v41 = vsub.f32 %v6178_v31, %v4186_v12  ;;  %v4210_v6 = vsel %vm6522_vm10, %v6279_v28, 0.0  ;;  %v4225_v23 = vmul.f32 %v4209_v27, %v4209_v27  ;;  %v4242_v33 = vsel %vm222_vm3, %v4223_v30, 0.0  ;;  %vm6527_vm7 = vmmov %vm6516_vm5 }
 0x5ab   : > { %v4239_v34 = vadd.f32 %v4238_v55, %v4237_v32  ;;  %v4197_v25 = vsub.f32 %v6197_v42, %v4186_v12  ;;  %v4211_v57 = vsel %vm6523_vm11, %v6286_v58, 0.0  ;;  %v4226_v48 = vmul.f32 %v4210_v6, %v4210_v6  ;;  %vm6528_vm15 = vmmov %vm6518_vm4 }
 0x5ac   : > { %v4244_v9 = vsel %vm222_vm3, %v4224_v51, 0.0  ;;  %v4198_v31 = vsub.f32 %v6207_v60, %v4186_v12  ;;  %v4212_v44 = vsel %vm6524_vm12, %v4196_v41, 0.0  ;;  %v4227_v7 = vmul.f32 %v4211_v57, %v4211_v57  ;;  %vm6529_vm2 = vmmov %vm6519_vm1 }
 0x5ad   : > { %v4241_v47 = vadd.f32 %v4240_v45, %v4239_v34  ;;  %v4246_v22 = vsel %vm222_vm3, %v4225_v23, 0.0  ;;  %v4199_v17 = vsub.f32 %v6199_v54, %v4186_v12  ;;  %v4213_v42 = vsel %vm6525_vm14, %v4197_v25, 0.0  ;;  %vm6530_vm6 = vmmov %vm6520_vm0 }
 0x5ae   : > { %v4228_v4 = vmul.f32 %v4212_v44, %v4212_v44  ;;  %v4248_v40 = vsel %vm222_vm3, %v4226_v48, 0.0  ;;  %v4200_v19 = vsub.f32 %v6210_v26, %v4186_v12  ;;  %v4214_v60 = vsel %vm6526_vm8, %v4198_v31, 0.0 }
 0x5af   : > { %v4243_v21 = vadd.f32 %v4242_v33, %v4241_v47  ;;  %v4229_v50 = vmul.f32 %v4213_v42, %v4213_v42  ;;  %v4250_v56 = vsel %vm222_vm3, %v4227_v7, 0.0  ;;  %v4201_v5 = vsub.f32 %v6227_v37, %v4186_v12 }
 0x5b0   : > { %v4215_v54 = vsel %vm6527_vm7, %v4199_v17, 0.0  ;;  %v4230_v52 = vmul.f32 %v4214_v60, %v4214_v60  ;;  %v4252_v39 = vsel %vm222_vm3, %v4228_v4, 0.0  ;;  %v4202_v2 = vsub.f32 %v6233_v63, %v4186_v12 }
 0x5b1   : > { %v4245_v24 = vadd.f32 %v4244_v9, %v4243_v21  ;;  %v4216_v26 = vsel %vm6528_vm15, %v4200_v19, 0.0  ;;  %v4231_v1 = vmul.f32 %v4215_v54, %v4215_v54  ;;  %v4254_v53 = vsel %vm222_vm3, %v4229_v50, 0.0 }
 0x5b2   : > { %v4217_v8 = vsel %vm6529_vm2, %v4201_v5, 0.0  ;;  %v4232_v49 = vmul.f32 %v4216_v26, %v4216_v26  ;;  %v4256_v20 = vsel %vm222_vm3, %v4230_v52, 0.0  ;;  %v4218_v36 = vsel %vm6530_vm6, %v4202_v2, 0.0 }
 0x5b3   : > { %v4247_v35 = vadd.f32 %v4246_v22, %v4245_v24  ;;  %v4233_v3 = vmul.f32 %v4217_v8, %v4217_v8  ;;  %v4258_v63 = vsel %vm222_vm3, %v4231_v1, 0.0  ;;  %v4234_v12 = vmul.f32 %v4218_v36, %v4218_v36 }
 0x5b4   : > { %v4260_v13 = vsel %vm222_vm3, %v4232_v49, 0.0  ;;  %vm4317_vm5 = vcmask 261120   ;;  %vm4319_vm13 = vcmask 392192   ;;  %vm4321_vm4 = vcmask 523264  }
 0x5b5   : > { %v4249_v38 = vadd.f32 %v4248_v40, %v4247_v35  ;;  %v4262_v30 = vsel %vm222_vm3, %v4233_v3, 0.0  ;;  %v4264_v55 = vsel %vm222_vm3, %v4234_v12, 0.0  ;;  %vm4315_vm3 = vcmask 130048  }
 0x5b6   : > { %vm4323_vm1 = vcmask 654336   ;;  %vm4325_vm0 = vcmask 785408   ;;  %vm4327_vm9 = vcmask 916480  }
 0x5b7   : > { %v4251_v15 = vadd.f32 %v4250_v56, %v4249_v38 }
 0x5b9   : > { %v4253_v46 = vadd.f32 %v4252_v39, %v4251_v15  ;;  %v4367_v39 = vld [vmem:[%s4926_s20 + $0x4] sm:$0xf] }
 0x5bb   : > { %v4255_v37 = vadd.f32 %v4254_v53, %v4253_v46 }
 0x5bd   : > { %v4257_v61 = vadd.f32 %v4256_v20, %v4255_v37 }
 0x5bf   : > { %v4259_v14 = vadd.f32 %v4258_v63, %v4257_v61 }
 0x5c1   : > { %v4261_v32 = vadd.f32 %v4260_v13, %v4259_v14 }
 0x5c3   : > { %v4263_v16 = vadd.f32 %v4262_v30, %v4261_v32 }
 0x5c5   : > { %v4265_v27 = vadd.f32 %v4264_v55, %v4263_v16 }
 0x5c7   : > { %4266 = vadd.xlane.f32.xlu1 %v4265_v27 }
 0x650   : > { %v4267_v34 = vpop.xlane.xlu1 %4266 }
 0x651   : > { %v4268_v51 = vmul.f32 0.00390625, %v4267_v34 }
 0x653   : > { %v4269_v10 = vadd.f32 1e-05, %v4268_v51 }
 0x655   : > { %4851 = vrsqrt.f32 %v4269_v10 }
 0x662   : > { %v4852_v45 = vpop.eup %4851 }
 0x663   : > { %v4280_v6 = vmul.f32 %v4852_v45, %v4196_v41  ;;  %v4272_v47 = vmul.f32 %v4852_v45, %v6244_v59  ;;  %v4281_v23 = vmul.f32 %v4852_v45, %v4197_v25  ;;  %v4273_v33 = vmul.f32 %v4852_v45, %v6247_v0 }
 0x664   : > { %v4282_v57 = vmul.f32 %v4852_v45, %v4198_v31  ;;  %v4274_v21 = vmul.f32 %v4852_v45, %v6250_v43  ;;  %v4283_v41 = vmul.f32 %v4852_v45, %v4199_v17  ;;  %v4275_v59 = vmul.f32 %v4852_v45, %v6259_v18 }
 0x665   : > { %4333 = vrot.lane.b32.xlu1 %v4280_v6, %s4884_s17  ;;  %4288 = vrot.lane.b32.xlu0 %v4272_v47, %s4884_s17  ;;  %v4284_v25 = vmul.f32 %v4852_v45, %v4200_v19  ;;  %v4276_v0 = vmul.f32 %v4852_v45, %v6265_v11  ;;  %v4285_v48 = vmul.f32 %v4852_v45, %v4201_v5  ;;  %s6531_s17 = sshll.u32 %s6533_s16, 3 }
 0x666   : > { %v4277_v43 = vmul.f32 %v4852_v45, %v6271_v62  ;;  %v4286_v9 = vmul.f32 %v4852_v45, %v4202_v2  ;;  %v4278_v18 = vmul.f32 %v4852_v45, %v6279_v28  ;;  %v4279_v4 = vmul.f32 %v4852_v45, %v6286_v58  ;;  %v4329_v2 = vld [vmem:[%s4926_s20] sm:$0xf] }
 0x667   : > { %v4271_v40 = vmul.f32 %v4852_v45, %v6241_v29 }
 0x669   : > { %4337 = vrot.lane.b32.xlu1 %v4281_v23, %s4882_s18  ;;  %4292 = vrot.lane.b32.xlu0 %v4273_v33, %s4882_s18 }
 0x66d   : > { %4341 = vrot.lane.b32.xlu1 %v4282_v57, %s4878_s12  ;;  %4296 = vrot.lane.b32.xlu0 %v4274_v21, %s4878_s12 }
 0x671   : > { %4345 = vrot.lane.b32.xlu1 %v4283_v41, %s4875_s9  ;;  %4300 = vrot.lane.b32.xlu0 %v4275_v59, %s4875_s9 }
 0x675   : > { %4349 = vrot.lane.b32.xlu1 %v4284_v25, %s4872_s6  ;;  %4304 = vrot.lane.b32.xlu0 %v4276_v0, %s4872_s6  ;;  %s197_s6 = scalar_lea.vmem %s6368_s4, %s6531_s17 }
 0x679   : > { %4353 = vrot.lane.b32.xlu1 %v4285_v48, %s4869_s29  ;;  %4308 = vrot.lane.b32.xlu0 %v4277_v43, %s4869_s29 }
 0x67d   : > { %4357 = vrot.lane.b32.xlu1 %v4286_v9, %s4866_s26  ;;  %4312 = vrot.lane.b32.xlu0 %v4278_v18, %s4866_s26 }
 0x6d7   : > { %v4334_v31 = vpop.permute.xlu1 %4333  ;;  %v4289_v11 = vpop.permute.xlu0 %4288 }
 0x6d8   : > { %v4360_v28 = vsel %vm4315_vm3, %v4279_v4, %v4334_v31  ;;  %v4316_v19 = vsel %vm4315_vm3, %v4271_v40, %v4289_v11 }
 0x6db   : > { %v4338_v44 = vpop.permute.xlu1 %4337  ;;  %v4293_v24 = vpop.permute.xlu0 %4292 }
 0x6dc   : > { %v4361_v60 = vsel %vm4317_vm5, %v4360_v28, %v4338_v44  ;;  %v4318_v38 = vsel %vm4317_vm5, %v4316_v19, %v4293_v24 }
 0x6df   : > { %v4342_v7 = vpop.permute.xlu1 %4341  ;;  %v4297_v22 = vpop.permute.xlu0 %4296 }
 0x6e0   : > { %v4362_v5 = vsel %vm4319_vm13, %v4361_v60, %v4342_v7  ;;  %v4320_v54 = vsel %vm4319_vm13, %v4318_v38, %v4297_v22 }
 0x6e3   : > { %v4346_v17 = vpop.permute.xlu1 %4345  ;;  %v4301_v42 = vpop.permute.xlu0 %4300 }
 0x6e4   : > { %v4363_v15 = vsel %vm4321_vm4, %v4362_v5, %v4346_v17  ;;  %v4322_v58 = vsel %vm4321_vm4, %v4320_v54, %v4301_v42 }
 0x6e7   : > { %v4350_v62 = vpop.permute.xlu1 %4349  ;;  %v4305_v35 = vpop.permute.xlu0 %4304 }
 0x6e8   : > { %v4364_v29 = vsel %vm4323_vm1, %v4363_v15, %v4350_v62  ;;  %v4324_v52 = vsel %vm4323_vm1, %v4322_v58, %v4305_v35 }
 0x6eb   : > { %v4354_v50 = vpop.permute.xlu1 %4353  ;;  %v4309_v56 = vpop.permute.xlu0 %4308 }
 0x6ec   : > { %v4365_v26 = vsel %vm4325_vm0, %v4364_v29, %v4354_v50  ;;  %v4326_v46 = vsel %vm4325_vm0, %v4324_v52, %v4309_v56 }
 0x6ef   : > { %v4358_v1 = vpop.permute.xlu1 %4357  ;;  %v4313_v53 = vpop.permute.xlu0 %4312 }
 0x6f0   : > { %v4366_v8 = vsel %vm4327_vm9, %v4365_v26, %v4358_v1  ;;  %v4328_v37 = vsel %vm4327_vm9, %v4326_v46, %v4313_v53 }
 0x6f1   : > { %v4368_v49 = vadd.f32 %v4367_v39, %v4366_v8  ;;  %v4330_v20 = vadd.f32 %v4329_v2, %v4328_v37 }
 0x6f3   : > { %4369 = vst [vmem:[%s197_s6 + $0x4] sm:$0xf] %v4368_v49  ;;  %4331 = vst [vmem:[%s197_s6] sm:$0xf] %v4330_v20 }
 0x6f4 PF: > { %s14_s15 = sadd.s32 1, %s4859_s15  }
 0x6f5   : > { %p11_p4 = scmp.ge.s32.totalorder %s14_s15, 4  }
 0x6f7   :  { %13 = sbr.rel (!%p11_p4) target bundleno = 1 (0x1), region = 70 }

</bundles_post_ra>
